<compile_context>
chip_gen: v7x
topology: tpu7x:2x2x1
jax: 0.10.0
libtpu: 0.0.40
codegen_flags: <defaults>
</compile_context>

<pallas_src>
import jax
import jax.numpy as jnp
from jax import lax
from jax.experimental import pallas as pl
from jax.experimental.pallas import tpu as pltpu

_SQRT_2_OVER_PI = 0.7978845608028654


# ------------------------------ in-kernel math ------------------------------
def _gelu(x):
    # TODO(synk): nn.GELU() is exact-erf GELU; tanh approximation used (|err| < 1e-3).
    return 0.5 * x * (1.0 + jnp.tanh(_SQRT_2_OVER_PI * (x + 0.044715 * x * x * x)))


def _layernorm_ch(x, g, b, eps=1e-5):
    # LayerNorm over the channel axis (axis=0) of a (C, tile) slab.
    mu = jnp.mean(x, axis=0, keepdims=True)
    var = jnp.mean((x - mu) ** 2, axis=0, keepdims=True)
    return (x - mu) * lax.rsqrt(var + eps) * g + b


def _l2n_ch(x, eps=1e-12):
    # matches torch.nn.functional.normalize(x, dim=1) in channel-first layout.
    n = jnp.sqrt(jnp.sum(x * x, axis=0, keepdims=True))
    return x / jnp.maximum(n, eps)


# ------------------------- conv1 epilogue (IN + GELU) ------------------------
def _norm_act_kernel(y_ref, stat_ref, o_ref):
    s = stat_ref[0]                                       # (C, 2): [rstd, -mu*rstd]
    y = y_ref[0].astype(jnp.float32)                      # (C, tile)
    o_ref[0] = _gelu(y * s[:, 0:1] + s[:, 1:2]).astype(jnp.bfloat16)


def _pick_tile(hw, max_tile=2048):
    tile = min(max_tile, 128 * ((hw + 127) // 128))
    hwp = ((hw + tile - 1) // tile) * tile
    return tile, hwp


def _pad_last(x, target):
    pad = target - x.shape[-1]
    if pad == 0:
        return x
    return jnp.pad(x, [(0, 0)] * (x.ndim - 1) + [(0, pad)])


def norm_act(y_flat, stats, max_tile=2048):
    """InstanceNorm-apply + GELU + bf16 cast, lane-dense, per (image, pixel-tile)."""
    B, C, HW = y_flat.shape
    tile, hwp = _pick_tile(HW, max_tile)
    yp = _pad_last(y_flat, hwp)
    out = pl.pallas_call(
        _norm_act_kernel,
        out_shape=jax.ShapeDtypeStruct((B, C, hwp), jnp.bfloat16),
        grid_spec=pltpu.PrefetchScalarGridSpec(
            num_scalar_prefetch=0,
            grid=(B, hwp // tile),
            in_specs=[
                pl.BlockSpec((1, C, tile), lambda b, i: (b, 0, i)),
                pl.BlockSpec((1, C, 2), lambda b, i: (b, 0, 0)),
            ],
            out_specs=pl.BlockSpec((1, C, tile), lambda b, i: (b, 0, i)),
        ),
        compiler_params=pltpu.CompilerParams(
            dimension_semantics=("parallel", "parallel")),
    )(yp, stats)
    return out[:, :, :HW]


# ---------------------- GripperGraspSampler fused kernel ---------------------
def _decoder(x1, x2_parts, Wmain_ref, Wside_ref, Wo_ref, vecs_ref):
    # att_res_mlp_LN_sparse(in_c1=64, in_c2=c2, out_c=2, use_sigmoid=True, activation=gelu)
    # TODO(synk): exact att_res_mlp_LN_sparse definition not provided; synthetic
    #             attention-gated residual MLP with LayerNorm used.
    vecs = vecs_ref[...]                                   # (64, 8) f32
    b_att, b1, g1, be1 = vecs[:, 0:1], vecs[:, 1:2], vecs[:, 2:3], vecs[:, 3:4]
    b2, g2, be2 = vecs[:, 4:5], vecs[:, 5:6], vecs[:, 6:7]
    bo = vecs[0:2, 7:8]                                    # (2, 1)
    Watt = Wside_ref[0]                                    # (64, c2) f32
    W1b = Wside_ref[1]                                     # (64, c2) f32

    # attention gate: tiny c2-contraction done as VPU rank-1 FMAs (keeps MXU free)
    att = b_att
    off = 0
    for part in x2_parts:
        for j in range(part.shape[0]):
            att = att + Watt[:, off + j:off + j + 1] * part[j:j + 1, :]
        off += part.shape[0]
    att = jax.nn.sigmoid(att)
    xg = (x1 * att).astype(jnp.bfloat16)

    # Linear on cat([x, x2]): 64x64 part on the MXU (bf16, f32 acc), x2 part as FMAs
    h = jnp.dot(Wmain_ref[0], xg, preferred_element_type=jnp.float32) + b1
    off = 0
    for part in x2_parts:
        for j in range(part.shape[0]):
            h = h + W1b[:, off + j:off + j + 1] * part[j:j + 1, :]
        off += part.shape[0]
    h = _gelu(_layernorm_ch(h, g1, be1))

    r = h
    h = jnp.dot(Wmain_ref[1], h.astype(jnp.bfloat16),
                preferred_element_type=jnp.float32) + b2
    h = _gelu(_layernorm_ch(h, g2, be2))
    h = h + r                                              # residual

    o = jnp.dot(Wo_ref[...], h.astype(jnp.bfloat16),
                preferred_element_type=jnp.float32) + bo
    return jax.nn.sigmoid(o)                               # use_sigmoid=True


def _sampler_kernel(feat_ref, stat_ref, app_ref,
                    bWmain, bWside, bWo, bvecs,
                    dWmain, dWside, dWo, dvecs,
                    pose_ref):
    # fused conv2 epilogue: InstanceNorm apply + GELU (stats from wrapper)
    s = stat_ref[0]                                        # (64, 2): [rstd, -mu*rstd]
    x1 = _gelu(feat_ref[0].astype(jnp.float32) * s[:, 0:1] + s[:, 1:2])  # (64, tile)

    app_n = _l2n_ch(app_ref[0])                            # F.normalize(approach, dim=1)

    beta = _decoder(x1, [app_n], bWmain, bWside, bWo, bvecs)
    beta_n = _l2n_ch(beta)                                 # F.normalize(beta, dim=1)

    # dist_width_decoder(features, cat([approach, beta], dim=1))
    dist = _decoder(x1, [app_n, beta_n], dWmain, dWside, dWo, dvecs)

    # pose = cat([approach, beta, dist_width], dim=1); lane-dense (7, tile) block
    pose_ref[0, 0:3, :] = app_n
    pose_ref[0, 3:5, :] = beta_n
    pose_ref[0, 5:7, :] = dist


def gripper_sampler(feats, stats, app, params, max_tile=2048):
    """feats: (B,64,HW) bf16 raw conv2 output, stats: (B,64,2) f32, app: (B,3,HW) f32."""
    B, C, HW = feats.shape
    assert C == 64
    tile, hwp = _pick_tile(HW, max_tile)
    featp = _pad_last(feats, hwp)
    appp = _pad_last(app, hwp)

    pb, pd = params["beta_dec"], params["dist_dec"]
    weights = [pb["Wmain"], pb["Wside"], pb["Wo"], pb["vecs"],
               pd["Wmain"], pd["Wside"], pd["Wo"], pd["vecs"]]

    def rep(w):
        return pl.BlockSpec(w.shape, lambda b, i, _n=w.ndim: (0,) * _n)

    in_specs = [pl.BlockSpec((1, 64, tile), lambda b, i: (b, 0, i)),
                pl.BlockSpec((1, 64, 2), lambda b, i: (b, 0, 0)),
                pl.BlockSpec((1, 3, tile), lambda b, i: (b, 0, i))]
    in_specs += [rep(w) for w in weights]

    out = pl.pallas_call(
        _sampler_kernel,
        out_shape=jax.ShapeDtypeStruct((B, 7, hwp), jnp.float32),
        grid_spec=pltpu.PrefetchScalarGridSpec(
            num_scalar_prefetch=0,
            grid=(B, hwp // tile),
            in_specs=in_specs,
            out_specs=pl.BlockSpec((1, 7, tile), lambda b, i: (b, 0, i)),
        ),
        compiler_params=pltpu.CompilerParams(
            dimension_semantics=("parallel", "parallel")),
    )(featp, stats, appp, *weights)
    return out[:, :, :HW]


# -------------------------------- glue (JAX) ---------------------------------
def standardize_depth(depth):
    # TODO(synk): exact standardize_depth() not provided; per-image mean/std used.
    mu = jnp.mean(depth, axis=(1, 2, 3), keepdims=True)
    sd = jnp.std(depth, axis=(1, 2, 3), keepdims=True)
    return (depth - mu) / (sd + 1e-6)


def conv3x3(x_nchw, w_oihw):
    # bf16 operands, f32 accumulation on the MXU via XLA's native conv.
    return lax.conv_general_dilated(
        x_nchw, w_oihw, window_strides=(1, 1), padding="SAME",
        dimension_numbers=("NCHW", "OIHW", "NCHW"),
        preferred_element_type=jnp.float32)


def instance_stats(y, eps=1e-5):
    # InstanceNorm2d(affine=False) per-(image, channel) stats -> [rstd, -mu*rstd]
    mu = jnp.mean(y, axis=(2, 3))
    var = jnp.var(y, axis=(2, 3))
    rstd = lax.rsqrt(var + eps)
    return jnp.stack([rstd, -mu * rstd], axis=-1)          # (B, C, 2)


# ------------------------------ parameter init -------------------------------
def _uniform(key, shape, fan_in):
    bound = 1.0 / float(fan_in) ** 0.5
    return jax.random.uniform(key, shape, jnp.float32, -bound, bound)


def _init_decoder(key, c2, hidden=64, out_c=2):
    ks = jax.random.split(key, 9)
    Watt = _uniform(ks[0], (hidden, c2), c2)
    b_att = _uniform(ks[1], (hidden,), c2)
    W1a = _uniform(ks[2], (hidden, hidden), hidden + c2)   # torch-style (out, in)
    W1b = _uniform(ks[3], (hidden, c2), hidden + c2)
    b1 = _uniform(ks[4], (hidden,), hidden + c2)
    W2 = _uniform(ks[5], (hidden, hidden), hidden)
    b2 = _uniform(ks[6], (hidden,), hidden)
    Wo = _uniform(ks[7], (out_c, hidden), hidden)
    bo = _uniform(ks[8], (out_c,), hidden)
    ones = jnp.ones((hidden,), jnp.float32)
    zeros = jnp.zeros((hidden,), jnp.float32)
    bo_pad = jnp.zeros((hidden,), jnp.float32).at[:out_c].set(bo)
    # packed per-channel vectors: [b_att, b1, ln1_g, ln1_b, b2, ln2_g, ln2_b, bo]
    vecs = jnp.stack([b_att, b1, ones, zeros, b2, ones, zeros, bo_pad], axis=1)
    return {
        "Wmain": jnp.stack([W1a, W2], axis=0).astype(jnp.bfloat16),   # (2,64,64)
        "Wside": jnp.stack([Watt, W1b], axis=0),                      # (2,64,c2) f32
        "Wo": Wo.astype(jnp.bfloat16),                                # (2,64)
        "vecs": vecs,                                                 # (64,8) f32
    }


def init_params(key):
    k1, k2, kb, kd = jax.random.split(key, 4)
    params = {}
    # TODO(synk): res_unet backbone not provided; 2-layer conv3x3 + InstanceNorm
    #             + GELU stack (1 -> 32 -> 64 channels) used.  Conv biases are
    #             omitted: they cancel exactly under InstanceNorm2d(affine=False).
    params["backbone"] = {
        "w1": _uniform(k1, (32, 1, 3, 3), 9).astype(jnp.bfloat16),
        "w2": _uniform(k2, (64, 32, 3, 3), 9 * 32).astype(jnp.bfloat16),
    }
    params["beta_dec"] = _init_decoder(kb, 3)   # in_c1=64, in_c2=3, out_c=2
    params["dist_dec"] = _init_decoder(kd, 5)   # in_c1=64, in_c2=5, out_c=2
    return params


# --------------------------------- G forward ---------------------------------
def g_forward(params, depth, approach):
    """depth: [B,1,H,W] NCHW, approach: [B,3,H,W] NCHW -> pose: [B,7,H,W] NCHW."""
    B, _, H, W = depth.shape
    HW = H * W
    bb = params["backbone"]

    d = standardize_depth(depth).astype(jnp.bfloat16)

    y1 = conv3x3(d, bb["w1"])                               # (B,32,H,W) f32
    s1 = instance_stats(y1)                                 # (B,32,2)
    h1 = norm_act(y1.reshape(B, 32, HW), s1)                # Pallas IN+GELU -> bf16

    y2 = conv3x3(h1.reshape(B, 32, H, W), bb["w2"])         # (B,64,H,W) f32
    s2 = instance_stats(y2)                                 # (B,64,2)

    feats = y2.reshape(B, 64, HW).astype(jnp.bfloat16)      # raw conv2 output
    app = approach.reshape(B, 3, HW).astype(jnp.float32)    # channel-first, no transpose

    pose = gripper_sampler(feats, s2, app, params)          # (B,7,HW) f32
    return pose.reshape(B, 7, H, W)                         # NCHW, no transpose needed


if __name__ == "__main__":
    key = jax.random.PRNGKey(0)
    kp, kd, ka = jax.random.split(key, 3)
    params = init_params(kp)

    B, H, W = 2, 16, 16
    depth = jax.random.uniform(kd, (B, 1, H, W), jnp.float32, 0.3, 1.5)
    approach = jax.random.normal(ka, (B, 3, H, W), jnp.float32)

    pose = jax.jit(g_forward)(params, depth, approach)
    jax.block_until_ready(pose)
    assert pose.shape == (B, 7, H, W)
    assert bool(jnp.all(jnp.isfinite(pose)))
    print("KERNEL_OK")
</pallas_src>

<mosaic_0001>
module attributes {stable_mosaic.version = 11 : i64} {
  func.func @_norm_act_kernel(%arg0: i32, %arg1: i32, %arg2: memref<1x32x256xf32, #tpu.memory_space<vmem>>, %arg3: memref<1x32x2xf32, #tpu.memory_space<vmem>>, %arg4: memref<1x32x256xbf16, #tpu.memory_space<vmem>>) attributes {dimension_semantics = [#tpu.dimension_semantics<parallel>, #tpu.dimension_semantics<parallel>], iteration_bounds = array<i64: 2, 1>, scalar_prefetch = 0 : i64, scratch_operands = 0 : i64, tpu.core_type = #tpu.core_type<tc>, window_params = [{transform_indices = @transform_0, window_bounds = array<i64: 1, 32, 256>}, {transform_indices = @transform_1, window_bounds = array<i64: 1, 32, 2>}, {transform_indices = @transform_2, window_bounds = array<i64: 1, 32, 256>}]} {
    %c0 = arith.constant 0 : index
    %c0_0 = arith.constant 0 : index
    %c0_1 = arith.constant 0 : index
    %0 = vector.load %arg3[%c0, %c0_0, %c0_1] : memref<1x32x2xf32, #tpu.memory_space<vmem>>, vector<1x32x2xf32>
    %1 = vector.shape_cast %0 : vector<1x32x2xf32> to vector<32x2xf32>
    %c0_2 = arith.constant 0 : index
    %c0_3 = arith.constant 0 : index
    %c0_4 = arith.constant 0 : index
    %2 = vector.load %arg2[%c0_2, %c0_3, %c0_4] : memref<1x32x256xf32, #tpu.memory_space<vmem>>, vector<1x32x256xf32>
    %3 = vector.shape_cast %2 : vector<1x32x256xf32> to vector<32x256xf32>
    %4 = vector.extract_strided_slice %1 {offsets = [0, 0], sizes = [32, 1], strides = [1, 1]} : vector<32x2xf32> to vector<32x1xf32>
    %5 = vector.broadcast %4 : vector<32x1xf32> to vector<32x256xf32>
    %6 = arith.mulf %3, %5 : vector<32x256xf32>
    %7 = vector.extract_strided_slice %1 {offsets = [0, 1], sizes = [32, 1], strides = [1, 1]} : vector<32x2xf32> to vector<32x1xf32>
    %8 = vector.broadcast %7 : vector<32x1xf32> to vector<32x256xf32>
    %9 = arith.addf %6, %8 : vector<32x256xf32>
    %cst = arith.constant 5.000000e-01 : f32
    %10 = vector.broadcast %cst : f32 to vector<32x256xf32>
    %11 = arith.mulf %10, %9 : vector<32x256xf32>
    %cst_5 = arith.constant 4.471500e-02 : f32
    %12 = vector.broadcast %cst_5 : f32 to vector<32x256xf32>
    %13 = arith.mulf %12, %9 : vector<32x256xf32>
    %14 = arith.mulf %13, %9 : vector<32x256xf32>
    %15 = arith.mulf %14, %9 : vector<32x256xf32>
    %16 = arith.addf %9, %15 : vector<32x256xf32>
    %cst_6 = arith.constant 0.797884583 : f32
    %17 = vector.broadcast %cst_6 : f32 to vector<32x256xf32>
    %18 = arith.mulf %17, %16 : vector<32x256xf32>
    %19 = math.tanh %18 : vector<32x256xf32>
    %cst_7 = arith.constant 1.000000e+00 : f32
    %20 = vector.broadcast %cst_7 : f32 to vector<32x256xf32>
    %21 = arith.addf %20, %19 : vector<32x256xf32>
    %22 = arith.mulf %11, %21 : vector<32x256xf32>
    %23 = arith.truncf %22 : vector<32x256xf32> to vector<32x256xbf16>
    %c0_8 = arith.constant 0 : index
    %c0_9 = arith.constant 0 : index
    %c0_10 = arith.constant 0 : index
    %24 = vector.load %arg4[%c0_8, %c0_9, %c0_10] : memref<1x32x256xbf16, #tpu.memory_space<vmem>>, vector<1x32x256xbf16>
    %25 = vector.shape_cast %24 : vector<1x32x256xbf16> to vector<32x256xbf16>
    %26 = vector.shape_cast %23 : vector<32x256xbf16> to vector<1x32x256xbf16>
    tpu.vector_store %arg4[%c0_8, %c0_9, %c0_10], %26 {strides = array<i32>} : memref<1x32x256xbf16, #tpu.memory_space<vmem>>, vector<1x32x256xbf16>,
    return
  }
  func.func @transform_0(%arg0: i32, %arg1: i32) -> (i32, i32, i32) {
    %c0_i32 = arith.constant 0 : i32
    %c0_i32_0 = arith.constant 0 : i32
    return %arg0, %c0_i32, %arg1 : i32, i32, i32
  }
  func.func @transform_1(%arg0: i32, %arg1: i32) -> (i32, i32, i32) {
    %c0_i32 = arith.constant 0 : i32
    %c0_i32_0 = arith.constant 0 : i32
    %c0_i32_1 = arith.constant 0 : i32
    return %arg0, %c0_i32, %c0_i32_0 : i32, i32, i32
  }
  func.func @transform_2(%arg0: i32, %arg1: i32) -> (i32, i32, i32) {
    %c0_i32 = arith.constant 0 : i32
    %c0_i32_0 = arith.constant 0 : i32
    return %arg0, %c0_i32, %arg1 : i32, i32, i32
  }
}

module attributes {stable_mosaic.version = 11 : i64} {
  func.func @_sampler_kernel(%arg0: i32, %arg1: i32, %arg2: memref<1x64x256xbf16, #tpu.memory_space<vmem>>, %arg3: memref<1x64x2xf32, #tpu.memory_space<vmem>>, %arg4: memref<1x3x256xf32, #tpu.memory_space<vmem>>, %arg5: memref<2x64x64xbf16, #tpu.memory_space<vmem>>, %arg6: memref<2x64x3xf32, #tpu.memory_space<vmem>>, %arg7: memref<2x64xbf16, #tpu.memory_space<vmem>>, %arg8: memref<64x8xf32, #tpu.memory_space<vmem>>, %arg9: memref<2x64x64xbf16, #tpu.memory_space<vmem>>, %arg10: memref<2x64x5xf32, #tpu.memory_space<vmem>>, %arg11: memref<2x64xbf16, #tpu.memory_space<vmem>>, %arg12: memref<64x8xf32, #tpu.memory_space<vmem>>, %arg13: memref<1x7x256xf32, #tpu.memory_space<vmem>>) attributes {dimension_semantics = [#tpu.dimension_semantics<parallel>, #tpu.dimension_semantics<parallel>], iteration_bounds = array<i64: 2, 1>, scalar_prefetch = 0 : i64, scratch_operands = 0 : i64, tpu.core_type = #tpu.core_type<tc>, window_params = [{transform_indices = @transform_0, window_bounds = array<i64: 1, 64, 256>}, {transform_indices = @transform_1, window_bounds = array<i64: 1, 64, 2>}, {transform_indices = @transform_2, window_bounds = array<i64: 1, 3, 256>}, {pipeline_mode = #tpu.pipeline_mode<synchronous>, transform_indices = @transform_3, window_bounds = array<i64: 2, 64, 64>}, {pipeline_mode = #tpu.pipeline_mode<synchronous>, transform_indices = @transform_4, window_bounds = array<i64: 2, 64, 3>}, {pipeline_mode = #tpu.pipeline_mode<synchronous>, transform_indices = @transform_5, window_bounds = array<i64: 2, 64>}, {pipeline_mode = #tpu.pipeline_mode<synchronous>, transform_indices = @transform_6, window_bounds = array<i64: 64, 8>}, {pipeline_mode = #tpu.pipeline_mode<synchronous>, transform_indices = @transform_7, window_bounds = array<i64: 2, 64, 64>}, {pipeline_mode = #tpu.pipeline_mode<synchronous>, transform_indices = @transform_8, window_bounds = array<i64: 2, 64, 5>}, {pipeline_mode = #tpu.pipeline_mode<synchronous>, transform_indices = @transform_9, window_bounds = array<i64: 2, 64>}, {pipeline_mode = #tpu.pipeline_mode<synchronous>, transform_indices = @transform_10, window_bounds = array<i64: 64, 8>}, {transform_indices = @transform_11, window_bounds = array<i64: 1, 7, 256>}]} {
    %c0 = arith.constant 0 : index
    %c0_0 = arith.constant 0 : index
    %c0_1 = arith.constant 0 : index
    %0 = vector.load %arg3[%c0, %c0_0, %c0_1] : memref<1x64x2xf32, #tpu.memory_space<vmem>>, vector<1x64x2xf32>
    %1 = vector.shape_cast %0 : vector<1x64x2xf32> to vector<64x2xf32>
    %c0_2 = arith.constant 0 : index
    %c0_3 = arith.constant 0 : index
    %c0_4 = arith.constant 0 : index
    %2 = vector.load %arg2[%c0_2, %c0_3, %c0_4] : memref<1x64x256xbf16, #tpu.memory_space<vmem>>, vector<1x64x256xbf16>
    %3 = vector.shape_cast %2 : vector<1x64x256xbf16> to vector<64x256xbf16>
    %4 = arith.extf %3 : vector<64x256xbf16> to vector<64x256xf32>
    %5 = vector.extract_strided_slice %1 {offsets = [0, 0], sizes = [64, 1], strides = [1, 1]} : vector<64x2xf32> to vector<64x1xf32>
    %6 = vector.broadcast %5 : vector<64x1xf32> to vector<64x256xf32>
    %7 = arith.mulf %4, %6 : vector<64x256xf32>
    %8 = vector.extract_strided_slice %1 {offsets = [0, 1], sizes = [64, 1], strides = [1, 1]} : vector<64x2xf32> to vector<64x1xf32>
    %9 = vector.broadcast %8 : vector<64x1xf32> to vector<64x256xf32>
    %10 = arith.addf %7, %9 : vector<64x256xf32>
    %cst = arith.constant 5.000000e-01 : f32
    %11 = vector.broadcast %cst : f32 to vector<64x256xf32>
    %12 = arith.mulf %11, %10 : vector<64x256xf32>
    %cst_5 = arith.constant 4.471500e-02 : f32
    %13 = vector.broadcast %cst_5 : f32 to vector<64x256xf32>
    %14 = arith.mulf %13, %10 : vector<64x256xf32>
    %15 = arith.mulf %14, %10 : vector<64x256xf32>
    %16 = arith.mulf %15, %10 : vector<64x256xf32>
    %17 = arith.addf %10, %16 : vector<64x256xf32>
    %cst_6 = arith.constant 0.797884583 : f32
    %18 = vector.broadcast %cst_6 : f32 to vector<64x256xf32>
    %19 = arith.mulf %18, %17 : vector<64x256xf32>
    %20 = math.tanh %19 : vector<64x256xf32>
    %cst_7 = arith.constant 1.000000e+00 : f32
    %21 = vector.broadcast %cst_7 : f32 to vector<64x256xf32>
    %22 = arith.addf %21, %20 : vector<64x256xf32>
    %23 = arith.mulf %12, %22 : vector<64x256xf32>
    %c0_8 = arith.constant 0 : index
    %c0_9 = arith.constant 0 : index
    %c0_10 = arith.constant 0 : index
    %24 = vector.load %arg4[%c0_8, %c0_9, %c0_10] : memref<1x3x256xf32, #tpu.memory_space<vmem>>, vector<1x3x256xf32>
    %25 = vector.shape_cast %24 : vector<1x3x256xf32> to vector<3x256xf32>
    %26 = arith.mulf %25, %25 : vector<3x256xf32>
    %cst_11 = arith.constant dense<0.000000e+00> : vector<256xf32>
    %27 = vector.multi_reduction <add>, %26, %cst_11 [0] : vector<3x256xf32> to vector<256xf32>
    %28 = vector.shape_cast %27 : vector<256xf32> to vector<1x256xf32>
    %29 = math.sqrt %28 : vector<1x256xf32>
    %cst_12 = arith.constant 9.99999996E-13 : f32
    %30 = vector.broadcast %cst_12 : f32 to vector<1x256xf32>
    %31 = arith.maximumf %29, %30 : vector<1x256xf32>
    %32 = vector.broadcast %31 : vector<1x256xf32> to vector<3x256xf32>
    %33 = arith.divf %25, %32 : vector<3x256xf32>
    %c0_13 = arith.constant 0 : index
    %c0_14 = arith.constant 0 : index
    %34 = vector.load %arg8[%c0_13, %c0_14] : memref<64x8xf32, #tpu.memory_space<vmem>>, vector<64x8xf32>
    %35 = vector.extract_strided_slice %34 {offsets = [0, 0], sizes = [64, 1], strides = [1, 1]} : vector<64x8xf32> to vector<64x1xf32>
    %36 = vector.extract_strided_slice %34 {offsets = [0, 1], sizes = [64, 1], strides = [1, 1]} : vector<64x8xf32> to vector<64x1xf32>
    %37 = vector.extract_strided_slice %34 {offsets = [0, 2], sizes = [64, 1], strides = [1, 1]} : vector<64x8xf32> to vector<64x1xf32>
    %38 = vector.extract_strided_slice %34 {offsets = [0, 3], sizes = [64, 1], strides = [1, 1]} : vector<64x8xf32> to vector<64x1xf32>
    %39 = vector.extract_strided_slice %34 {offsets = [0, 4], sizes = [64, 1], strides = [1, 1]} : vector<64x8xf32> to vector<64x1xf32>
    %40 = vector.extract_strided_slice %34 {offsets = [0, 5], sizes = [64, 1], strides = [1, 1]} : vector<64x8xf32> to vector<64x1xf32>
    %41 = vector.extract_strided_slice %34 {offsets = [0, 6], sizes = [64, 1], strides = [1, 1]} : vector<64x8xf32> to vector<64x1xf32>
    %42 = vector.extract_strided_slice %34 {offsets = [0, 7], sizes = [2, 1], strides = [1, 1]} : vector<64x8xf32> to vector<2x1xf32>
    %c0_15 = arith.constant 0 : index
    %c0_16 = arith.constant 0 : index
    %c0_17 = arith.constant 0 : index
    %43 = vector.load %arg6[%c0_15, %c0_16, %c0_17] : memref<2x64x3xf32, #tpu.memory_space<vmem>>, vector<1x64x3xf32>
    %44 = vector.shape_cast %43 : vector<1x64x3xf32> to vector<64x3xf32>
    %c1 = arith.constant 1 : index
    %c0_18 = arith.constant 0 : index
    %c0_19 = arith.constant 0 : index
    %45 = vector.load %arg6[%c1, %c0_18, %c0_19] : memref<2x64x3xf32, #tpu.memory_space<vmem>>, vector<1x64x3xf32>
    %46 = vector.shape_cast %45 : vector<1x64x3xf32> to vector<64x3xf32>
    %47 = vector.extract_strided_slice %44 {offsets = [0, 0], sizes = [64, 1], strides = [1, 1]} : vector<64x3xf32> to vector<64x1xf32>
    %48 = vector.extract_strided_slice %33 {offsets = [0, 0], sizes = [1, 256], strides = [1, 1]} : vector<3x256xf32> to vector<1x256xf32>
    %49 = vector.broadcast %47 : vector<64x1xf32> to vector<64x256xf32>
    %50 = vector.broadcast %48 : vector<1x256xf32> to vector<64x256xf32>
    %51 = arith.mulf %49, %50 : vector<64x256xf32>
    %52 = vector.broadcast %35 : vector<64x1xf32> to vector<64x256xf32>
    %53 = arith.addf %52, %51 : vector<64x256xf32>
    %54 = vector.extract_strided_slice %44 {offsets = [0, 1], sizes = [64, 1], strides = [1, 1]} : vector<64x3xf32> to vector<64x1xf32>
    %55 = vector.extract_strided_slice %33 {offsets = [1, 0], sizes = [1, 256], strides = [1, 1]} : vector<3x256xf32> to vector<1x256xf32>
    %56 = vector.broadcast %54 : vector<64x1xf32> to vector<64x256xf32>
    %57 = vector.broadcast %55 : vector<1x256xf32> to vector<64x256xf32>
    %58 = arith.mulf %56, %57 : vector<64x256xf32>
    %59 = arith.addf %53, %58 : vector<64x256xf32>
    %60 = vector.extract_strided_slice %44 {offsets = [0, 2], sizes = [64, 1], strides = [1, 1]} : vector<64x3xf32> to vector<64x1xf32>
    %61 = vector.extract_strided_slice %33 {offsets = [2, 0], sizes = [1, 256], strides = [1, 1]} : vector<3x256xf32> to vector<1x256xf32>
    %62 = vector.broadcast %60 : vector<64x1xf32> to vector<64x256xf32>
    %63 = vector.broadcast %61 : vector<1x256xf32> to vector<64x256xf32>
    %64 = arith.mulf %62, %63 : vector<64x256xf32>
    %65 = arith.addf %59, %64 : vector<64x256xf32>
    %66 = arith.negf %65 : vector<64x256xf32>
    %67 = math.exp %66 : vector<64x256xf32>
    %cst_20 = arith.constant 1.000000e+00 : f32
    %68 = vector.broadcast %cst_20 : f32 to vector<64x256xf32>
    %69 = arith.addf %68, %67 : vector<64x256xf32>
    %70 = arith.divf %68, %69 : vector<64x256xf32>
    %71 = arith.mulf %23, %70 : vector<64x256xf32>
    %72 = arith.truncf %71 : vector<64x256xf32> to vector<64x256xbf16>
    %c0_21 = arith.constant 0 : index
    %c0_22 = arith.constant 0 : index
    %c0_23 = arith.constant 0 : index
    %73 = vector.load %arg5[%c0_21, %c0_22, %c0_23] : memref<2x64x64xbf16, #tpu.memory_space<vmem>>, vector<1x64x64xbf16>
    %74 = vector.shape_cast %73 : vector<1x64x64xbf16> to vector<64x64xbf16>
    %cst_24 = arith.constant dense<0.000000e+00> : vector<64x256xf32>
    %75 = tpu.matmul %74, %72, %cst_24 {dimension_numbers = #tpu.dot_dimension_numbers<[1], [0], [0], [1], [0, 0, 1, 1], [], []>} : vector<64x64xbf16>, vector<64x256xbf16>, vector<64x256xf32> -> vector<64x256xf32>
    %76 = vector.broadcast %36 : vector<64x1xf32> to vector<64x256xf32>
    %77 = arith.addf %75, %76 : vector<64x256xf32>
    %78 = vector.extract_strided_slice %46 {offsets = [0, 0], sizes = [64, 1], strides = [1, 1]} : vector<64x3xf32> to vector<64x1xf32>
    %79 = vector.extract_strided_slice %33 {offsets = [0, 0], sizes = [1, 256], strides = [1, 1]} : vector<3x256xf32> to vector<1x256xf32>
    %80 = vector.broadcast %78 : vector<64x1xf32> to vector<64x256xf32>
    %81 = vector.broadcast %79 : vector<1x256xf32> to vector<64x256xf32>
    %82 = arith.mulf %80, %81 : vector<64x256xf32>
    %83 = arith.addf %77, %82 : vector<64x256xf32>
    %84 = vector.extract_strided_slice %46 {offsets = [0, 1], sizes = [64, 1], strides = [1, 1]} : vector<64x3xf32> to vector<64x1xf32>
    %85 = vector.extract_strided_slice %33 {offsets = [1, 0], sizes = [1, 256], strides = [1, 1]} : vector<3x256xf32> to vector<1x256xf32>
    %86 = vector.broadcast %84 : vector<64x1xf32> to vector<64x256xf32>
    %87 = vector.broadcast %85 : vector<1x256xf32> to vector<64x256xf32>
    %88 = arith.mulf %86, %87 : vector<64x256xf32>
    %89 = arith.addf %83, %88 : vector<64x256xf32>
    %90 = vector.extract_strided_slice %46 {offsets = [0, 2], sizes = [64, 1], strides = [1, 1]} : vector<64x3xf32> to vector<64x1xf32>
    %91 = vector.extract_strided_slice %33 {offsets = [2, 0], sizes = [1, 256], strides = [1, 1]} : vector<3x256xf32> to vector<1x256xf32>
    %92 = vector.broadcast %90 : vector<64x1xf32> to vector<64x256xf32>
    %93 = vector.broadcast %91 : vector<1x256xf32> to vector<64x256xf32>
    %94 = arith.mulf %92, %93 : vector<64x256xf32>
    %95 = arith.addf %89, %94 : vector<64x256xf32>
    %cst_25 = arith.constant dense<0.000000e+00> : vector<256xf32>
    %96 = vector.multi_reduction <add>, %95, %cst_25 [0] : vector<64x256xf32> to vector<256xf32>
    %97 = vector.shape_cast %96 : vector<256xf32> to vector<1x256xf32>
    %cst_26 = arith.constant 6.400000e+01 : f32
    %98 = vector.broadcast %cst_26 : f32 to vector<1x256xf32>
    %99 = arith.divf %97, %98 : vector<1x256xf32>
    %100 = vector.broadcast %99 : vector<1x256xf32> to vector<64x256xf32>
    %101 = arith.subf %95, %100 : vector<64x256xf32>
    %102 = arith.mulf %101, %101 : vector<64x256xf32>
    %cst_27 = arith.constant dense<0.000000e+00> : vector<256xf32>
    %103 = vector.multi_reduction <add>, %102, %cst_27 [0] : vector<64x256xf32> to vector<256xf32>
    %104 = vector.shape_cast %103 : vector<256xf32> to vector<1x256xf32>
    %cst_28 = arith.constant 6.400000e+01 : f32
    %105 = vector.broadcast %cst_28 : f32 to vector<1x256xf32>
    %106 = arith.divf %104, %105 : vector<1x256xf32>
    %107 = vector.broadcast %99 : vector<1x256xf32> to vector<64x256xf32>
    %108 = arith.subf %95, %107 : vector<64x256xf32>
    %cst_29 = arith.constant 9.99999974E-6 : f32
    %109 = vector.broadcast %cst_29 : f32 to vector<1x256xf32>
    %110 = arith.addf %106, %109 : vector<1x256xf32>
    %111 = math.rsqrt %110 : vector<1x256xf32>
    %112 = vector.broadcast %111 : vector<1x256xf32> to vector<64x256xf32>
    %113 = arith.mulf %108, %112 : vector<64x256xf32>
    %114 = vector.broadcast %37 : vector<64x1xf32> to vector<64x256xf32>
    %115 = arith.mulf %113, %114 : vector<64x256xf32>
    %116 = vector.broadcast %38 : vector<64x1xf32> to vector<64x256xf32>
    %117 = arith.addf %115, %116 : vector<64x256xf32>
    %cst_30 = arith.constant 5.000000e-01 : f32
    %118 = vector.broadcast %cst_30 : f32 to vector<64x256xf32>
    %119 = arith.mulf %118, %117 : vector<64x256xf32>
    %cst_31 = arith.constant 4.471500e-02 : f32
    %120 = vector.broadcast %cst_31 : f32 to vector<64x256xf32>
    %121 = arith.mulf %120, %117 : vector<64x256xf32>
    %122 = arith.mulf %121, %117 : vector<64x256xf32>
    %123 = arith.mulf %122, %117 : vector<64x256xf32>
    %124 = arith.addf %117, %123 : vector<64x256xf32>
    %cst_32 = arith.constant 0.797884583 : f32
    %125 = vector.broadcast %cst_32 : f32 to vector<64x256xf32>
    %126 = arith.mulf %125, %124 : vector<64x256xf32>
    %127 = math.tanh %126 : vector<64x256xf32>
    %cst_33 = arith.constant 1.000000e+00 : f32
    %128 = vector.broadcast %cst_33 : f32 to vector<64x256xf32>
    %129 = arith.addf %128, %127 : vector<64x256xf32>
    %130 = arith.mulf %119, %129 : vector<64x256xf32>
    %c1_34 = arith.constant 1 : index
    %c0_35 = arith.constant 0 : index
    %c0_36 = arith.constant 0 : index
    %131 = vector.load %arg5[%c1_34, %c0_35, %c0_36] : memref<2x64x64xbf16, #tpu.memory_space<vmem>>, vector<1x64x64xbf16>
    %132 = vector.shape_cast %131 : vector<1x64x64xbf16> to vector<64x64xbf16>
    %133 = arith.truncf %130 : vector<64x256xf32> to vector<64x256xbf16>
    %cst_37 = arith.constant dense<0.000000e+00> : vector<64x256xf32>
    %134 = tpu.matmul %132, %133, %cst_37 {dimension_numbers = #tpu.dot_dimension_numbers<[1], [0], [0], [1], [0, 0, 1, 1], [], []>} : vector<64x64xbf16>, vector<64x256xbf16>, vector<64x256xf32> -> vector<64x256xf32>
    %135 = vector.broadcast %39 : vector<64x1xf32> to vector<64x256xf32>
    %136 = arith.addf %134, %135 : vector<64x256xf32>
    %cst_38 = arith.constant dense<0.000000e+00> : vector<256xf32>
    %137 = vector.multi_reduction <add>, %136, %cst_38 [0] : vector<64x256xf32> to vector<256xf32>
    %138 = vector.shape_cast %137 : vector<256xf32> to vector<1x256xf32>
    %cst_39 = arith.constant 6.400000e+01 : f32
    %139 = vector.broadcast %cst_39 : f32 to vector<1x256xf32>
    %140 = arith.divf %138, %139 : vector<1x256xf32>
    %141 = vector.broadcast %140 : vector<1x256xf32> to vector<64x256xf32>
    %142 = arith.subf %136, %141 : vector<64x256xf32>
    %143 = arith.mulf %142, %142 : vector<64x256xf32>
    %cst_40 = arith.constant dense<0.000000e+00> : vector<256xf32>
    %144 = vector.multi_reduction <add>, %143, %cst_40 [0] : vector<64x256xf32> to vector<256xf32>
    %145 = vector.shape_cast %144 : vector<256xf32> to vector<1x256xf32>
    %cst_41 = arith.constant 6.400000e+01 : f32
    %146 = vector.broadcast %cst_41 : f32 to vector<1x256xf32>
    %147 = arith.divf %145, %146 : vector<1x256xf32>
    %148 = vector.broadcast %140 : vector<1x256xf32> to vector<64x256xf32>
    %149 = arith.subf %136, %148 : vector<64x256xf32>
    %cst_42 = arith.constant 9.99999974E-6 : f32
    %150 = vector.broadcast %cst_42 : f32 to vector<1x256xf32>
    %151 = arith.addf %147, %150 : vector<1x256xf32>
    %152 = math.rsqrt %151 : vector<1x256xf32>
    %153 = vector.broadcast %152 : vector<1x256xf32> to vector<64x256xf32>
    %154 = arith.mulf %149, %153 : vector<64x256xf32>
    %155 = vector.broadcast %40 : vector<64x1xf32> to vector<64x256xf32>
    %156 = arith.mulf %154, %155 : vector<64x256xf32>
    %157 = vector.broadcast %41 : vector<64x1xf32> to vector<64x256xf32>
    %158 = arith.addf %156, %157 : vector<64x256xf32>
    %cst_43 = arith.constant 5.000000e-01 : f32
    %159 = vector.broadcast %cst_43 : f32 to vector<64x256xf32>
    %160 = arith.mulf %159, %158 : vector<64x256xf32>
    %cst_44 = arith.constant 4.471500e-02 : f32
    %161 = vector.broadcast %cst_44 : f32 to vector<64x256xf32>
    %162 = arith.mulf %161, %158 : vector<64x256xf32>
    %163 = arith.mulf %162, %158 : vector<64x256xf32>
    %164 = arith.mulf %163, %158 : vector<64x256xf32>
    %165 = arith.addf %158, %164 : vector<64x256xf32>
    %cst_45 = arith.constant 0.797884583 : f32
    %166 = vector.broadcast %cst_45 : f32 to vector<64x256xf32>
    %167 = arith.mulf %166, %165 : vector<64x256xf32>
    %168 = math.tanh %167 : vector<64x256xf32>
    %cst_46 = arith.constant 1.000000e+00 : f32
    %169 = vector.broadcast %cst_46 : f32 to vector<64x256xf32>
    %170 = arith.addf %169, %168 : vector<64x256xf32>
    %171 = arith.mulf %160, %170 : vector<64x256xf32>
    %172 = arith.addf %171, %130 : vector<64x256xf32>
    %c0_47 = arith.constant 0 : index
    %c0_48 = arith.constant 0 : index
    %173 = vector.load %arg7[%c0_47, %c0_48] : memref<2x64xbf16, #tpu.memory_space<vmem>>, vector<2x64xbf16>
    %174 = arith.truncf %172 : vector<64x256xf32> to vector<64x256xbf16>
    %cst_49 = arith.constant dense<0.000000e+00> : vector<2x256xf32>
    %175 = tpu.matmul %173, %174, %cst_49 {dimension_numbers = #tpu.dot_dimension_numbers<[1], [0], [0], [1], [0, 0, 1, 1], [], []>} : vector<2x64xbf16>, vector<64x256xbf16>, vector<2x256xf32> -> vector<2x256xf32>
    %176 = vector.broadcast %42 : vector<2x1xf32> to vector<2x256xf32>
    %177 = arith.addf %175, %176 : vector<2x256xf32>
    %178 = arith.negf %177 : vector<2x256xf32>
    %179 = math.exp %178 : vector<2x256xf32>
    %cst_50 = arith.constant 1.000000e+00 : f32
    %180 = vector.broadcast %cst_50 : f32 to vector<2x256xf32>
    %181 = arith.addf %180, %179 : vector<2x256xf32>
    %182 = arith.divf %180, %181 : vector<2x256xf32>
    %183 = arith.mulf %182, %182 : vector<2x256xf32>
    %cst_51 = arith.constant dense<0.000000e+00> : vector<256xf32>
    %184 = vector.multi_reduction <add>, %183, %cst_51 [0] : vector<2x256xf32> to vector<256xf32>
    %185 = vector.shape_cast %184 : vector<256xf32> to vector<1x256xf32>
    %186 = math.sqrt %185 : vector<1x256xf32>
    %cst_52 = arith.constant 9.99999996E-13 : f32
    %187 = vector.broadcast %cst_52 : f32 to vector<1x256xf32>
    %188 = arith.maximumf %186, %187 : vector<1x256xf32>
    %189 = vector.broadcast %188 : vector<1x256xf32> to vector<2x256xf32>
    %190 = arith.divf %182, %189 : vector<2x256xf32>
    %c0_53 = arith.constant 0 : index
    %c0_54 = arith.constant 0 : index
    %191 = vector.load %arg12[%c0_53, %c0_54] : memref<64x8xf32, #tpu.memory_space<vmem>>, vector<64x8xf32>
    %192 = vector.extract_strided_slice %191 {offsets = [0, 0], sizes = [64, 1], strides = [1, 1]} : vector<64x8xf32> to vector<64x1xf32>
    %193 = vector.extract_strided_slice %191 {offsets = [0, 1], sizes = [64, 1], strides = [1, 1]} : vector<64x8xf32> to vector<64x1xf32>
    %194 = vector.extract_strided_slice %191 {offsets = [0, 2], sizes = [64, 1], strides = [1, 1]} : vector<64x8xf32> to vector<64x1xf32>
    %195 = vector.extract_strided_slice %191 {offsets = [0, 3], sizes = [64, 1], strides = [1, 1]} : vector<64x8xf32> to vector<64x1xf32>
    %196 = vector.extract_strided_slice %191 {offsets = [0, 4], sizes = [64, 1], strides = [1, 1]} : vector<64x8xf32> to vector<64x1xf32>
    %197 = vector.extract_strided_slice %191 {offsets = [0, 5], sizes = [64, 1], strides = [1, 1]} : vector<64x8xf32> to vector<64x1xf32>
    %198 = vector.extract_strided_slice %191 {offsets = [0, 6], sizes = [64, 1], strides = [1, 1]} : vector<64x8xf32> to vector<64x1xf32>
    %199 = vector.extract_strided_slice %191 {offsets = [0, 7], sizes = [2, 1], strides = [1, 1]} : vector<64x8xf32> to vector<2x1xf32>
    %c0_55 = arith.constant 0 : index
    %c0_56 = arith.constant 0 : index
    %c0_57 = arith.constant 0 : index
    %200 = vector.load %arg10[%c0_55, %c0_56, %c0_57] : memref<2x64x5xf32, #tpu.memory_space<vmem>>, vector<1x64x5xf32>
    %201 = vector.shape_cast %200 : vector<1x64x5xf32> to vector<64x5xf32>
    %c1_58 = arith.constant 1 : index
    %c0_59 = arith.constant 0 : index
    %c0_60 = arith.constant 0 : index
    %202 = vector.load %arg10[%c1_58, %c0_59, %c0_60] : memref<2x64x5xf32, #tpu.memory_space<vmem>>, vector<1x64x5xf32>
    %203 = vector.shape_cast %202 : vector<1x64x5xf32> to vector<64x5xf32>
    %204 = vector.extract_strided_slice %201 {offsets = [0, 0], sizes = [64, 1], strides = [1, 1]} : vector<64x5xf32> to vector<64x1xf32>
    %205 = vector.extract_strided_slice %33 {offsets = [0, 0], sizes = [1, 256], strides = [1, 1]} : vector<3x256xf32> to vector<1x256xf32>
    %206 = vector.broadcast %204 : vector<64x1xf32> to vector<64x256xf32>
    %207 = vector.broadcast %205 : vector<1x256xf32> to vector<64x256xf32>
    %208 = arith.mulf %206, %207 : vector<64x256xf32>
    %209 = vector.broadcast %192 : vector<64x1xf32> to vector<64x256xf32>
    %210 = arith.addf %209, %208 : vector<64x256xf32>
    %211 = vector.extract_strided_slice %201 {offsets = [0, 1], sizes = [64, 1], strides = [1, 1]} : vector<64x5xf32> to vector<64x1xf32>
    %212 = vector.extract_strided_slice %33 {offsets = [1, 0], sizes = [1, 256], strides = [1, 1]} : vector<3x256xf32> to vector<1x256xf32>
    %213 = vector.broadcast %211 : vector<64x1xf32> to vector<64x256xf32>
    %214 = vector.broadcast %212 : vector<1x256xf32> to vector<64x256xf32>
    %215 = arith.mulf %213, %214 : vector<64x256xf32>
    %216 = arith.addf %210, %215 : vector<64x256xf32>
    %217 = vector.extract_strided_slice %201 {offsets = [0, 2], sizes = [64, 1], strides = [1, 1]} : vector<64x5xf32> to vector<64x1xf32>
    %218 = vector.extract_strided_slice %33 {offsets = [2, 0], sizes = [1, 256], strides = [1, 1]} : vector<3x256xf32> to vector<1x256xf32>
    %219 = vector.broadcast %217 : vector<64x1xf32> to vector<64x256xf32>
    %220 = vector.broadcast %218 : vector<1x256xf32> to vector<64x256xf32>
    %221 = arith.mulf %219, %220 : vector<64x256xf32>
    %222 = arith.addf %216, %221 : vector<64x256xf32>
    %223 = vector.extract_strided_slice %201 {offsets = [0, 3], sizes = [64, 1], strides = [1, 1]} : vector<64x5xf32> to vector<64x1xf32>
    %224 = vector.extract_strided_slice %190 {offsets = [0, 0], sizes = [1, 256], strides = [1, 1]} : vector<2x256xf32> to vector<1x256xf32>
    %225 = vector.broadcast %223 : vector<64x1xf32> to vector<64x256xf32>
    %226 = vector.broadcast %224 : vector<1x256xf32> to vector<64x256xf32>
    %227 = arith.mulf %225, %226 : vector<64x256xf32>
    %228 = arith.addf %222, %227 : vector<64x256xf32>
    %229 = vector.extract_strided_slice %201 {offsets = [0, 4], sizes = [64, 1], strides = [1, 1]} : vector<64x5xf32> to vector<64x1xf32>
    %230 = vector.extract_strided_slice %190 {offsets = [1, 0], sizes = [1, 256], strides = [1, 1]} : vector<2x256xf32> to vector<1x256xf32>
    %231 = vector.broadcast %229 : vector<64x1xf32> to vector<64x256xf32>
    %232 = vector.broadcast %230 : vector<1x256xf32> to vector<64x256xf32>
    %233 = arith.mulf %231, %232 : vector<64x256xf32>
    %234 = arith.addf %228, %233 : vector<64x256xf32>
    %235 = arith.negf %234 : vector<64x256xf32>
    %236 = math.exp %235 : vector<64x256xf32>
    %cst_61 = arith.constant 1.000000e+00 : f32
    %237 = vector.broadcast %cst_61 : f32 to vector<64x256xf32>
    %238 = arith.addf %237, %236 : vector<64x256xf32>
    %239 = arith.divf %237, %238 : vector<64x256xf32>
    %240 = arith.mulf %23, %239 : vector<64x256xf32>
    %241 = arith.truncf %240 : vector<64x256xf32> to vector<64x256xbf16>
    %c0_62 = arith.constant 0 : index
    %c0_63 = arith.constant 0 : index
    %c0_64 = arith.constant 0 : index
    %242 = vector.load %arg9[%c0_62, %c0_63, %c0_64] : memref<2x64x64xbf16, #tpu.memory_space<vmem>>, vector<1x64x64xbf16>
    %243 = vector.shape_cast %242 : vector<1x64x64xbf16> to vector<64x64xbf16>
    %cst_65 = arith.constant dense<0.000000e+00> : vector<64x256xf32>
    %244 = tpu.matmul %243, %241, %cst_65 {dimension_numbers = #tpu.dot_dimension_numbers<[1], [0], [0], [1], [0, 0, 1, 1], [], []>} : vector<64x64xbf16>, vector<64x256xbf16>, vector<64x256xf32> -> vector<64x256xf32>
    %245 = vector.broadcast %193 : vector<64x1xf32> to vector<64x256xf32>
    %246 = arith.addf %244, %245 : vector<64x256xf32>
    %247 = vector.extract_strided_slice %203 {offsets = [0, 0], sizes = [64, 1], strides = [1, 1]} : vector<64x5xf32> to vector<64x1xf32>
    %248 = vector.extract_strided_slice %33 {offsets = [0, 0], sizes = [1, 256], strides = [1, 1]} : vector<3x256xf32> to vector<1x256xf32>
    %249 = vector.broadcast %247 : vector<64x1xf32> to vector<64x256xf32>
    %250 = vector.broadcast %248 : vector<1x256xf32> to vector<64x256xf32>
    %251 = arith.mulf %249, %250 : vector<64x256xf32>
    %252 = arith.addf %246, %251 : vector<64x256xf32>
    %253 = vector.extract_strided_slice %203 {offsets = [0, 1], sizes = [64, 1], strides = [1, 1]} : vector<64x5xf32> to vector<64x1xf32>
    %254 = vector.extract_strided_slice %33 {offsets = [1, 0], sizes = [1, 256], strides = [1, 1]} : vector<3x256xf32> to vector<1x256xf32>
    %255 = vector.broadcast %253 : vector<64x1xf32> to vector<64x256xf32>
    %256 = vector.broadcast %254 : vector<1x256xf32> to vector<64x256xf32>
    %257 = arith.mulf %255, %256 : vector<64x256xf32>
    %258 = arith.addf %252, %257 : vector<64x256xf32>
    %259 = vector.extract_strided_slice %203 {offsets = [0, 2], sizes = [64, 1], strides = [1, 1]} : vector<64x5xf32> to vector<64x1xf32>
    %260 = vector.extract_strided_slice %33 {offsets = [2, 0], sizes = [1, 256], strides = [1, 1]} : vector<3x256xf32> to vector<1x256xf32>
    %261 = vector.broadcast %259 : vector<64x1xf32> to vector<64x256xf32>
    %262 = vector.broadcast %260 : vector<1x256xf32> to vector<64x256xf32>
    %263 = arith.mulf %261, %262 : vector<64x256xf32>
    %264 = arith.addf %258, %263 : vector<64x256xf32>
    %265 = vector.extract_strided_slice %203 {offsets = [0, 3], sizes = [64, 1], strides = [1, 1]} : vector<64x5xf32> to vector<64x1xf32>
    %266 = vector.extract_strided_slice %190 {offsets = [0, 0], sizes = [1, 256], strides = [1, 1]} : vector<2x256xf32> to vector<1x256xf32>
    %267 = vector.broadcast %265 : vector<64x1xf32> to vector<64x256xf32>
    %268 = vector.broadcast %266 : vector<1x256xf32> to vector<64x256xf32>
    %269 = arith.mulf %267, %268 : vector<64x256xf32>
    %270 = arith.addf %264, %269 : vector<64x256xf32>
    %271 = vector.extract_strided_slice %203 {offsets = [0, 4], sizes = [64, 1], strides = [1, 1]} : vector<64x5xf32> to vector<64x1xf32>
    %272 = vector.extract_strided_slice %190 {offsets = [1, 0], sizes = [1, 256], strides = [1, 1]} : vector<2x256xf32> to vector<1x256xf32>
    %273 = vector.broadcast %271 : vector<64x1xf32> to vector<64x256xf32>
    %274 = vector.broadcast %272 : vector<1x256xf32> to vector<64x256xf32>
    %275 = arith.mulf %273, %274 : vector<64x256xf32>
    %276 = arith.addf %270, %275 : vector<64x256xf32>
    %cst_66 = arith.constant dense<0.000000e+00> : vector<256xf32>
    %277 = vector.multi_reduction <add>, %276, %cst_66 [0] : vector<64x256xf32> to vector<256xf32>
    %278 = vector.shape_cast %277 : vector<256xf32> to vector<1x256xf32>
    %cst_67 = arith.constant 6.400000e+01 : f32
    %279 = vector.broadcast %cst_67 : f32 to vector<1x256xf32>
    %280 = arith.divf %278, %279 : vector<1x256xf32>
    %281 = vector.broadcast %280 : vector<1x256xf32> to vector<64x256xf32>
    %282 = arith.subf %276, %281 : vector<64x256xf32>
    %283 = arith.mulf %282, %282 : vector<64x256xf32>
    %cst_68 = arith.constant dense<0.000000e+00> : vector<256xf32>
    %284 = vector.multi_reduction <add>, %283, %cst_68 [0] : vector<64x256xf32> to vector<256xf32>
    %285 = vector.shape_cast %284 : vector<256xf32> to vector<1x256xf32>
    %cst_69 = arith.constant 6.400000e+01 : f32
    %286 = vector.broadcast %cst_69 : f32 to vector<1x256xf32>
    %287 = arith.divf %285, %286 : vector<1x256xf32>
    %288 = vector.broadcast %280 : vector<1x256xf32> to vector<64x256xf32>
    %289 = arith.subf %276, %288 : vector<64x256xf32>
    %cst_70 = arith.constant 9.99999974E-6 : f32
    %290 = vector.broadcast %cst_70 : f32 to vector<1x256xf32>
    %291 = arith.addf %287, %290 : vector<1x256xf32>
    %292 = math.rsqrt %291 : vector<1x256xf32>
    %293 = vector.broadcast %292 : vector<1x256xf32> to vector<64x256xf32>
    %294 = arith.mulf %289, %293 : vector<64x256xf32>
    %295 = vector.broadcast %194 : vector<64x1xf32> to vector<64x256xf32>
    %296 = arith.mulf %294, %295 : vector<64x256xf32>
    %297 = vector.broadcast %195 : vector<64x1xf32> to vector<64x256xf32>
    %298 = arith.addf %296, %297 : vector<64x256xf32>
    %cst_71 = arith.constant 5.000000e-01 : f32
    %299 = vector.broadcast %cst_71 : f32 to vector<64x256xf32>
    %300 = arith.mulf %299, %298 : vector<64x256xf32>
    %cst_72 = arith.constant 4.471500e-02 : f32
    %301 = vector.broadcast %cst_72 : f32 to vector<64x256xf32>
    %302 = arith.mulf %301, %298 : vector<64x256xf32>
    %303 = arith.mulf %302, %298 : vector<64x256xf32>
    %304 = arith.mulf %303, %298 : vector<64x256xf32>
    %305 = arith.addf %298, %304 : vector<64x256xf32>
    %cst_73 = arith.constant 0.797884583 : f32
    %306 = vector.broadcast %cst_73 : f32 to vector<64x256xf32>
    %307 = arith.mulf %306, %305 : vector<64x256xf32>
    %308 = math.tanh %307 : vector<64x256xf32>
    %cst_74 = arith.constant 1.000000e+00 : f32
    %309 = vector.broadcast %cst_74 : f32 to vector<64x256xf32>
    %310 = arith.addf %309, %308 : vector<64x256xf32>
    %311 = arith.mulf %300, %310 : vector<64x256xf32>
    %c1_75 = arith.constant 1 : index
    %c0_76 = arith.constant 0 : index
    %c0_77 = arith.constant 0 : index
    %312 = vector.load %arg9[%c1_75, %c0_76, %c0_77] : memref<2x64x64xbf16, #tpu.memory_space<vmem>>, vector<1x64x64xbf16>
    %313 = vector.shape_cast %312 : vector<1x64x64xbf16> to vector<64x64xbf16>
    %314 = arith.truncf %311 : vector<64x256xf32> to vector<64x256xbf16>
    %cst_78 = arith.constant dense<0.000000e+00> : vector<64x256xf32>
    %315 = tpu.matmul %313, %314, %cst_78 {dimension_numbers = #tpu.dot_dimension_numbers<[1], [0], [0], [1], [0, 0, 1, 1], [], []>} : vector<64x64xbf16>, vector<64x256xbf16>, vector<64x256xf32> -> vector<64x256xf32>
    %316 = vector.broadcast %196 : vector<64x1xf32> to vector<64x256xf32>
    %317 = arith.addf %315, %316 : vector<64x256xf32>
    %cst_79 = arith.constant dense<0.000000e+00> : vector<256xf32>
    %318 = vector.multi_reduction <add>, %317, %cst_79 [0] : vector<64x256xf32> to vector<256xf32>
    %319 = vector.shape_cast %318 : vector<256xf32> to vector<1x256xf32>
    %cst_80 = arith.constant 6.400000e+01 : f32
    %320 = vector.broadcast %cst_80 : f32 to vector<1x256xf32>
    %321 = arith.divf %319, %320 : vector<1x256xf32>
    %322 = vector.broadcast %321 : vector<1x256xf32> to vector<64x256xf32>
    %323 = arith.subf %317, %322 : vector<64x256xf32>
    %324 = arith.mulf %323, %323 : vector<64x256xf32>
    %cst_81 = arith.constant dense<0.000000e+00> : vector<256xf32>
    %325 = vector.multi_reduction <add>, %324, %cst_81 [0] : vector<64x256xf32> to vector<256xf32>
    %326 = vector.shape_cast %325 : vector<256xf32> to vector<1x256xf32>
    %cst_82 = arith.constant 6.400000e+01 : f32
    %327 = vector.broadcast %cst_82 : f32 to vector<1x256xf32>
    %328 = arith.divf %326, %327 : vector<1x256xf32>
    %329 = vector.broadcast %321 : vector<1x256xf32> to vector<64x256xf32>
    %330 = arith.subf %317, %329 : vector<64x256xf32>
    %cst_83 = arith.constant 9.99999974E-6 : f32
    %331 = vector.broadcast %cst_83 : f32 to vector<1x256xf32>
    %332 = arith.addf %328, %331 : vector<1x256xf32>
    %333 = math.rsqrt %332 : vector<1x256xf32>
    %334 = vector.broadcast %333 : vector<1x256xf32> to vector<64x256xf32>
    %335 = arith.mulf %330, %334 : vector<64x256xf32>
    %336 = vector.broadcast %197 : vector<64x1xf32> to vector<64x256xf32>
    %337 = arith.mulf %335, %336 : vector<64x256xf32>
    %338 = vector.broadcast %198 : vector<64x1xf32> to vector<64x256xf32>
    %339 = arith.addf %337, %338 : vector<64x256xf32>
    %cst_84 = arith.constant 5.000000e-01 : f32
    %340 = vector.broadcast %cst_84 : f32 to vector<64x256xf32>
    %341 = arith.mulf %340, %339 : vector<64x256xf32>
    %cst_85 = arith.constant 4.471500e-02 : f32
    %342 = vector.broadcast %cst_85 : f32 to vector<64x256xf32>
    %343 = arith.mulf %342, %339 : vector<64x256xf32>
    %344 = arith.mulf %343, %339 : vector<64x256xf32>
    %345 = arith.mulf %344, %339 : vector<64x256xf32>
    %346 = arith.addf %339, %345 : vector<64x256xf32>
    %cst_86 = arith.constant 0.797884583 : f32
    %347 = vector.broadcast %cst_86 : f32 to vector<64x256xf32>
    %348 = arith.mulf %347, %346 : vector<64x256xf32>
    %349 = math.tanh %348 : vector<64x256xf32>
    %cst_87 = arith.constant 1.000000e+00 : f32
    %350 = vector.broadcast %cst_87 : f32 to vector<64x256xf32>
    %351 = arith.addf %350, %349 : vector<64x256xf32>
    %352 = arith.mulf %341, %351 : vector<64x256xf32>
    %353 = arith.addf %352, %311 : vector<64x256xf32>
    %c0_88 = arith.constant 0 : index
    %c0_89 = arith.constant 0 : index
    %354 = vector.load %arg11[%c0_88, %c0_89] : memref<2x64xbf16, #tpu.memory_space<vmem>>, vector<2x64xbf16>
    %355 = arith.truncf %353 : vector<64x256xf32> to vector<64x256xbf16>
    %cst_90 = arith.constant dense<0.000000e+00> : vector<2x256xf32>
    %356 = tpu.matmul %354, %355, %cst_90 {dimension_numbers = #tpu.dot_dimension_numbers<[1], [0], [0], [1], [0, 0, 1, 1], [], []>} : vector<2x64xbf16>, vector<64x256xbf16>, vector<2x256xf32> -> vector<2x256xf32>
    %357 = vector.broadcast %199 : vector<2x1xf32> to vector<2x256xf32>
    %358 = arith.addf %356, %357 : vector<2x256xf32>
    %359 = arith.negf %358 : vector<2x256xf32>
    %360 = math.exp %359 : vector<2x256xf32>
    %cst_91 = arith.constant 1.000000e+00 : f32
    %361 = vector.broadcast %cst_91 : f32 to vector<2x256xf32>
    %362 = arith.addf %361, %360 : vector<2x256xf32>
    %363 = arith.divf %361, %362 : vector<2x256xf32>
    %c0_92 = arith.constant 0 : index
    %c0_93 = arith.constant 0 : index
    %c0_94 = arith.constant 0 : index
    %364 = vector.load %arg13[%c0_92, %c0_93, %c0_94] : memref<1x7x256xf32, #tpu.memory_space<vmem>>, vector<1x3x256xf32>
    %365 = vector.shape_cast %364 : vector<1x3x256xf32> to vector<3x256xf32>
    %366 = vector.shape_cast %33 : vector<3x256xf32> to vector<1x3x256xf32>
    tpu.vector_store %arg13[%c0_92, %c0_93, %c0_94], %366 {strides = array<i32>} : memref<1x7x256xf32, #tpu.memory_space<vmem>>, vector<1x3x256xf32>,
    %c0_95 = arith.constant 0 : index
    %c3 = arith.constant 3 : index
    %c0_96 = arith.constant 0 : index
    %367 = vector.load %arg13[%c0_95, %c3, %c0_96] : memref<1x7x256xf32, #tpu.memory_space<vmem>>, vector<1x2x256xf32>
    %368 = vector.shape_cast %367 : vector<1x2x256xf32> to vector<2x256xf32>
    %369 = vector.shape_cast %190 : vector<2x256xf32> to vector<1x2x256xf32>
    tpu.vector_store %arg13[%c0_95, %c3, %c0_96], %369 {strides = array<i32>} : memref<1x7x256xf32, #tpu.memory_space<vmem>>, vector<1x2x256xf32>,
    %c0_97 = arith.constant 0 : index
    %c5 = arith.constant 5 : index
    %c0_98 = arith.constant 0 : index
    %370 = vector.load %arg13[%c0_97, %c5, %c0_98] : memref<1x7x256xf32, #tpu.memory_space<vmem>>, vector<1x2x256xf32>
    %371 = vector.shape_cast %370 : vector<1x2x256xf32> to vector<2x256xf32>
    %372 = vector.shape_cast %363 : vector<2x256xf32> to vector<1x2x256xf32>
    tpu.vector_store %arg13[%c0_97, %c5, %c0_98], %372 {strides = array<i32>} : memref<1x7x256xf32, #tpu.memory_space<vmem>>, vector<1x2x256xf32>,
    return
  }
  func.func @transform_0(%arg0: i32, %arg1: i32) -> (i32, i32, i32) {
    %c0_i32 = arith.constant 0 : i32
    %c0_i32_0 = arith.constant 0 : i32
    return %arg0, %c0_i32, %arg1 : i32, i32, i32
  }
  func.func @transform_1(%arg0: i32, %arg1: i32) -> (i32, i32, i32) {
    %c0_i32 = arith.constant 0 : i32
    %c0_i32_0 = arith.constant 0 : i32
    %c0_i32_1 = arith.constant 0 : i32
    return %arg0, %c0_i32, %c0_i32_0 : i32, i32, i32
  }
  func.func @transform_2(%arg0: i32, %arg1: i32) -> (i32, i32, i32) {
    %c0_i32 = arith.constant 0 : i32
    %c0_i32_0 = arith.constant 0 : i32
    return %arg0, %c0_i32, %arg1 : i32, i32, i32
  }
  func.func @transform_3(%arg0: i32, %arg1: i32) -> (i32, i32, i32) {
    %c0_i32 = arith.constant 0 : i32
    %c0_i32_0 = arith.constant 0 : i32
    %c0_i32_1 = arith.constant 0 : i32
    %c0_i32_2 = arith.constant 0 : i32
    return %c0_i32, %c0_i32_0, %c0_i32_1 : i32, i32, i32
  }
  func.func @transform_4(%arg0: i32, %arg1: i32) -> (i32, i32, i32) {
    %c0_i32 = arith.constant 0 : i32
    %c0_i32_0 = arith.constant 0 : i32
    %c0_i32_1 = arith.constant 0 : i32
    %c0_i32_2 = arith.constant 0 : i32
    return %c0_i32, %c0_i32_0, %c0_i32_1 : i32, i32, i32
  }
  func.func @transform_5(%arg0: i32, %arg1: i32) -> (i32, i32) {
    %c0_i32 = arith.constant 0 : i32
    %c0_i32_0 = arith.constant 0 : i32
    %c0_i32_1 = arith.constant 0 : i32
    return %c0_i32, %c0_i32_0 : i32, i32
  }
  func.func @transform_6(%arg0: i32, %arg1: i32) -> (i32, i32) {
    %c0_i32 = arith.constant 0 : i32
    %c0_i32_0 = arith.constant 0 : i32
    %c0_i32_1 = arith.constant 0 : i32
    return %c0_i32, %c0_i32_0 : i32, i32
  }
  func.func @transform_7(%arg0: i32, %arg1: i32) -> (i32, i32, i32) {
    %c0_i32 = arith.constant 0 : i32
    %c0_i32_0 = arith.constant 0 : i32
    %c0_i32_1 = arith.constant 0 : i32
    %c0_i32_2 = arith.constant 0 : i32
    return %c0_i32, %c0_i32_0, %c0_i32_1 : i32, i32, i32
  }
  func.func @transform_8(%arg0: i32, %arg1: i32) -> (i32, i32, i32) {
    %c0_i32 = arith.constant 0 : i32
    %c0_i32_0 = arith.constant 0 : i32
    %c0_i32_1 = arith.constant 0 : i32
    %c0_i32_2 = arith.constant 0 : i32
    return %c0_i32, %c0_i32_0, %c0_i32_1 : i32, i32, i32
  }
  func.func @transform_9(%arg0: i32, %arg1: i32) -> (i32, i32) {
    %c0_i32 = arith.constant 0 : i32
    %c0_i32_0 = arith.constant 0 : i32
    %c0_i32_1 = arith.constant 0 : i32
    return %c0_i32, %c0_i32_0 : i32, i32
  }
  func.func @transform_10(%arg0: i32, %arg1: i32) -> (i32, i32) {
    %c0_i32 = arith.constant 0 : i32
    %c0_i32_0 = arith.constant 0 : i32
    %c0_i32_1 = arith.constant 0 : i32
    return %c0_i32, %c0_i32_0 : i32, i32
  }
  func.func @transform_11(%arg0: i32, %arg1: i32) -> (i32, i32, i32) {
    %c0_i32 = arith.constant 0 : i32
    %c0_i32_0 = arith.constant 0 : i32
    return %arg0, %c0_i32, %arg1 : i32, i32, i32
  }
}

</mosaic_0001>

<bundles_post_ra>
// kernel: g_forward.2
= control target key start
LH: loop header
LB: loop body
LE: loop exit
PB: predicated region body
PF: predicated region fallthrough
CT: control target
= control target key end

     0   :  { %s577_s9 = smov 0   ;;  %s579_s10 = smov 0   ;;  %s677_s0 = inlined_call_operand.vmem [shape: f32[2,32,256], index: 0, kind: input, shape index: {}]   ;;  %s678_s1 = inlined_call_operand.vmem [shape: f32[2,32,2], index: 1, kind: input, shape index: {}]   ;;  %s679_s2 = inlined_call_operand.vmem [shape: bf16[2,32,256], index: 2, kind: output, shape index: {}]  }
   0x1   :  { %s581_s11 = smov 0  }
   0x2 LB: > { %s24_s12 = sadd.s32 1, %s554_s10  ;;  %p470_p0 = scmp.ge.s32.totalorder %s558_s11, 1  ;;  %s558_s11 = sphi %s581_s11, %s12_s11   ;;  %s554_s10 = sphi %s579_s10, %s681_s10   ;;  %s550_s9 = sphi %s577_s9, %s680_s9  }
   0x3   : > { %p26_p1 = scmp.ge.s32.totalorder %s24_s12, 2  ;;  %p143_p2 = scmp.lt.s32.totalorder %s558_s11, 3 }
   0x5   : > { %s683_s12 = smov (%p26_p1, %s24_s12), 0  ;;  %p144_p3 = pnand %p470_p0, %p143_p2 }
   0x6   : > { %p179_p4 = scmp.lt.s32.totalorder (!%p144_p3), %s550_s9, 1  ;;  %v560_v0 = vmov (!%p144_p3), 0   ;;  %v561_v5 = vmov (!%p144_p3), 1  }
   0x7   : > { %147 = sbr.rel (%p144_p3) target bundleno = 192 (0xc0), region = 28  ;;  %517 = vset.pattern.permute.xlu1 (!%p144_p3), %v560_v0  ;;  %516 = vset.pattern.permute.xlu0 (!%p144_p3), %v560_v0 }
   0xe   : > { %s685_s9 = smov (!%p179_p4, %s550_s9), 1 }
   0xf   : > { %s484_s13 = sshll.u32 %s685_s9, 5  ;;  %s483_s17 = sshll.u32 %s685_s9, 6 }
  0x10   : > { %s192_s16 = scalar_lea.vmem %s678_s1, %s484_s13  ;;  %s186_s20 = scalar_lea.vmem %s677_s0, %s483_s17 }
  0x11   : > { %v205_v1 = vld [vmem:[%s192_s16 + $0x10] sm:$0xff]  ;;  %v203_v2 = vld [vmem:[%s192_s16] sm:$0xff]  ;;  %v206_v3 = vld [vmem:[%s192_s16 + $0x18] sm:$0xff]  ;;  %s201_s23 = scalar_lea.vmem %s679_s2, %s484_s13 }
  0x12   : > { %227 = vperm.xlu1 %517, %v205_v1   ;;  %217 = vperm.xlu0 %516, %v203_v2   ;;  %v204_v4 = vld [vmem:[%s192_s16 + $0x8] sm:$0xff]  ;;  %v207_v8 = vld [vmem:[%s186_s20] sm:$0xff]  ;;  %v209_v12 = vld [vmem:[%s186_s20 + $0x10] sm:$0xff] }
  0x13   : > { %v208_v11 = vld [vmem:[%s186_s20 + $0x8] sm:$0xff]  ;;  %v210_v13 = vld [vmem:[%s186_s20 + $0x18] sm:$0xff]  ;;  %v211_v18 = vld [vmem:[%s186_s20 + $0x20] sm:$0xff] }
  0x14   : > { %v212_v19 = vld [vmem:[%s186_s20 + $0x28] sm:$0xff]  ;;  %v213_v22 = vld [vmem:[%s186_s20 + $0x30] sm:$0xff]  ;;  %v214_v31 = vld [vmem:[%s186_s20 + $0x38] sm:$0xff] }
  0x16   : > { %232 = vperm.xlu1 %517, %v206_v3   ;;  %222 = vperm.xlu0 %516, %v204_v4  }
  0x1a   : > { %519 = vset.pattern.permute.xlu1 %v561_v5  ;;  %518 = vset.pattern.permute.xlu0 %v561_v5 }
  0x1b   : > { %248 = vperm.xlu1 %519, %v204_v4   ;;  %244 = vperm.xlu0 %518, %v203_v2  }
  0x1f   : > { %252 = vperm.xlu1 %519, %v205_v1   ;;  %256 = vperm.xlu0 %518, %v206_v3  }
  0x91   : > { %v228_v6 = vpop.permute.xlu1 %227  ;;  %v218_v7 = vpop.permute.xlu0 %217 }
  0x92   : > { %v235_v14 = vmul.f32 %v218_v7, %v207_v8  ;;  %v236_v15 = vmul.f32 %v218_v7, %v208_v11  ;;  %v239_v27 = vmul.f32 %v228_v6, %v211_v18  ;;  %v240_v28 = vmul.f32 %v228_v6, %v212_v19 }
  0x95   : > { %v233_v9 = vpop.permute.xlu1 %232  ;;  %v223_v10 = vpop.permute.xlu0 %222 }
  0x96   : > { %v237_v16 = vmul.f32 %v223_v10, %v209_v12  ;;  %v238_v17 = vmul.f32 %v223_v10, %v210_v13  ;;  %v241_v32 = vmul.f32 %v233_v9, %v213_v22  ;;  %v242_v43 = vmul.f32 %v233_v9, %v214_v31 }
  0x9a   : > { %v249_v20 = vpop.permute.xlu1 %248  ;;  %v245_v21 = vpop.permute.xlu0 %244 }
  0x9b   : > { %v607_v23 = vadd.f32 %v249_v20, %v237_v16  ;;  %v609_v24 = vadd.f32 %v249_v20, %v238_v17  ;;  %v611_v25 = vadd.f32 %v245_v21, %v235_v14  ;;  %v613_v26 = vadd.f32 %v245_v21, %v236_v15 }
  0x9d   : > { %v277_v29 = vmul.f32 0.044715, %v607_v23  ;;  %v278_v30 = vmul.f32 0.044715, %v609_v24  ;;  %v275_v33 = vmul.f32 0.044715, %v611_v25 }
  0x9e   : > { %v276_v34 = vmul.f32 0.044715, %v613_v26  ;;  %v253_v35 = vpop.permute.xlu1 %252  ;;  %v257_v36 = vpop.permute.xlu0 %256  ;;  %v269_v16 = vmul.f32 0.5, %v607_v23  ;;  %v270_v19 = vmul.f32 0.5, %v609_v24 }
  0x9f   : > { %v285_v37 = vmul.f32 %v277_v29, %v607_v23  ;;  %v286_v38 = vmul.f32 %v278_v30, %v609_v24  ;;  %v621_v39 = vadd.f32 %v253_v35, %v239_v27  ;;  %v623_v40 = vadd.f32 %v253_v35, %v240_v28 }
  0xa0   : > { %v283_v41 = vmul.f32 %v275_v33, %v611_v25  ;;  %v284_v42 = vmul.f32 %v276_v34, %v613_v26  ;;  %v629_v46 = vadd.f32 %v257_v36, %v241_v32  ;;  %v637_v53 = vadd.f32 %v257_v36, %v242_v43 }
  0xa1   : > { %v293_v44 = vmul.f32 %v285_v37, %v607_v23  ;;  %v294_v45 = vmul.f32 %v286_v38, %v609_v24  ;;  %v279_v49 = vmul.f32 0.044715, %v621_v39  ;;  %v280_v50 = vmul.f32 0.044715, %v623_v40 }
  0xa2   : > { %v291_v47 = vmul.f32 %v283_v41, %v611_v25  ;;  %v292_v48 = vmul.f32 %v284_v42, %v613_v26  ;;  %v281_v60 = vmul.f32 0.044715, %v629_v46  ;;  %v282_v1 = vmul.f32 0.044715, %v637_v53 }
  0xa3   : > { %v301_v51 = vadd.f32 %v293_v44, %v607_v23  ;;  %v302_v52 = vadd.f32 %v294_v45, %v609_v24  ;;  %v287_v56 = vmul.f32 %v279_v49, %v621_v39  ;;  %v288_v57 = vmul.f32 %v280_v50, %v623_v40 }
  0xa4   : > { %v299_v54 = vadd.f32 %v291_v47, %v611_v25  ;;  %v300_v55 = vadd.f32 %v292_v48, %v613_v26  ;;  %v289_v2 = vmul.f32 %v281_v60, %v629_v46  ;;  %v290_v5 = vmul.f32 %v282_v1, %v637_v53 }
  0xa5   : > { %v309_v58 = vmul.f32 0.7978846, %v301_v51  ;;  %v310_v59 = vmul.f32 0.7978846, %v302_v52  ;;  %v295_v63 = vmul.f32 %v287_v56, %v621_v39  ;;  %v296_v0 = vmul.f32 %v288_v57, %v623_v40 }
  0xa6   : > { %v307_v61 = vmul.f32 0.7978846, %v299_v54  ;;  %v308_v62 = vmul.f32 0.7978846, %v300_v55  ;;  %v297_v6 = vmul.f32 %v289_v2, %v629_v46  ;;  %v298_v9 = vmul.f32 %v290_v5, %v637_v53 }
  0xa7   : > { %520 = vtanh.f32 %v309_v58  ;;  %v303_v3 = vadd.f32 %v295_v63, %v621_v39  ;;  %v304_v4 = vadd.f32 %v296_v0, %v623_v40  ;;  %v267_v27 = vmul.f32 0.5, %v611_v25 }
  0xa8   : > { %522 = vtanh.f32 %v310_v59  ;;  %v305_v10 = vadd.f32 %v297_v6, %v629_v46  ;;  %v306_v11 = vadd.f32 %v298_v9, %v637_v53  ;;  %v268_v30 = vmul.f32 0.5, %v613_v26 }
  0xa9   : > { %524 = vtanh.f32 %v307_v61  ;;  %v311_v7 = vmul.f32 0.7978846, %v303_v3  ;;  %v312_v8 = vmul.f32 0.7978846, %v304_v4  ;;  %v271_v35 = vmul.f32 0.5, %v621_v39 }
  0xaa   : > { %526 = vtanh.f32 %v308_v62  ;;  %v313_v12 = vmul.f32 0.7978846, %v305_v10  ;;  %v314_v13 = vmul.f32 0.7978846, %v306_v11  ;;  %v272_v25 = vmul.f32 0.5, %v623_v40 }
  0xab   : > { %528 = vtanh.f32 %v311_v7  ;;  %v273_v43 = vmul.f32 0.5, %v629_v46  ;;  %v274_v48 = vmul.f32 0.5, %v637_v53 }
  0xac   : > { %530 = vtanh.f32 %v312_v8 }
  0xad   : > { %532 = vtanh.f32 %v313_v12 }
  0xae   : > { %534 = vtanh.f32 %v314_v13 }
  0xb1   : > { %v521_v14 = vpop.eup %520 }
  0xb2   : > { %v523_v15 = vpop.eup %522  ;;  %v325_v17 = vadd.f32 1.0, %v521_v14 }
  0xb3   : > { %v525_v18 = vpop.eup %524  ;;  %v326_v20 = vadd.f32 1.0, %v523_v15 }
  0xb4   : > { %v527_v21 = vpop.eup %526  ;;  %v333_v22 = vmul.f32 %v325_v17, %v269_v16  ;;  %v323_v28 = vadd.f32 1.0, %v525_v18 }
  0xb5   : > { %v334_v29 = vmul.f32 %v326_v20, %v270_v19  ;;  %v324_v31 = vadd.f32 1.0, %v527_v21  ;;  %v529_v32 = vpop.eup %528 }
  0xb6   : > { %v331_v23 = vmul.f32 %v323_v28, %v267_v27  ;;  %v531_v33 = vpop.eup %530  ;;  %v327_v36 = vadd.f32 1.0, %v529_v32 }
  0xb7   : > { %v487_v34 = vpack.c.bf16 %v334_v29, %v333_v22  ;;  %v332_v24 = vmul.f32 %v324_v31, %v268_v30  ;;  %v328_v37 = vadd.f32 1.0, %v531_v33  ;;  %v533_v38 = vpop.eup %532 }
  0xb8   : > { %v335_v41 = vmul.f32 %v327_v36, %v271_v35  ;;  %v329_v44 = vadd.f32 1.0, %v533_v38  ;;  %v535_v45 = vpop.eup %534 }
  0xb9   : > { %364 = vst [vmem:[%s201_s23 + $0x8] sm:$0xff] %v487_v34  ;;  %v486_v26 = vpack.c.bf16 %v332_v24, %v331_v23  ;;  %v336_v42 = vmul.f32 %v328_v37, %v272_v25  ;;  %v330_v49 = vadd.f32 1.0, %v535_v45 }
  0xba   : > { %v337_v50 = vmul.f32 %v329_v44, %v273_v43 }
  0xbb   : > { %363 = vst [vmem:[%s201_s23] sm:$0xff] %v486_v26  ;;  %v488_v47 = vpack.c.bf16 %v336_v42, %v335_v41  ;;  %v338_v39 = vmul.f32 %v330_v49, %v274_v48 }
  0xbd   : > { %365 = vst [vmem:[%s201_s23 + $0x10] sm:$0xff] %v488_v47  ;;  %v489_v51 = vpack.c.bf16 %v338_v39, %v337_v50 }
  0xbf   : > { %366 = vst [vmem:[%s201_s23 + $0x18] sm:$0xff] %v489_v51 }
  0xc0 PF: > { %s12_s11 = sadd.s32 1, %s558_s11   ;;  %s680_s9 = smov %s554_s10 }
  0xc1   : > { %p9_p5 = scmp.ge.s32.totalorder %s12_s11, 4   ;;  %s681_s10 = smov %s683_s12 }
  0xc3   :  { %11 = sbr.rel (!%p9_p5) target bundleno = 2 (0x2), region = 61 }

// kernel: g_forward.3
= control target key start
LH: loop header
LB: loop body
LE: loop exit
PB: predicated region body
PF: predicated region fallthrough
CT: control target
= control target key end

     0   :  { %s5396_s17 = smov 0   ;;  %s5398_s18 = smov 0   ;;  %s8509_s0 = inlined_call_operand.vmem [shape: bf16[2,64,256], index: 0, kind: input, shape index: {}]   ;;  %s8510_s1 = inlined_call_operand.vmem [shape: f32[2,64,2], index: 1, kind: input, shape index: {}]   ;;  %s8511_s2 = inlined_call_operand.vmem [shape: f32[2,3,256], index: 2, kind: input, shape index: {}]   ;;  %s8512_s3 = inlined_call_operand.vmem [shape: bf16[2,64,64], index: 3, kind: input, shape index: {}]   ;;  %s8513_s4 = inlined_call_operand.vmem [shape: f32[2,64,3], index: 4, kind: input, shape index: {}]   ;;  %s8514_s5 = inlined_call_operand.vmem [shape: bf16[2,64], index: 5, kind: input, shape index: {}]   ;;  %s8515_s6 = inlined_call_operand.vmem [shape: f32[64,8], index: 6, kind: input, shape index: {}]   ;;  %s8516_s7 = inlined_call_operand.vmem [shape: bf16[2,64,64], index: 7, kind: input, shape index: {}]   ;;  %s8517_s8 = inlined_call_operand.vmem [shape: f32[2,64,5], index: 8, kind: input, shape index: {}]   ;;  %s8518_s9 = inlined_call_operand.vmem [shape: bf16[2,64], index: 9, kind: input, shape index: {}]   ;;  %s8519_s10 = inlined_call_operand.vmem [shape: f32[64,8], index: 10, kind: input, shape index: {}]   ;;  %s8520_s11 = inlined_call_operand.vmem [shape: f32[2,7,256], index: 11, kind: output, shape index: {}]  }
   0x1   :  { %s5400_s19 = smov 0  }
   0x2 LB: > { %s33_s20 = sadd.s32 1, %s5322_s18  ;;  %p4642_p0 = scmp.ge.s32.totalorder %s5326_s19, 1  ;;  %s5326_s19 = sphi %s5400_s19, %s21_s19   ;;  %s5322_s18 = sphi %s5398_s18, %s8784_s18   ;;  %s5318_s17 = sphi %s5396_s17, %s8783_s17  }
   0x3   : > { %p35_p1 = scmp.ge.s32.totalorder %s33_s20, 2  ;;  %p385_p2 = scmp.lt.s32.totalorder %s5326_s19, 3 }
   0x5   : > { %s8786_s20 = smov (%p35_p1, %s33_s20), 0  ;;  %p386_p3 = pnand %p4642_p0, %p385_p2 }
   0x7   : > { %389 = sbr.rel (%p386_p3) target bundleno = 2385 (0x951), region = 64 }
   0xe   : > { %v5417_v0 = vld [vmem:[%s8515_s6] sm:$0xff]  ;;  %p448_p4 = scmp.lt.s32.totalorder %s5318_s17, 1  ;;  %v8525_v2 = vmov 0   ;;  %v5430_v3 = vld [vmem:[%s8515_s6 + $0x8] sm:$0xff]  ;;  %v816_v5 = vld [vmem:[%s8513_s4 + $0x18] sm:$0xff]  ;;  %v8527_v6 = vmov 1  }
   0xf   : > { %v813_v1 = vld [vmem:[%s8513_s4] sm:$0xff]  ;;  %4792 = vset.pattern.permute.xlu1 %v8525_v2  ;;  %4791 = vset.pattern.permute.xlu0 %v8525_v2  ;;  %v814_v4 = vld [vmem:[%s8513_s4 + $0x8] sm:$0xff]  ;;  %v815_v8 = vld [vmem:[%s8513_s4 + $0x10] sm:$0xff]  ;;  %v8523_v11 = vmov 2   ;;  %vm768_vm0 = vcmask 1042432   ;;  %vm1305_vm5 = vcmask 523264  }
  0x10   : > { %907 = vperm.xlu1 %4792, %v5417_v0   ;;  %832 = vperm.xlu0 %4791, %v813_v1   ;;  %s8788_s17 = smov (!%p448_p4, %s5318_s17), 1  ;;  %v5457_v9 = vld [vmem:[%s8515_s6 + $0x10] sm:$0xff]  ;;  %v5464_v10 = vld [vmem:[%s8513_s4 + $0x28] sm:$0xff]  ;;  %v5473_v14 = vld [vmem:[%s8515_s6 + $0x20] sm:$0xff]  ;;  %vm2529_vm6 = vcmask 1041408  }
  0x11   : > { %1350 = vmatprep.mubr.bf16.mxu0 %v8525_v2  ;;  %2053 = vmatprep.mubr.bf16.mxu1 %v8525_v2  ;;  %s4755_s29 = sshll.u32 %s8788_s17, 6  ;;  %v5480_v15 = vld [vmem:[%s8515_s6 + $0x18] sm:$0xff]  ;;  %v5497_v18 = vld [vmem:[%s8515_s6 + $0x30] sm:$0xff]  ;;  %v817_v19 = vld [vmem:[%s8513_s4 + $0x20] sm:$0xff]  ;;  %s4757_s27 = sshll.u32 %s8788_s17, 3 }
  0x12   : > { %s5447_s15 = scalar_lea.vmem %s8510_s1, %s4755_s29  ;;  %v5485_v16 = vld [vmem:[%s8513_s4 + $0x38] sm:$0xff]  ;;  %v5513_v21 = vld [vmem:[%s8515_s6 + $0x28] sm:$0xff]  ;;  %v819_v22 = vld [vmem:[%s8513_s4 + $0x30] sm:$0xff]  ;;  %s470_s12 = scalar_lea.vmem %s8511_s2, %s4757_s27 }
  0x13   : > { %v483_v7 = vld [vmem:[%s5447_s15] sm:$0xff]  ;;  %v485_v12 = vld [vmem:[%s5447_s15 + $0x10] sm:$0xff]  ;;  %v484_v13 = vld [vmem:[%s5447_s15 + $0x8] sm:$0xff]  ;;  %s5589_s21 = scalar_lea.vmem %s8509_s0, %s4755_s29  ;;  %s4758_s14 = sshll.u32 %s8788_s17, 4 }
  0x14   : > { %912 = vperm.xlu1 %4792, %v5430_v3   ;;  %837 = vperm.xlu0 %4791, %v814_v4   ;;  %v5490_v17 = vld [vmem:[%s5447_s15 + $0x20] sm:$0xff]  ;;  %v486_v20 = vld [vmem:[%s5447_s15 + $0x18] sm:$0xff]  ;;  %v488_v23 = vld [vmem:[%s5447_s15 + $0x28] sm:$0xff]  ;;  %s7298_s29 = scalar_lea.vmem %s8520_s11, %s4758_s14 }
  0x15   : > { %v489_v24 = vld [vmem:[%s5447_s15 + $0x30] sm:$0xff]  ;;  %v5527_v25 = vld [vmem:[%s470_s12] sm:$0x77]  ;;  %v5539_v33 = vld [vmem:[%s8515_s6 + $0x38] sm:$0xff] }
  0x16   : > { %v764_v26 = vmul.f32 %v5527_v25, %v5527_v25  ;;  %v490_v43 = vld [vmem:[%s5447_s15 + $0x38] sm:$0xff] }
  0x18   : > { %4793 = vset.pattern.permute.xlu1 %v8527_v6  ;;  %847 = vperm.xlu0 %4791, %v816_v5   ;;  %v766_v27 = vcombine.high %v764_v26, %v764_v26  ;;  %v769_v28 = vsel %vm768_vm0, %v764_v26, 0.0 }
  0x19   : > { %966 = vperm.xlu1 %4793, %v814_v4   ;;  %v770_v30 = vrot.slane %v769_v28, 4 }
  0x1a   : > { %v776_v29 = vsel %vm768_vm0, %v766_v27, 0.0 }
  0x1b   : > { %v777_v31 = vrot.slane %v776_v29, 4  ;;  %v771_v32 = vadd.f32 %v770_v30, %v769_v28  ;;  %v491_v28 = vld [vmem:[%s5589_s21] sm:$0xff] }
  0x1c   : > { %517 = vperm.xlu0 %4791, %v483_v7  }
  0x1d   : > { %4794 = vset.pattern.permute.xlu1 %v8525_v2  ;;  %v778_v34 = vadd.f32 %v777_v31, %v776_v29  ;;  %v772_v35 = vrot.slane %v771_v32, 2 }
  0x1e   : > { %842 = vperm.xlu1 %4794, %v815_v8  }
  0x1f   : > { %v779_v36 = vrot.slane %v778_v34, 2  ;;  %v773_v37 = vadd.f32 %v772_v35, %v771_v32 }
  0x20   : > { %917 = vperm.xlu0 %4791, %v5457_v9  }
  0x21   : > { %v780_v38 = vadd.f32 %v779_v36, %v778_v34  ;;  %v774_v39 = vrot.slane %v773_v37, 1  ;;  %v500_v36 = vunpack.c.h.bf16 %v491_v28 }
  0x22   : > { %4795 = vset.pattern.permute.xlu1 %v8523_v11 }
  0x23   : > { %1044 = vperm.xlu1 %4795, %v813_v1   ;;  %v781_v40 = vrot.slane %v780_v38, 1  ;;  %v775_v41 = vadd.f32 %v774_v39, %v773_v37 }
  0x24   : > { %857 = vperm.xlu0 %4791, %v5464_v10  }
  0x25   : > { %v782_v42 = vadd.f32 %v781_v40, %v780_v38  ;;  %4953 = vrsqrt.f32 %v775_v41  ;;  %vm785_vm1 = vcmp.eq.f32.partialorder %v775_v41, inf  ;;  %v788_v50 = vand.u32 2147483648, %v775_v41 }
  0x26   : > { %vm787_vm3 = vcmp.eq.f32.partialorder %v775_v41, 0.0  ;;  %v499_v38 = vunpack.c.l.bf16 %v491_v28 }
  0x27   : > { %1048 = vperm.xlu1 %4795, %v814_v4   ;;  %4955 = vrsqrt.f32 %v782_v42  ;;  %vm792_vm2 = vcmp.eq.f32.partialorder %v782_v42, inf  ;;  %v795_v51 = vand.u32 2147483648, %v782_v42  ;;  %vm794_vm4 = vcmp.eq.f32.partialorder %v782_v42, 0.0 }
  0x28   : > { %527 = vperm.xlu0 %4791, %v485_v12  }
  0x2b   : > { %4796 = vset.pattern.permute.xlu1 %v8525_v2 }
  0x2c   : > { %522 = vperm.xlu1 %4796, %v484_v13   ;;  %927 = vperm.xlu0 %4791, %v5473_v14  }
  0x2f   : > { %v4954_v44 = vpop.eup %4953 }
  0x30   : > { %922 = vperm.xlu1 %4796, %v5480_v15   ;;  %867 = vperm.xlu0 %4791, %v5485_v16   ;;  %v784_v46 = vmul.f32 %v4954_v44, %v775_v41 }
  0x31   : > { %v4956_v45 = vpop.eup %4955 }
  0x32   : > { %v791_v47 = vmul.f32 %v4956_v45, %v782_v42  ;;  %v786_v52 = vsel %vm785_vm1, %v775_v41, %v784_v46 }
  0x33   : > { %v789_v56 = vsel %vm787_vm3, %v788_v50, %v786_v52 }
  0x34   : > { %4797 = vset.pattern.permute.xlu1 %v8527_v6  ;;  %537 = vperm.xlu0 %4791, %v5490_v17   ;;  %v793_v53 = vsel %vm792_vm2, %v782_v42, %v791_v47  ;;  %v797_v60 = vmax.f32 %v789_v56, 1e-12 }
  0x35   : > { %974 = vperm.xlu1 %4797, %v816_v5   ;;  %v796_v57 = vsel %vm794_vm4, %v795_v51, %v793_v53  ;;  %v5622_v51 = vld [vmem:[%s8513_s4 + $0x40] sm:$0xff] }
  0x36   : > { %v798_v61 = vmax.f32 %v796_v57, 1e-12 }
  0x38   : > { %937 = vperm.xlu0 %4791, %v5497_v18   ;;  %v801_v63 = vcombine.low %v797_v60, %v798_v61 }
  0x39   : > { %572 = vperm.xlu1 %4797, %v483_v7   ;;  %v871_v7 = vlaneseq }
  0x3a   : > { %4957 = vrcp.f32 %v801_v63 }
  0x3c   : > { %4807 = vset.pattern.permute.xlu0 %v8523_v11 }
  0x3d   : > { %4798 = vset.pattern.permute.xlu1 %v8525_v2  ;;  %1072 = vperm.xlu0 %4807, %v5485_v16  }
  0x3e   : > { %852 = vperm.xlu1 %4798, %v817_v19  }
  0x41   : > { %4808 = vset.pattern.permute.xlu0 %v8527_v6 }
  0x42   : > { %4799 = vset.pattern.permute.xlu1 %v8523_v11  ;;  %962 = vperm.xlu0 %4808, %v813_v1  }
  0x43   : > { %1052 = vperm.xlu1 %4799, %v815_v8  }
  0x46   : > { %970 = vperm.xlu0 %4808, %v815_v8  }
  0x47   : > { %1056 = vperm.xlu1 %4799, %v816_v5  }
  0x4a   : > { %576 = vperm.xlu0 %4808, %v484_v13   ;;  %v4958_v13 = vpop.eup %4957 }
  0x4b   : > { %4800 = vset.pattern.permute.xlu1 %v8525_v2 }
  0x4c   : > { %532 = vperm.xlu1 %4800, %v486_v20  }
  0x4e   : > { %978 = vperm.xlu0 %4808, %v817_v19  }
  0x50   : > { %932 = vperm.xlu1 %4800, %v5513_v21  }
  0x52   : > { %584 = vperm.xlu0 %4808, %v486_v20  }
  0x54   : > { %4801 = vset.pattern.permute.xlu1 %v8527_v6 }
  0x55   : > { %982 = vperm.xlu1 %4801, %v5464_v10  }
  0x56   : > { %986 = vperm.xlu0 %4808, %v819_v22  }
  0x59   : > { %580 = vperm.xlu1 %4801, %v485_v12   ;;  %v872_v12 = vshrl.u32 %v871_v7, 7 }
  0x5a   : > { %592 = vperm.xlu0 %4808, %v488_v23  }
  0x5b   : > { %v5576_v20 = vsub.s32 0, %v872_v12  ;;  %v1077_v30 = vsub.s32 2, %v872_v12  ;;  %v1081_v34 = vsub.s32 6, %v872_v12 }
  0x5d   : > { %4802 = vset.pattern.permute.xlu1 %v8525_v2  ;;  %8614 = vst [vmem:[#allocation3_spill] sm:$0xff] %v5576_v20 }
  0x5e   : > { %862 = vperm.xlu1 %4802, %v819_v22   ;;  %596 = vperm.xlu0 %4808, %v489_v24  }
  0x62   : > { %4803 = vset.pattern.permute.xlu1 %v8523_v11  ;;  %4816 = vset.pattern.permute.xlu0 %v8523_v11 }
  0x63   : > { %1060 = vperm.xlu1 %4803, %v817_v19   ;;  %v5574_v19 = vmul.f32 %v4958_v13, %v5527_v25 }
  0x65   : > { %8613 = vst [vmem:[#allocation2_spill] sm:$0xff] %v5574_v19  ;;  %v874_v25 = vrot.slane %v5574_v19, %v5576_v20  ;;  %v1078_v41 = vrot.slane %v5574_v19, %v1077_v30  ;;  %v1082_v44 = vrot.slane %v5574_v19, %v1081_v34  ;;  %v5652_v34 = vld [vmem:[%s5589_s21 + $0x18] sm:$0xff] }
  0x67   : > { %1064 = vperm.xlu1 %4803, %v5464_v10   ;;  %v5603_v39 = vrot.slane %v874_v25, %v5576_v20  ;;  %v5626_v56 = vrot.slane %v1078_v41, %v1077_v30  ;;  %v5629_v60 = vrot.slane %v1082_v44, %v1077_v30 }
  0x69   : > { %8616 = vst [vmem:[#allocation5_spill] sm:$0xff] %v5603_v39  ;;  %8620 = vst [vmem:[#allocation9_spill] sm:$0xff] %v5626_v56 }
  0x6a   : > { %8621 = vst [vmem:[#allocation10_spill] sm:$0xff] %v5629_v60 }
  0x6b   : > { %4804 = vset.pattern.permute.xlu1 %v8525_v2 }
  0x6c   : > { %542 = vperm.xlu1 %4804, %v488_v23   ;;  %v877_v23 = vsub.s32 4, %v872_v12 }
  0x6e   : > { %v878_v31 = vrot.slane %v5574_v19, %v877_v23 }
  0x70   : > { %942 = vperm.xlu1 %4804, %v5539_v33   ;;  %v5610_v42 = vrot.slane %v878_v31, %v5576_v20 }
  0x72   : > { %8618 = vst [vmem:[#allocation7_spill] sm:$0xff] %v5610_v42 }
  0x74   : > { %4805 = vset.pattern.permute.xlu1 %v8527_v6 }
  0x75   : > { %990 = vperm.xlu1 %4805, %v5485_v16  }
  0x79   : > { %588 = vperm.xlu1 %4805, %v5490_v17  }
  0x7d   : > { %4806 = vset.pattern.permute.xlu1 %v8523_v11 }
  0x7e   : > { %1068 = vperm.xlu1 %4806, %v819_v22   ;;  %v5578_v22 = vsub.s32 1, %v872_v12 }
  0x80   : > { %8615 = vst [vmem:[#allocation4_spill] sm:$0xff] %v5578_v22  ;;  %v996_v29 = vrot.slane %v5574_v19, %v5578_v22 }
  0x82   : > { %4809 = vset.pattern.permute.xlu1 %v8525_v2  ;;  %v5606_v40 = vrot.slane %v996_v29, %v5578_v22 }
  0x83   : > { %547 = vperm.xlu1 %4809, %v489_v24   ;;  %v999_v24 = vsub.s32 5, %v872_v12 }
  0x84   : > { %8617 = vst [vmem:[#allocation6_spill] sm:$0xff] %v5606_v40 }
  0x85   : > { %v1000_v32 = vrot.slane %v5574_v19, %v999_v24  ;;  %v492_v24 = vld [vmem:[%s5589_s21 + $0x8] sm:$0xff] }
  0x87   : > { %552 = vperm.xlu1 %4809, %v490_v43  }
  0x8b   : > { %4810 = vset.pattern.permute.xlu1 %v8527_v6 }
  0x8c   : > { %600 = vperm.xlu1 %4810, %v490_v43   ;;  %v5613_v43 = vrot.slane %v1000_v32, %v5578_v22  ;;  %v501_v32 = vunpack.c.l.bf16 %v492_v24 }
  0x8e   : > { %8619 = vst [vmem:[#allocation8_spill] sm:$0xff] %v5613_v43 }
  0x8f   : > { %v5549_v48 = vpop.permute.xlu1 %907  ;;  %v5551_v49 = vpop.permute.xlu0 %832 }
  0x90   : > { %1254 = vperm.xlu1 %4810, %v5417_v0   ;;  %v890_v25 = vmul.f32 %v5610_v42, %v5551_v49 }
  0x93   : > { %v5554_v54 = vpop.permute.xlu1 %912  ;;  %v838_v55 = vpop.permute.xlu0 %837 }
  0x94   : > { %4811 = vset.pattern.permute.xlu1 %v8525_v2  ;;  %v891_v46 = vmul.f32 %v5603_v39, %v838_v55  ;;  %v892_v52 = vmul.f32 %v5610_v42, %v838_v55  ;;  %v889_v55 = vmul.f32 %v5603_v39, %v5551_v49 }
  0x95   : > { %1393 = vperm.xlu1 %4811, %v5622_v51  }
  0x96   : > { %v947_v63 = vadd.f32 %v5554_v54, %v891_v46  ;;  %v946_v46 = vadd.f32 %v5549_v48, %v890_v25 }
  0x97   : > { %v5557_v58 = vpop.permute.xlu0 %847 }
  0x98   : > { %v967_v59 = vpop.permute.xlu1 %966 }
  0x99   : > { %v1013_v57 = vmul.f32 %v5606_v40, %v967_v59  ;;  %v1014_v61 = vmul.f32 %v5613_v43, %v967_v59  ;;  %4812 = vset.pattern.permute.xlu1 %v8527_v6 }
  0x9a   : > { %1262 = vperm.xlu1 %4812, %v5457_v9  }
  0x9b   : > { %v518_v62 = vpop.permute.xlu0 %517  ;;  %v1029_v29 = vadd.f32 %v1013_v57, %v947_v63  ;;  %v505_v57 = vunpack.c.l.bf16 %v5652_v34 }
  0x9c   : > { %v556_v47 = vmul.f32 %v518_v62, %v500_v36  ;;  %v555_v53 = vmul.f32 %v518_v62, %v499_v38  ;;  %v948_v62 = vadd.f32 %v5554_v54, %v892_v52  ;;  %v502_v38 = vunpack.c.h.bf16 %v492_v24 }
  0x9d   : > { %v5559_v0 = vpop.permute.xlu1 %842 }
  0x9e   : > { %v1030_v30 = vadd.f32 %v1014_v61, %v948_v62  ;;  %v893_v49 = vmul.f32 %v5603_v39, %v5559_v0  ;;  %4813 = vset.pattern.permute.xlu1 %v8525_v2  ;;  %v894_v52 = vmul.f32 %v5610_v42, %v5559_v0  ;;  %v895_v62 = vmul.f32 %v5603_v39, %v5557_v58 }
  0x9f   : > { %v5561_v1 = vpop.permute.xlu0 %917  ;;  %v506_v0 = vunpack.c.h.bf16 %v5652_v34 }
  0xa2   : > { %v5563_v4 = vpop.permute.xlu1 %1044 }
  0xa3   : > { %v5565_v5 = vpop.permute.xlu0 %857 }
  0xa6   : > { %v1049_v8 = vpop.permute.xlu1 %1048 }
  0xa7   : > { %v5567_v10 = vpop.permute.xlu0 %527  ;;  %v1095_v7 = vmul.f32 %v5626_v56, %v1049_v8  ;;  %v1096_v23 = vmul.f32 %v5629_v60, %v1049_v8  ;;  %v945_v8 = vadd.f32 %v5549_v48, %v889_v55  ;;  %v1094_v48 = vmul.f32 %v5629_v60, %v5563_v4 }
  0xa9   : > { %v1111_v31 = vadd.f32 %v1095_v7, %v1029_v29  ;;  %v1112_v36 = vadd.f32 %v1096_v23, %v1030_v30  ;;  %v896_v29 = vmul.f32 %v5610_v42, %v5557_v58  ;;  %v4652_v58 = vld [vmem:[%s8513_s4 + $0x48] sm:$0xff] }
  0xaa   : > { %1532 = vperm.xlu0 %4816, %v4652_v58  }
  0xab   : > { %v5569_v16 = vpop.permute.xlu1 %522  ;;  %v5571_v17 = vpop.permute.xlu0 %927  ;;  %v4661_v61 = vmul.f32 -1.442695, %v1111_v31  ;;  %v4662_v23 = vmul.f32 -1.442695, %v1112_v36 }
  0xad   : > { %4959 = vpow2.f32 %v4661_v61 }
  0xae   : > { %4961 = vpow2.f32 %v4662_v23  ;;  %4817 = vset.pattern.permute.xlu0 %v8525_v2 }
  0xaf   : > { %v5580_v26 = vpop.permute.xlu1 %922  ;;  %v5582_v27 = vpop.permute.xlu0 %867  ;;  %1398 = vperm.xlu0 %4817, %v4652_v58  }
  0xb3   : > { %v5598_v35 = vpop.permute.xlu0 %537 }
  0xb4   : > { %v5600_v37 = vpop.permute.xlu1 %974 }
  0xb7   : > { %v5616_v45 = vpop.permute.xlu0 %937 }
  0xb8   : > { %v573_v50 = vpop.permute.xlu1 %572 }
  0xb9   : > { %v5634_v12 = vadd.f32 %v573_v50, %v556_v47  ;;  %v5643_v28 = vadd.f32 %v573_v50, %v555_v53  ;;  %v1093_v53 = vmul.f32 %v5626_v56, %v5563_v4  ;;  %v949_v4 = vadd.f32 %v5561_v1, %v893_v49 }
  0xba   : > { %v1017_v49 = vmul.f32 %v5606_v40, %v5600_v37 }
  0xbb   : > { %v636_v54 = vmul.f32 0.044715, %v5634_v12  ;;  %v635_v41 = vmul.f32 0.044715, %v5643_v28 }
  0xbc   : > { %v5636_v13 = vpop.permute.xlu0 %1072 }
  0xbd   : > { %v5645_v59 = vpop.permute.xlu1 %852  ;;  %v652_v55 = vmul.f32 %v636_v54, %v5634_v12  ;;  %v651_v25 = vmul.f32 %v635_v41, %v5643_v28  ;;  %v557_v54 = vmul.f32 %v5569_v16, %v501_v32  ;;  %v5687_v41 = vld [vmem:[%s8513_s4 + $0x50] sm:$0xff] }
  0xbe   : > { %1403 = vperm.xlu1 %4813, %v5687_v41  }
  0xbf   : > { %v668_v32 = vmul.f32 %v652_v55, %v5634_v12 }
  0xc1   : > { %v963_v44 = vpop.permute.xlu0 %962 }
  0xc2   : > { %v1011_v9 = vmul.f32 %v5606_v40, %v963_v44  ;;  %v1012_v47 = vmul.f32 %v5613_v43, %v963_v44  ;;  %v5662_v50 = vpop.permute.xlu1 %1052  ;;  %v950_v44 = vadd.f32 %v5561_v1, %v894_v52  ;;  %v1018_v52 = vmul.f32 %v5613_v43, %v5600_v37  ;;  %4814 = vset.pattern.permute.xlu1 %v8527_v6 }
  0xc3   : > { %v1098_v37 = vmul.f32 %v5629_v60, %v5662_v50  ;;  %1468 = vperm.xlu1 %4814, %v4652_v58   ;;  %v493_v58 = vld [vmem:[%s5589_s21 + $0x10] sm:$0xff] }
  0xc4   : > { %v1027_v63 = vadd.f32 %v1011_v9, %v945_v8  ;;  %v1028_v7 = vadd.f32 %v1012_v47, %v946_v46  ;;  %v558_v46 = vmul.f32 %v5569_v16, %v502_v38  ;;  %v951_v16 = vadd.f32 %v5580_v26, %v895_v62 }
  0xc5   : > { %v971_v24 = vpop.permute.xlu0 %970  ;;  %v667_v47 = vmul.f32 %v651_v25, %v5643_v28 }
  0xc6   : > { %v1109_v30 = vadd.f32 %v1093_v53, %v1027_v63  ;;  %v1110_v31 = vadd.f32 %v1094_v48, %v1028_v7  ;;  %v1057_v8 = vpop.permute.xlu1 %1056  ;;  %v1016_v36 = vmul.f32 %v5613_v43, %v971_v24  ;;  %v1015_v38 = vmul.f32 %v5606_v40, %v971_v24 }
  0xc7   : > { %v1099_v48 = vmul.f32 %v5626_v56, %v1057_v8  ;;  %v952_v63 = vadd.f32 %v5580_v26, %v896_v29  ;;  %v1033_v23 = vadd.f32 %v1017_v49, %v951_v16  ;;  %v1100_v24 = vmul.f32 %v5629_v60, %v1057_v8  ;;  %1266 = vperm.xlu1 %4814, %v5480_v15  }
  0xc8   : > { %v4660_v1 = vmul.f32 -1.442695, %v1110_v31  ;;  %v4659_v53 = vmul.f32 -1.442695, %v1109_v30  ;;  %v1032_v7 = vadd.f32 %v1016_v36, %v950_v44  ;;  %v684_v31 = vadd.f32 %v668_v32, %v5634_v12 }
  0xc9   : > { %v577_v9 = vpop.permute.xlu0 %576  ;;  %v1031_v26 = vadd.f32 %v1015_v38, %v949_v4  ;;  %v683_v44 = vadd.f32 %v667_v47, %v5643_v28  ;;  %v1034_v8 = vadd.f32 %v1018_v52, %v952_v63  ;;  %v1097_v4 = vmul.f32 %v5626_v56, %v5662_v50  ;;  %v5734_v50 = vld [vmem:[%s5589_s21 + $0x28] sm:$0xff] }
  0xca   : > { %v5702_v61 = vadd.f32 %v577_v9, %v557_v54  ;;  %4963 = vpow2.f32 %v4660_v1  ;;  %v5705_v55 = vadd.f32 %v577_v9, %v558_v46  ;;  %v1115_v54 = vadd.f32 %v1099_v48, %v1033_v23  ;;  %v5721_v46 = vld [vmem:[%s8513_s4 + $0x58] sm:$0xff] }
  0xcb   : > { %v533_v62 = vpop.permute.xlu1 %532  ;;  %4965 = vpow2.f32 %v4659_v53  ;;  %v1114_v36 = vadd.f32 %v1098_v37, %v1032_v7  ;;  %v1116_v16 = vadd.f32 %v1100_v24, %v1034_v8  ;;  %v700_v47 = vmul.f32 0.7978846, %v684_v31  ;;  %1408 = vperm.xlu0 %4817, %v5721_v46   ;;  %v4960_v7 = vpop.eup %4959  ;;  %1472 = vperm.xlu1 %4814, %v5687_v41  }
  0xcc   : > { %v637_v25 = vmul.f32 0.044715, %v5702_v61  ;;  %v638_v30 = vmul.f32 0.044715, %v5705_v55  ;;  %v561_v38 = vmul.f32 %v533_v62, %v505_v57  ;;  %v562_v9 = vmul.f32 %v533_v62, %v506_v0  ;;  %v5746_v57 = vld [vmem:[%s8513_s4 + $0x68] sm:$0xff]  ;;  %v4962_v0 = vpop.eup %4961 }
  0xcd   : > { %v5714_v29 = vpop.permute.xlu0 %978  ;;  %v1113_v52 = vadd.f32 %v1097_v4, %v1031_v26  ;;  %v699_v63 = vmul.f32 0.7978846, %v683_v44  ;;  %v4665_v23 = vmul.f32 -1.442695, %v1115_v54  ;;  %v503_v62 = vunpack.c.l.bf16 %v493_v58 }
  0xce   : > { %v654_v1 = vmul.f32 %v638_v30, %v5705_v55  ;;  %v653_v32 = vmul.f32 %v637_v25, %v5702_v61  ;;  %v504_v31 = vunpack.c.h.bf16 %v493_v58  ;;  %v4664_v37 = vmul.f32 -1.442695, %v1114_v36 }
  0xcf   : > { %v5725_v49 = vpop.permute.xlu1 %932  ;;  %v4666_v26 = vmul.f32 -1.442695, %v1116_v16  ;;  %4967 = vtanh.f32 %v700_v47  ;;  %v509_v8 = vunpack.c.l.bf16 %v5734_v50  ;;  %1418 = vperm.xlu0 %4817, %v5746_v57   ;;  %v4663_v36 = vmul.f32 -1.442695, %v1113_v52  ;;  %4815 = vset.pattern.permute.xlu1 %v8523_v11 }
  0xd0   : > { %v670_v48 = vmul.f32 %v654_v1, %v5705_v55  ;;  %v669_v34 = vmul.f32 %v653_v32, %v5702_v61  ;;  %4969 = vtanh.f32 %v699_v63  ;;  %v1176_v63 = vadd.f32 1.0, %v4962_v0  ;;  %1528 = vperm.xlu1 %4815, %v5622_v51  }
  0xd1   : > { %v585_v53 = vpop.permute.xlu0 %584  ;;  %4971 = vpow2.f32 %v4665_v23 }
  0xd2   : > { %v5738_v25 = vadd.f32 %v585_v53, %v561_v38  ;;  %v5740_v24 = vadd.f32 %v585_v53, %v562_v9  ;;  %v686_v15 = vadd.f32 %v670_v48, %v5705_v55  ;;  %v685_v16 = vadd.f32 %v669_v34, %v5702_v61 }
  0xd3   : > { %v559_v38 = vmul.f32 %v5567_v10, %v503_v62  ;;  %v560_v9 = vmul.f32 %v5567_v10, %v504_v31  ;;  %4973 = vpow2.f32 %v4664_v37  ;;  %v1175_v48 = vadd.f32 1.0, %v4960_v7  ;;  %4822 = vset.pattern.permute.xlu0 %v8527_v6 }
  0xd4   : > { %v642_v30 = vmul.f32 0.044715, %v5740_v24  ;;  %v5750_v44 = vpop.permute.xlu1 %982  ;;  %v4964_v54 = vpop.eup %4963  ;;  %v641_v4 = vmul.f32 0.044715, %v5738_v25  ;;  %v702_v1 = vmul.f32 0.7978846, %v686_v15  ;;  %4975 = vpow2.f32 %v4666_v26  ;;  %1258 = vperm.xlu0 %4822, %v5430_v3   ;;  %4818 = vset.pattern.permute.xlu1 %v8527_v6 }
  0xd5   : > { %v1174_v47 = vadd.f32 1.0, %v4964_v54  ;;  %v4966_v53 = vpop.eup %4965  ;;  %v899_v10 = vmul.f32 %v5603_v39, %v5565_v5  ;;  %v701_v7 = vmul.f32 0.7978846, %v685_v16  ;;  %v897_v37 = vmul.f32 %v5603_v39, %v5645_v59  ;;  %1270 = vperm.xlu1 %4818, %v5473_v14  }
  0xd6   : > { %v658_v58 = vmul.f32 %v642_v30, %v5740_v24  ;;  %v657_v52 = vmul.f32 %v641_v4, %v5738_v25  ;;  %4977 = vtanh.f32 %v702_v1  ;;  %v1173_v0 = vadd.f32 1.0, %v4966_v53 }
  0xd7   : > { %4979 = vpow2.f32 %v4663_v36  ;;  %v898_v26 = vmul.f32 %v5610_v42, %v5645_v59  ;;  %v1019_v16 = vmul.f32 %v5606_v40, %v5714_v29  ;;  %v1020_v59 = vmul.f32 %v5613_v43, %v5714_v29 }
  0xd8   : > { %v581_v15 = vpop.permute.xlu1 %580  ;;  %v674_v32 = vmul.f32 %v658_v58, %v5740_v24  ;;  %4981 = vrcp.f32 %v1174_v47  ;;  %v5787_v58 = vmul.f32 %v5610_v42, %v5565_v5  ;;  %1464 = vperm.xlu0 %4822, %v5622_v51  }
  0xd9   : > { %v5763_v23 = vadd.f32 %v581_v15, %v559_v38  ;;  %v5765_v30 = vadd.f32 %v581_v15, %v560_v9  ;;  %4983 = vrcp.f32 %v1175_v48  ;;  %v4968_v36 = vpop.eup %4967  ;;  %v953_v48 = vadd.f32 %v5571_v17, %v897_v37  ;;  %4819 = vset.pattern.permute.xlu1 %v8525_v2 }
  0xda   : > { %v690_v34 = vadd.f32 %v674_v32, %v5740_v24  ;;  %4985 = vrcp.f32 %v1176_v63  ;;  %v673_v32 = vmul.f32 %v657_v52, %v5738_v25  ;;  %v4970_v38 = vpop.eup %4969  ;;  %v954_v29 = vadd.f32 %v5571_v17, %v898_v26 }
  0xdb   : > { %v639_v62 = vmul.f32 0.044715, %v5763_v23  ;;  %v640_v31 = vmul.f32 0.044715, %v5765_v30  ;;  %4987 = vtanh.f32 %v701_v7  ;;  %v4972_v53 = vpop.eup %4971  ;;  %v620_v63 = vmul.f32 0.5, %v5634_v12 }
  0xdc   : > { %v706_v54 = vmul.f32 0.7978846, %v690_v34  ;;  %4989 = vrcp.f32 %v1173_v0  ;;  %v689_v5 = vadd.f32 %v673_v32, %v5738_v25  ;;  %v732_v51 = vadd.f32 1.0, %v4968_v36  ;;  %v5807_v0 = vld [vmem:[%s8513_s4 + $0x60] sm:$0xff]  ;;  %1476 = vperm.xlu0 %4822, %v5721_v46  }
  0xdd   : > { %v655_v4 = vmul.f32 %v639_v62, %v5763_v23  ;;  %v656_v1 = vmul.f32 %v640_v31, %v5765_v30  ;;  %v5782_v3 = vpop.permute.xlu1 %862  ;;  %v4974_v15 = vpop.eup %4973  ;;  %v1035_v31 = vadd.f32 %v1019_v16, %v953_v48  ;;  %v622_v17 = vmul.f32 0.5, %v5705_v55  ;;  %1413 = vperm.xlu1 %4819, %v5807_v0  }
  0xde   : > { %4991 = vtanh.f32 %v706_v54  ;;  %v705_v34 = vmul.f32 0.7978846, %v689_v5  ;;  %v4976_v62 = vpop.eup %4975  ;;  %v619_v12 = vmul.f32 0.5, %v5643_v28  ;;  %v621_v26 = vmul.f32 0.5, %v5702_v61 }
  0xdf   : > { %v672_v9 = vmul.f32 %v656_v1, %v5765_v30  ;;  %v671_v47 = vmul.f32 %v655_v4, %v5763_v23  ;;  %v1179_v4 = vadd.f32 1.0, %v4972_v53  ;;  %v1036_v1 = vadd.f32 %v1020_v59, %v954_v29 }
  0xe0   : > { %v4978_v54 = vpop.eup %4977  ;;  %v955_v32 = vadd.f32 %v5725_v49, %v899_v10  ;;  %4993 = vtanh.f32 %v705_v34  ;;  %v1178_v61 = vadd.f32 1.0, %v4974_v15  ;;  %v5817_v55 = vmul.f32 %v732_v51, %v620_v63  ;;  %1278 = vperm.xlu0 %4822, %v5497_v18  }
  0xe1   : > { %v688_v52 = vadd.f32 %v672_v9, %v5765_v30  ;;  %v687_v7 = vadd.f32 %v671_v47, %v5763_v23  ;;  %v4980_v9 = vpop.eup %4979  ;;  %v734_v47 = vadd.f32 1.0, %v4978_v54  ;;  %v731_v48 = vadd.f32 1.0, %v4970_v38  ;;  %4820 = vset.pattern.permute.xlu1 %v8523_v11 }
  0xe2   : > { %v1061_v37 = vpop.permute.xlu1 %1060  ;;  %v4982_v28 = vpop.eup %4981  ;;  %8622 = vst [vmem:[#allocation11_spill] sm:$0xff] %v5817_v55  ;;  %v1180_v53 = vadd.f32 1.0, %v4976_v62  ;;  %v1021_v10 = vmul.f32 %v5606_v40, %v5750_v44  ;;  %v1177_v34 = vadd.f32 1.0, %v4980_v9  ;;  %v1022_v63 = vmul.f32 %v5613_v43, %v5750_v44  ;;  %1536 = vperm.xlu1 %4820, %v5687_v41  }
  0xe3   : > { %v704_v36 = vmul.f32 0.7978846, %v688_v52  ;;  %v1101_v16 = vmul.f32 %v5626_v56, %v1061_v37  ;;  %v703_v5 = vmul.f32 0.7978846, %v687_v7  ;;  %v4984_v59 = vpop.eup %4983  ;;  %v5821_v52 = vmul.f32 %v734_v47, %v622_v17 }
  0xe4   : > { %v4986_v7 = vpop.eup %4985  ;;  %v1102_v38 = vmul.f32 %v5629_v60, %v1061_v37  ;;  %v1222_v54 = vmul.f32 %v4982_v28, %v5817_v55  ;;  %v956_v18 = vadd.f32 %v5725_v49, %v5787_v58  ;;  %v5835_v9 = vmul.f32 %v731_v48, %v619_v12 }
  0xe5   : > { %4995 = vtanh.f32 %v704_v36  ;;  %8623 = vst [vmem:[#allocation12_spill] sm:$0xff] %v5821_v52  ;;  %v4988_v15 = vpop.eup %4987  ;;  %v1117_v51 = vadd.f32 %v1101_v16, %v1035_v31  ;;  %v1224_v17 = vmul.f32 %v4986_v7, %v5821_v52  ;;  %v5841_v31 = vld [vmem:[%s8513_s4 + $0x70] sm:$0xff]  ;;  %v1037_v16 = vadd.f32 %v1021_v10, %v955_v32 }
  0xe6   : > { %v1065_v29 = vpop.permute.xlu1 %1064  ;;  %4997 = vtanh.f32 %v703_v5  ;;  %v4990_v36 = vpop.eup %4989  ;;  %v733_v44 = vadd.f32 1.0, %v4988_v15  ;;  %8624 = vst [vmem:[#allocation13_spill] sm:$0xff] %v5835_v9  ;;  %1488 = vperm.xlu0 %4822, %v5841_v31   ;;  %v1038_v49 = vadd.f32 %v1022_v63, %v956_v18  ;;  %v1118_v58 = vadd.f32 %v1102_v38, %v1036_v1  ;;  %4821 = vset.pattern.permute.xlu1 %v8527_v6 }
  0xe7   : > { %4999 = vrcp.f32 %v1179_v4  ;;  %v1103_v62 = vmul.f32 %v5626_v56, %v1065_v29  ;;  %v5833_v4 = vpop.permute.xlu0 %986  ;;  %v1104_v47 = vmul.f32 %v5629_v60, %v1065_v29  ;;  %v1238_v5 = vpack.c.bf16 %v1224_v17, %v1222_v54  ;;  %1274 = vperm.xlu1 %4821, %v5513_v21  }
  0xe8   : > { %5001 = vrcp.f32 %v1178_v61  ;;  %v4992_v37 = vpop.eup %4991  ;;  %v5845_v12 = vmul.f32 %v733_v44, %v621_v26  ;;  %v4667_v41 = vmul.f32 -1.442695, %v1117_v51  ;;  %v1221_v10 = vmul.f32 %v4990_v36, %v5835_v9 }
  0xe9   : > { %5003 = vrcp.f32 %v1180_v53  ;;  %v1119_v61 = vadd.f32 %v1103_v62, %v1037_v16  ;;  %1318 = vmatprep.subr.bf16.mxu0 %v1238_v5  ;;  %v8626_v53 = vunpack.c.h.bf16 %v5734_v50  ;;  %v626_v1 = vmul.f32 0.5, %v5740_v24 }
  0xea   : > { %5005 = vrcp.f32 %v1177_v34  ;;  %8625 = vst [vmem:[#allocation14_spill] sm:$0xff] %v5845_v12  ;;  %v1223_v29 = vmul.f32 %v4984_v59, %v5845_v12  ;;  %v738_v26 = vadd.f32 1.0, %v4992_v37  ;;  %v4994_v34 = vpop.eup %4993  ;;  %v1120_v63 = vadd.f32 %v1104_v47, %v1038_v49  ;;  %4827 = vset.pattern.permute.xlu0 %v8523_v11  ;;  %v495_v59 = vld [vmem:[%s5589_s21 + $0x20] sm:$0xff] }
  0xeb   : > { %v543_v28 = vpop.permute.xlu1 %542  ;;  %v593_v7 = vpop.permute.xlu0 %592  ;;  %v625_v50 = vmul.f32 0.5, %v5738_v25  ;;  %v4668_v51 = vmul.f32 -1.442695, %v1118_v58  ;;  %v624_v54 = vmul.f32 0.5, %v5765_v30  ;;  %v737_v17 = vadd.f32 1.0, %v4994_v34  ;;  %1544 = vperm.xlu0 %4827, %v5807_v0   ;;  %1480 = vperm.xlu1 %4821, %v5807_v0  }
  0xec   : > { %v565_v48 = vmul.f32 %v543_v28, %v509_v8  ;;  %v566_v32 = vmul.f32 %v543_v28, %v8626_v53  ;;  %v1237_v62 = vpack.c.bf16 %v1223_v29, %v1221_v10  ;;  %5007 = vpow2.f32 %v4667_v41  ;;  %v5877_v41 = vld [vmem:[%s5589_s21 + $0x30] sm:$0xff] }
  0xed   : > { %v4669_v18 = vmul.f32 -1.442695, %v1119_v61  ;;  %v5869_v16 = vmul.f32 %v738_v26, %v626_v1  ;;  %v623_v47 = vmul.f32 0.5, %v5763_v23  ;;  %v4670_v30 = vmul.f32 -1.442695, %v1120_v63 }
  0xee   : > { %v5855_v38 = vadd.f32 %v593_v7, %v565_v48  ;;  %v5857_v15 = vadd.f32 %v593_v7, %v566_v32  ;;  %1319 = vmatpush1.bf16.msra.mxu0 %v1237_v62  ;;  %v5874_v28 = vmul.f32 %v737_v17, %v625_v50  ;;  %v507_v48 = vunpack.c.l.bf16 %v495_v59  ;;  %v5901_v17 = vld [vmem:[%s8515_s6 + $0x8] sm:$0xff] }
  0xef   : > { %v4996_v8 = vpop.eup %4995  ;;  %v5863_v24 = vpop.permute.xlu1 %942  ;;  %8627 = vst [vmem:[#allocation15_spill] sm:$0xff] %v5869_v16  ;;  %5009 = vpow2.f32 %v4668_v51  ;;  %1552 = vperm.xlu0 %4827, %v5841_v31   ;;  %v508_v10 = vunpack.c.h.bf16 %v495_v59  ;;  %v511_v34 = vunpack.c.l.bf16 %v5877_v41  ;;  %4823 = vset.pattern.permute.xlu1 %v8523_v11  ;;  %v902_v51 = vmul.f32 %v5610_v42, %v5782_v3 }
  0xf0   : > { %v4998_v36 = vpop.eup %4997  ;;  %v645_v25 = vmul.f32 0.044715, %v5855_v38  ;;  %v646_v21 = vmul.f32 0.044715, %v5857_v15  ;;  %v736_v37 = vadd.f32 1.0, %v4996_v8  ;;  %8628 = vst [vmem:[#allocation16_spill] sm:$0xff] %v5874_v28  ;;  %5011 = vpow2.f32 %v4669_v18  ;;  %1540 = vperm.xlu1 %4823, %v5721_v46  }
  0xf1   : > { %v5000_v44 = vpop.eup %4999  ;;  %v735_v5 = vadd.f32 1.0, %v4998_v36  ;;  %5013 = vpow2.f32 %v4670_v30  ;;  %v563_v59 = vmul.f32 %v5598_v35, %v507_v48  ;;  %v903_v36 = vmul.f32 %v5603_v39, %v5582_v27 }
  0xf2   : > { %v661_v49 = vmul.f32 %v645_v25, %v5855_v38  ;;  %v662_v58 = vmul.f32 %v646_v21, %v5857_v15  ;;  %v5002_v61 = vpop.eup %5001  ;;  %v5880_v53 = vmul.f32 %v736_v37, %v624_v54  ;;  %v1227_v50 = vmul.f32 %v5000_v44, %v5874_v28 }
  0xf3   : > { %v5882_v32 = vmul.f32 %v735_v5, %v623_v47  ;;  %v5004_v23 = vpop.eup %5003  ;;  %v512_v54 = vunpack.c.h.bf16 %v5877_v41  ;;  %1705 = vperm.xlu0 %4827, %v5901_v17   ;;  %v564_v18 = vmul.f32 %v5598_v35, %v508_v10  ;;  %v904_v37 = vmul.f32 %v5610_v42, %v5582_v27 }
  0xf4   : > { %8629 = vst [vmem:[#allocation17_spill] sm:$0xff] %v5880_v53  ;;  %v991_v29 = vpop.permute.xlu1 %990  ;;  %v678_v7 = vmul.f32 %v662_v58, %v5857_v15  ;;  %v5006_v1 = vpop.eup %5005  ;;  %v1226_v26 = vmul.f32 %v5002_v61, %v5880_v53  ;;  %v1228_v0 = vmul.f32 %v5004_v23, %v5869_v16  ;;  %v677_v8 = vmul.f32 %v661_v49, %v5855_v38 }
  0xf5   : > { %8630 = vst [vmem:[#allocation18_spill] sm:$0xff] %v5882_v32  ;;  %v1225_v63 = vmul.f32 %v5006_v1, %v5882_v32  ;;  %v1107_v46 = vmul.f32 %v5626_v56, %v5636_v13  ;;  %v1025_v47 = vmul.f32 %v5606_v40, %v991_v29  ;;  %v901_v49 = vmul.f32 %v5603_v39, %v5782_v3 }
  0xf6   : > { %v1240_v62 = vpack.c.bf16 %v1228_v0, %v1226_v26  ;;  %v694_v44 = vadd.f32 %v678_v7, %v5857_v15  ;;  %v5008_v30 = vpop.eup %5007  ;;  %v1026_v35 = vmul.f32 %v5613_v43, %v991_v29  ;;  %v693_v61 = vadd.f32 %v677_v8, %v5855_v38  ;;  %4824 = vset.pattern.permute.xlu1 %v8525_v2 }
  0xf7   : > { %v1239_v21 = vpack.c.bf16 %v1227_v50, %v1225_v63  ;;  %v958_v27 = vadd.f32 %v5616_v45, %v902_v51  ;;  %v1024_v48 = vmul.f32 %v5613_v43, %v5833_v4  ;;  %v959_v23 = vadd.f32 %v5863_v24, %v903_v36  ;;  %1717 = vperm.xlu0 %4827, %v5473_v14  }
  0xf8   : > { %v589_v25 = vpop.permute.xlu1 %588  ;;  %1320 = vmatprep.subr.bf16.mxu0 %v1240_v62  ;;  %v960_v3 = vadd.f32 %v5863_v24, %v904_v37  ;;  %v710_v7 = vmul.f32 0.7978846, %v694_v44  ;;  %1423 = vperm.xlu1 %4824, %v5841_v31   ;;  %v1023_v26 = vmul.f32 %v5606_v40, %v5833_v4  ;;  %v1181_v0 = vadd.f32 1.0, %v5008_v30 }
  0xf9   : > { %v5913_v5 = vadd.f32 %v589_v25, %v563_v59  ;;  %v5918_v58 = vadd.f32 %v589_v25, %v564_v18  ;;  %1321 = vmatpush1.bf16.msra.mxu0 %v1239_v21  ;;  %v5010_v1 = vpop.eup %5009  ;;  %v1041_v63 = vadd.f32 %v1025_v47, %v959_v23  ;;  %v957_v51 = vadd.f32 %v5616_v45, %v901_v49 }
  0xfa   : > { %v5012_v59 = vpop.eup %5011  ;;  %v1042_v14 = vadd.f32 %v1026_v35, %v960_v3  ;;  %v709_v62 = vmul.f32 0.7978846, %v693_v61  ;;  %v1108_v36 = vmul.f32 %v5629_v60, %v5636_v13  ;;  %v1040_v31 = vadd.f32 %v1024_v48, %v958_v27 }
  0xfb   : > { %v643_v10 = vmul.f32 0.044715, %v5913_v5  ;;  %v644_v29 = vmul.f32 0.044715, %v5918_v58  ;;  %v8521_v25 = vmov 3   ;;  %v5014_v21 = vpop.eup %5013  ;;  %v1182_v44 = vadd.f32 1.0, %v5010_v1 }
  0xfc   : > { %4834 = vset.pattern.permute.xlu0 %v8521_v25  ;;  %5015 = vtanh.f32 %v710_v7  ;;  %4825 = vset.pattern.permute.xlu1 %v8527_v6  ;;  %v1183_v13 = vadd.f32 1.0, %v5012_v59  ;;  %v1123_v47 = vadd.f32 %v1107_v46, %v1041_v63  ;;  %v1039_v49 = vadd.f32 %v1023_v26, %v957_v51  ;;  %v597_v46 = vpop.permute.xlu0 %596  ;;  %v5956_v26 = vld [vmem:[%s8515_s6 + $0x10] sm:$0xff]  ;;  %v5967_v51 = vld [vmem:[%s8513_s4 + $0x78] sm:$0xff] }
  0xfd   : > { %v659_v50 = vmul.f32 %v643_v10, %v5913_v5  ;;  %v1069_v8 = vpop.permute.xlu1 %1068  ;;  %v660_v24 = vmul.f32 %v644_v29, %v5918_v58  ;;  %1753 = vperm.xlu0 %4834, %v5901_v17   ;;  %5017 = vrcp.f32 %v1181_v0  ;;  %1484 = vperm.xlu1 %4825, %v5746_v57   ;;  %v1124_v35 = vadd.f32 %v1108_v36, %v1042_v14  ;;  %v498_v29 = vld [vmem:[%s5589_s21 + $0x38] sm:$0xff] }
  0xfe   : > { %v1106_v18 = vmul.f32 %v5629_v60, %v1069_v8  ;;  %v1105_v37 = vmul.f32 %v5626_v56, %v1069_v8  ;;  %5019 = vtanh.f32 %v709_v62  ;;  %v1184_v48 = vadd.f32 1.0, %v5014_v21 }
  0xff   : > { %v675_v4 = vmul.f32 %v659_v50, %v5913_v5  ;;  %v676_v45 = vmul.f32 %v660_v24, %v5918_v58  ;;  %5021 = vrcp.f32 %v1182_v44  ;;  %v4673_v63 = vmul.f32 -1.442695, %v1123_v47 }
 0x100   : > { %v1122_v23 = vadd.f32 %v1106_v18, %v1040_v31  ;;  %v1121_v7 = vadd.f32 %v1105_v37, %v1039_v49  ;;  %5023 = vrcp.f32 %v1183_v13  ;;  %v4674_v41 = vmul.f32 -1.442695, %v1124_v35 }
 0x101   : > { %v691_v30 = vadd.f32 %v675_v4, %v5913_v5  ;;  %v692_v27 = vadd.f32 %v676_v45, %v5918_v58  ;;  %1757 = vperm.xlu0 %4834, %v5956_v26   ;;  %1282 = vperm.xlu1 %4825, %v5539_v33   ;;  %v513_v8 = vunpack.c.l.bf16 %v498_v29  ;;  %v514_v59 = vunpack.c.h.bf16 %v498_v29  ;;  %v5974_v33 = vld [vmem:[%s8515_s6 + $0x28] sm:$0xff] }
 0x102   : > { %v548_v61 = vpop.permute.xlu1 %547  ;;  %v4672_v14 = vmul.f32 -1.442695, %v1122_v23  ;;  %v4671_v36 = vmul.f32 -1.442695, %v1121_v7  ;;  %v630_v7 = vmul.f32 0.5, %v5857_v15  ;;  %v627_v15 = vmul.f32 0.5, %v5913_v5 }
 0x103   : > { %v567_v10 = vmul.f32 %v548_v61, %v511_v34  ;;  %v568_v3 = vmul.f32 %v548_v61, %v512_v54  ;;  %v708_v1 = vmul.f32 0.7978846, %v692_v27  ;;  %v707_v0 = vmul.f32 0.7978846, %v691_v30  ;;  %v5990_v61 = vld [vmem:[%s8515_s6 + $0x30] sm:$0xff] }
 0x105   : > { %v5959_v50 = vadd.f32 %v597_v46, %v567_v10  ;;  %v5961_v34 = vadd.f32 %v597_v46, %v568_v3  ;;  %5025 = vtanh.f32 %v708_v1  ;;  %1769 = vperm.xlu0 %4834, %v5974_v33   ;;  %4826 = vset.pattern.permute.xlu1 %v8525_v2 }
 0x106   : > { %v553_v54 = vpop.permute.xlu1 %552  ;;  %5027 = vrcp.f32 %v1184_v48  ;;  %v5016_v4 = vpop.eup %5015  ;;  %1428 = vperm.xlu1 %4826, %v5967_v51  }
 0x107   : > { %v647_v24 = vmul.f32 0.044715, %v5959_v50  ;;  %v648_v62 = vmul.f32 0.044715, %v5961_v34  ;;  %5029 = vtanh.f32 %v707_v0  ;;  %v569_v21 = vmul.f32 %v553_v54, %v513_v8  ;;  %v5018_v37 = vpop.eup %5017 }
 0x108   : > { %5031 = vpow2.f32 %v4673_v63  ;;  %v570_v44 = vmul.f32 %v553_v54, %v514_v59  ;;  %v5020_v30 = vpop.eup %5019  ;;  %v742_v27 = vadd.f32 1.0, %v5016_v4 }
 0x109   : > { %v664_v31 = vmul.f32 %v648_v62, %v5961_v34  ;;  %v663_v18 = vmul.f32 %v647_v24, %v5959_v50  ;;  %5033 = vpow2.f32 %v4674_v41  ;;  %1773 = vperm.xlu0 %4834, %v5990_v61   ;;  %v5022_v10 = vpop.eup %5021  ;;  %v741_v1 = vadd.f32 1.0, %v5020_v30 }
 0x10a   : > { %5035 = vpow2.f32 %v4672_v14  ;;  %4828 = vset.pattern.permute.xlu1 %v8523_v11  ;;  %v5024_v46 = vpop.eup %5023  ;;  %v628_v14 = vmul.f32 0.5, %v5918_v58  ;;  %v6003_v62 = vmul.f32 %v742_v27, %v630_v7 }
 0x10b   : > { %v601_v45 = vpop.permute.xlu1 %600  ;;  %v680_v13 = vmul.f32 %v664_v31, %v5961_v34  ;;  %v679_v47 = vmul.f32 %v663_v18, %v5959_v50  ;;  %5037 = vpow2.f32 %v4671_v36  ;;  %1548 = vperm.xlu1 %4828, %v5746_v57   ;;  %v629_v36 = vmul.f32 0.5, %v5855_v38 }
 0x10c   : > { %v5983_v49 = vadd.f32 %v601_v45, %v569_v21  ;;  %v5985_v35 = vadd.f32 %v601_v45, %v570_v44  ;;  %8631 = vst [vmem:[#allocation19_spill] sm:$0xff] %v6003_v62 }
 0x10d   : > { %v696_v48 = vadd.f32 %v680_v13, %v5961_v34  ;;  %v695_v23 = vadd.f32 %v679_v47, %v5959_v50  ;;  %v6011_v45 = vmul.f32 %v741_v1, %v629_v36  ;;  %v631_v36 = vmul.f32 0.5, %v5959_v50 }
 0x10e   : > { %v649_v3 = vmul.f32 0.044715, %v5983_v49  ;;  %v650_v29 = vmul.f32 0.044715, %v5985_v35 }
 0x10f   : > { %v712_v0 = vmul.f32 0.7978846, %v696_v48  ;;  %v5026_v63 = vpop.eup %5025  ;;  %v711_v8 = vmul.f32 0.7978846, %v695_v23  ;;  %8633 = vst [vmem:[#allocation21_spill] sm:$0xff] %v6011_v45  ;;  %4829 = vset.pattern.permute.xlu1 %v8527_v6 }
 0x110   : > { %v665_v41 = vmul.f32 %v649_v3, %v5983_v49  ;;  %v666_v54 = vmul.f32 %v650_v29, %v5985_v35  ;;  %v5028_v59 = vpop.eup %5027  ;;  %v740_v24 = vadd.f32 1.0, %v5026_v63  ;;  %1492 = vperm.xlu1 %4829, %v5967_v51   ;;  %v1231_v63 = vmul.f32 %v5024_v46, %v6011_v45 }
 0x111   : > { %v5030_v31 = vpop.eup %5029  ;;  %5039 = vtanh.f32 %v712_v0  ;;  %v1232_v30 = vmul.f32 %v5028_v59, %v6003_v62 }
 0x112   : > { %v682_v18 = vmul.f32 %v666_v54, %v5985_v35  ;;  %v681_v57 = vmul.f32 %v665_v41, %v5983_v49  ;;  %v5032_v4 = vpop.eup %5031  ;;  %v6009_v21 = vmul.f32 %v740_v24, %v628_v14  ;;  %v739_v44 = vadd.f32 1.0, %v5030_v31 }
 0x113   : > { %v5034_v58 = vpop.eup %5033  ;;  %5041 = vtanh.f32 %v711_v8  ;;  %v1187_v23 = vadd.f32 1.0, %v5032_v4  ;;  %v632_v24 = vmul.f32 0.5, %v5961_v34 }
 0x114   : > { %8632 = vst [vmem:[#allocation20_spill] sm:$0xff] %v6009_v21  ;;  %v698_v13 = vadd.f32 %v682_v18, %v5985_v35  ;;  %v697_v38 = vadd.f32 %v681_v57, %v5983_v49  ;;  %v5036_v5 = vpop.eup %5035  ;;  %v1230_v47 = vmul.f32 %v5022_v10, %v6009_v21  ;;  %v6019_v27 = vmul.f32 %v739_v44, %v627_v15 }
 0x115   : > { %v5038_v48 = vpop.eup %5037  ;;  %v1188_v7 = vadd.f32 1.0, %v5034_v58  ;;  %v1186_v41 = vadd.f32 1.0, %v5036_v5  ;;  %4830 = vset.pattern.permute.xlu1 %v8523_v11  ;;  %v634_v15 = vmul.f32 0.5, %v5985_v35  ;;  %v633_v44 = vmul.f32 0.5, %v5983_v49 }
 0x116   : > { %8634 = vst [vmem:[#allocation22_spill] sm:$0xff] %v6019_v27  ;;  %v714_v3 = vmul.f32 0.7978846, %v698_v13  ;;  %v713_v29 = vmul.f32 0.7978846, %v697_v38  ;;  %v1242_v1 = vpack.c.bf16 %v1232_v30, %v1230_v47  ;;  %v1229_v0 = vmul.f32 %v5018_v37, %v6019_v27  ;;  %1556 = vperm.xlu1 %4830, %v5967_v51   ;;  %v6028_v37 = vld [vmem:[%s8515_s6] sm:$0xff] }
 0x117   : > { %v1185_v54 = vadd.f32 1.0, %v5038_v48 }
 0x118   : > { %5043 = vtanh.f32 %v714_v3  ;;  %1322 = vmatprep.subr.bf16.mxu0 %v1242_v1  ;;  %v1241_v10 = vpack.c.bf16 %v1231_v63, %v1229_v0  ;;  %v4938_v1 = vld [vmem:[%s8512_s3 + $0x8] sm:$0xff]   ;;  %v6075_v0 = vld [vmem:[%s8515_s6 + $0x20] sm:$0xff]  ;;  %v4939_v63 = vld [vmem:[%s8512_s3 + $0x10] sm:$0xff]  }
 0x119   : > { %5045 = vtanh.f32 %v713_v29  ;;  %v4937_v29 = vld [vmem:[%s8512_s3] sm:$0xff]  }
 0x11a   : > { %5047 = vrcp.f32 %v1187_v23  ;;  %1323 = vmatpush1.bf16.msra.mxu0 %v1241_v10  ;;  %1701 = vperm.xlu1 %4830, %v6028_v37   ;;  %v1255_v10 = vpop.permute.xlu1 %1254 }
 0x11b   : > { %5049 = vrcp.f32 %v1188_v7  ;;  %v5040_v8 = vpop.eup %5039  ;;  %v6057_v7 = vld [vmem:[%s8515_s6 + $0x18] sm:$0xff] }
 0x11c   : > { %5051 = vrcp.f32 %v1186_v41  ;;  %v744_v59 = vadd.f32 1.0, %v5040_v8  ;;  %v4940_v41 = vld [vmem:[%s8512_s3 + $0x18] sm:$0xff]  }
 0x11d   : > { %5053 = vrcp.f32 %v1185_v54  ;;  %v5042_v46 = vpop.eup %5041  ;;  %v6091_v54 = vld [vmem:[%s8515_s6 + $0x38] sm:$0xff] }
 0x11e   : > { %v743_v14 = vadd.f32 1.0, %v5042_v46  ;;  %4831 = vset.pattern.permute.xlu1 %v8521_v25  ;;  %v6036_v57 = vmul.f32 %v744_v59, %v632_v24  ;;  %v1394_v8 = vpop.permute.xlu1 %1393 }
 0x11f   : > { %1749 = vperm.xlu1 %4831, %v6028_v37  }
 0x120   : > { %8635 = vst [vmem:[#allocation23_spill] sm:$0xff] %v6036_v57  ;;  %v6039_v13 = vmul.f32 %v743_v14, %v631_v36 }
 0x122   : > { %v5044_v51 = vpop.eup %5043  ;;  %8636 = vst [vmem:[#allocation24_spill] sm:$0xff] %v6039_v13  ;;  %v6098_v46 = vpop.permute.xlu1 %1262 }
 0x123   : > { %v5046_v31 = vpop.eup %5045  ;;  %v746_v18 = vadd.f32 1.0, %v5044_v51  ;;  %4832 = vset.pattern.permute.xlu1 %v8523_v11 }
 0x124   : > { %v5048_v4 = vpop.eup %5047  ;;  %v745_v58 = vadd.f32 1.0, %v5046_v31  ;;  %1709 = vperm.xlu1 %4832, %v5956_v26  }
 0x125   : > { %v5050_v34 = vpop.eup %5049  ;;  %v6041_v38 = vmul.f32 %v746_v18, %v634_v15 }
 0x126   : > { %v5052_v5 = vpop.eup %5051  ;;  %v6043_v47 = vmul.f32 %v745_v58, %v633_v44 }
 0x127   : > { %8637 = vst [vmem:[#allocation25_spill] sm:$0xff] %v6041_v38  ;;  %v5054_v50 = vpop.eup %5053  ;;  %v1234_v35 = vmul.f32 %v5052_v5, %v6036_v57  ;;  %v1236_v30 = vmul.f32 %v5050_v34, %v6041_v38 }
 0x128   : > { %8638 = vst [vmem:[#allocation26_spill] sm:$0xff] %v6043_v47  ;;  %v1233_v49 = vmul.f32 %v5054_v50, %v6039_v13  ;;  %v1235_v48 = vmul.f32 %v5048_v4, %v6043_v47  ;;  %1713 = vperm.xlu1 %4832, %v6057_v7  }
 0x129   : > { %v1244_v23 = vpack.c.bf16 %v1236_v30, %v1234_v35  ;;  %v1533_v15 = vpop.permute.xlu0 %1532 }
 0x12a   : > { %v1243_v3 = vpack.c.bf16 %v1235_v48, %v1233_v49 }
 0x12b   : > { %1324 = vmatprep.subr.bf16.mxu0 %v1244_v23 }
 0x12c   : > { %1325 = vmatpush1.bf16.msra.mxu0 %v1243_v3  ;;  %4833 = vset.pattern.permute.xlu1 %v8521_v25 }
 0x12d   : > { %1761 = vperm.xlu1 %4833, %v6057_v7  }
 0x12e   : > { %v1399_v4 = vpop.permute.xlu0 %1398 }
 0x12f   : > { %4679 = vmatmul.mubr.msk.bf16.vlgmr.msra.gmra.mrb[0].mxu0 %vm1305_vm5, %v4937_v29  ;;  %v1431_v29 = vmul.f32 %v1394_v8, %v5603_v39  ;;  %v1433_v13 = vmul.f32 %v1399_v4, %v5603_v39  ;;  %v1434_v27 = vmul.f32 %v1399_v4, %v5610_v42  ;;  %v1561_v4 = vmul.f32 %v1533_v15, %v5626_v56 }
 0x130   : > { %1360 = vmatprep.mubr.bf16.mxu0 %v8525_v2 }
 0x131   : > { %4835 = vset.pattern.permute.xlu1 %v8523_v11 }
 0x132   : > { %1721 = vperm.xlu1 %4835, %v5974_v33  }
 0x136   : > { %4836 = vset.pattern.permute.xlu1 %v8521_v25 }
 0x137   : > { %4680 = vmatmul.mubr.msk.bf16.gmra.mrb[4].mxu0 %vm1305_vm5, %v4938_v1  ;;  %1765 = vperm.xlu1 %4836, %v6075_v0  }
 0x138   : > { %1370 = vmatprep.mubr.bf16.mxu0 %v8525_v2 }
 0x13b   : > { %4837 = vset.pattern.permute.xlu1 %v8523_v11 }
 0x13c   : > { %1725 = vperm.xlu1 %4837, %v5990_v61  }
 0x13d   : > { %v1404_v59 = vpop.permute.xlu1 %1403 }
 0x13e   : > { %v1435_v28 = vmul.f32 %v1404_v59, %v5603_v39 }
 0x13f   : > { %4681 = vmatmul.mubr.msk.bf16.gmra.mrb[8].mxu0 %vm1305_vm5, %v4939_v63 }
 0x140   : > { %1380 = vmatprep.mubr.bf16.mxu0 %v8525_v2  ;;  %1729 = vperm.xlu1 %4837, %v6091_v54  }
 0x142   : > { %v1469_v14 = vpop.permute.xlu1 %1468 }
 0x144   : > { %4838 = vset.pattern.permute.xlu1 %v8521_v25  ;;  %v1432_v25 = vmul.f32 %v1394_v8, %v5610_v42 }
 0x145   : > { %1777 = vperm.xlu1 %4838, %v6091_v54  }
 0x146   : > { %v6100_v24 = vpop.permute.xlu1 %1266 }
 0x147   : > { %4682 = vmatmul.mubr.msk.bf16.gmra.mrb[12].mxu0 %vm1305_vm5, %v4940_v41 }
 0x148   : > { %2506 = vmatprep.mubr.bf16.mxu0 %v8525_v2 }
 0x14a   : > { %v1473_v51 = vpop.permute.xlu1 %1472  ;;  %v1409_v58 = vpop.permute.xlu0 %1408 }
 0x14e   : > { %v1419_v5 = vpop.permute.xlu0 %1418 }
 0x14f   : > { %v1529_v36 = vpop.permute.xlu1 %1528 }
 0x153   : > { %v1259_v30 = vpop.permute.xlu0 %1258 }
 0x154   : > { %v6102_v31 = vpop.permute.xlu1 %1270 }
 0x157   : > { %v1465_v48 = vpop.permute.xlu0 %1464 }
 0x158   : > { %v1495_v1 = vmul.f32 %v1465_v48, %v5606_v40  ;;  %v1496_v11 = vmul.f32 %v1465_v48, %v5613_v43  ;;  %v1436_v48 = vmul.f32 %v1404_v59, %v5610_v42 }
 0x15b   : > { %v1477_v2 = vpop.permute.xlu0 %1476 }
 0x15c   : > { %v6104_v18 = vpop.permute.xlu1 %1413 }
 0x161   : > { %v6106_v44 = vpop.permute.xlu1 %1536 }
 0x166   : > { %v6108_v34 = vpop.permute.xlu1 %1274 }
 0x16a   : > { %v6110_v50 = vpop.permute.xlu1 %1480 }
 0x16f   : > { %v6112_v35 = vpop.permute.xlu1 %1540 }
 0x177   : > { %v6114_v49 = vpop.permute.xlu1 %1423 }
 0x17c   : > { %v6116_v3 = vpop.permute.xlu1 %1484 }
 0x180   : > { %v6128_v53 = vpop.permute.xlu1 %1282 }
 0x202   : > { %v1352_v23 = vpop.f32.mrb[0].mxu0 }
 0x203   : > { %v1353_v63 = vadd.f32 %v1352_v23, %v1255_v10  ;;  %v1354_v41 = vpop.f32.mrb[1].mxu0  ;;  %v1497_v23 = vmul.f32 %v1469_v14, %v5606_v40 }
 0x204   : > { %v1355_v6 = vadd.f32 %v1354_v41, %v1255_v10  ;;  %v1356_v47 = vpop.f32.mrb[2].mxu0  ;;  %v1498_v10 = vmul.f32 %v1469_v14, %v5613_v43 }
 0x205   : > { %v1447_v45 = vadd.f32 %v1431_v29, %v1353_v63  ;;  %v1357_v38 = vadd.f32 %v1356_v47, %v1259_v30  ;;  %v1358_v57 = vpop.f32.mrb[3].mxu0  ;;  %v1559_v47 = vmul.f32 %v1529_v36, %v5626_v56  ;;  %v1441_v63 = vmul.f32 %v1419_v5, %v5603_v39 }
 0x206   : > { %v1448_v62 = vadd.f32 %v1432_v25, %v1355_v6  ;;  %v1359_v21 = vadd.f32 %v1358_v57, %v1259_v30  ;;  %v1562_v6 = vmul.f32 %v1533_v15, %v5629_v60  ;;  %v1560_v57 = vmul.f32 %v1529_v36, %v5629_v60 }
 0x207   : > { %v1511_v32 = vadd.f32 %v1495_v1, %v1447_v45  ;;  %v1449_v8 = vadd.f32 %v1433_v13, %v1357_v38  ;;  %v1437_v45 = vmul.f32 %v1409_v58, %v5603_v39  ;;  %v1438_v13 = vmul.f32 %v1409_v58, %v5610_v42  ;;  %v6136_v38 = vpop.permute.xlu0 %1278 }
 0x208   : > { %v1512_v41 = vadd.f32 %v1496_v11, %v1448_v62  ;;  %v1450_v16 = vadd.f32 %v1434_v27, %v1359_v21  ;;  %v1499_v62 = vmul.f32 %v1473_v51, %v5606_v40  ;;  %v1500_v30 = vmul.f32 %v1473_v51, %v5613_v43 }
 0x209   : > { %v1513_v25 = vadd.f32 %v1497_v23, %v1449_v8  ;;  %v6139_v21 = vadd.f32 %v1559_v47, %v1511_v32  ;;  %v1442_v51 = vmul.f32 %v1419_v5, %v5610_v42 }
 0x20a   : > { %v1514_v59 = vadd.f32 %v1498_v10, %v1450_v16  ;;  %v1362_v11 = vpop.f32.mrb[4].mxu0  ;;  %v6145_v36 = vadd.f32 %v1560_v57, %v1512_v41  ;;  %v6150_v16 = vpop.permute.xlu1 %1428 }
 0x20b   : > { %v6141_v27 = vadd.f32 %v1561_v4, %v1513_v25  ;;  %v1363_v14 = vadd.f32 %v1362_v11, %v6098_v46  ;;  %v1364_v15 = vpop.f32.mrb[5].mxu0  ;;  %v1563_v4 = vmul.f32 %v6106_v44, %v5626_v56  ;;  %v1489_v11 = vpop.permute.xlu0 %1488 }
 0x20c   : > { %v6147_v29 = vadd.f32 %v1562_v6, %v1514_v59  ;;  %v1365_v58 = vadd.f32 %v1364_v15, %v6098_v46  ;;  %v1366_v1 = vpop.f32.mrb[6].mxu0  ;;  %v1501_v6 = vmul.f32 %v1477_v2, %v5606_v40  ;;  %v1502_v59 = vmul.f32 %v1477_v2, %v5613_v43 }
 0x20d   : > { %v1591_v32 = vadd.f32 %v6141_v27, %v6139_v21  ;;  %v1451_v23 = vadd.f32 %v1435_v28, %v1363_v14  ;;  %v1367_v8 = vadd.f32 %v1366_v1, %v6100_v24  ;;  %v1368_v10 = vpop.f32.mrb[7].mxu0  ;;  %v1564_v28 = vmul.f32 %v6106_v44, %v5629_v60 }
 0x20e   : > { %v1604_v41 = vadd.f32 %v6147_v29, %v6145_v36  ;;  %v1452_v47 = vadd.f32 %v1436_v48, %v1365_v58  ;;  %v1369_v46 = vadd.f32 %v1368_v10, %v6100_v24  ;;  %v1439_v48 = vmul.f32 %v6104_v18, %v5603_v39 }
 0x20f   : > { %v1515_v25 = vadd.f32 %v1499_v62, %v1451_v23  ;;  %v1453_v57 = vadd.f32 %v1437_v45, %v1367_v8  ;;  %v1565_v24 = vmul.f32 %v6112_v35, %v5626_v56  ;;  %v1440_v45 = vmul.f32 %v6104_v18, %v5610_v42 }
 0x210   : > { %v1516_v5 = vadd.f32 %v1500_v30, %v1452_v47  ;;  %v1454_v14 = vadd.f32 %v1438_v13, %v1369_v46  ;;  %v1566_v44 = vmul.f32 %v6112_v35, %v5629_v60  ;;  %v1549_v13 = vpop.permute.xlu1 %1548  ;;  %v1503_v1 = vmul.f32 %v6110_v50, %v5606_v40 }
 0x211   : > { %v6170_v15 = vadd.f32 %v1563_v4, %v1515_v25  ;;  %v1517_v58 = vadd.f32 %v1501_v6, %v1453_v57  ;;  %v1504_v18 = vmul.f32 %v6110_v50, %v5613_v43  ;;  %v1545_v4 = vpop.permute.xlu0 %1544 }
 0x212   : > { %v6176_v62 = vadd.f32 %v1564_v28, %v1516_v5  ;;  %v1518_v2 = vadd.f32 %v1502_v59, %v1454_v14  ;;  %v1372_v30 = vpop.f32.mrb[8].mxu0  ;;  %v1568_v50 = vmul.f32 %v1545_v4, %v5629_v60 }
 0x213   : > { %v1592_v23 = vadd.f32 %v1591_v32, %v6170_v15  ;;  %v6181_v8 = vadd.f32 %v1565_v24, %v1517_v58  ;;  %v1373_v10 = vadd.f32 %v1372_v30, %v6102_v31  ;;  %v1374_v47 = vpop.f32.mrb[9].mxu0  ;;  %v1567_v32 = vmul.f32 %v1545_v4, %v5626_v56 }
 0x214   : > { %v1605_v35 = vadd.f32 %v1604_v41, %v6176_v62  ;;  %v6187_v46 = vadd.f32 %v1566_v44, %v1518_v2  ;;  %v1375_v6 = vadd.f32 %v1374_v47, %v6102_v31  ;;  %v1376_v25 = vpop.f32.mrb[10].mxu0  ;;  %v1505_v58 = vmul.f32 %v6116_v3, %v5606_v40  ;;  %v1493_v47 = vpop.permute.xlu1 %1492 }
 0x215   : > { %v1593_v57 = vadd.f32 %v1592_v23, %v6181_v8  ;;  %v1455_v28 = vadd.f32 %v1439_v48, %v1373_v10  ;;  %v1377_v59 = vadd.f32 %v1376_v25, %v6108_v34  ;;  %v1378_v5 = vpop.f32.mrb[11].mxu0  ;;  %v1569_v2 = vmul.f32 %v1549_v13, %v5626_v56 }
 0x216   : > { %v1606_v14 = vadd.f32 %v1605_v35, %v6187_v46  ;;  %v1456_v24 = vadd.f32 %v1440_v45, %v1375_v6  ;;  %v1379_v41 = vadd.f32 %v1378_v5, %v6108_v34  ;;  %v1443_v48 = vmul.f32 %v6114_v49, %v5603_v39 }
 0x217   : > { %v1519_v31 = vadd.f32 %v1503_v1, %v1455_v28  ;;  %v1457_v44 = vadd.f32 %v1441_v63, %v1377_v59  ;;  %v1506_v30 = vmul.f32 %v6116_v3, %v5613_v43  ;;  %v1444_v45 = vmul.f32 %v6114_v49, %v5610_v42 }
 0x218   : > { %v1520_v23 = vadd.f32 %v1504_v18, %v1456_v24  ;;  %v1458_v10 = vadd.f32 %v1442_v51, %v1379_v41  ;;  %v1507_v34 = vmul.f32 %v1489_v11, %v5606_v40  ;;  %v1508_v63 = vmul.f32 %v1489_v11, %v5613_v43 }
 0x219   : > { %v1583_v35 = vadd.f32 %v1567_v32, %v1519_v31  ;;  %v1521_v4 = vadd.f32 %v1505_v58, %v1457_v44  ;;  %v1570_v6 = vmul.f32 %v1549_v13, %v5629_v60  ;;  %v1445_v3 = vmul.f32 %v6150_v16, %v5603_v39  ;;  %v1553_v32 = vpop.permute.xlu0 %1552 }
 0x21a   : > { %v1584_v1 = vadd.f32 %v1568_v50, %v1520_v23  ;;  %v1522_v25 = vadd.f32 %v1506_v30, %v1458_v10  ;;  %v1382_v28 = vpop.f32.mrb[12].mxu0  ;;  %v1446_v49 = vmul.f32 %v6150_v16, %v5610_v42  ;;  %v1571_v13 = vmul.f32 %v1553_v32, %v5626_v56  ;;  %v1557_v10 = vpop.permute.xlu1 %1556 }
 0x21b   : > { %v1594_v18 = vadd.f32 %v1593_v57, %v1583_v35  ;;  %v1585_v51 = vadd.f32 %v1569_v2, %v1521_v4  ;;  %v1383_v59 = vadd.f32 %v1382_v28, %v6136_v38  ;;  %v1384_v5 = vpop.f32.mrb[13].mxu0  ;;  %v1572_v2 = vmul.f32 %v1553_v32, %v5629_v60 }
 0x21c   : > { %v1607_v24 = vadd.f32 %v1606_v14, %v1584_v1  ;;  %v1586_v41 = vadd.f32 %v1570_v6, %v1522_v25  ;;  %v1385_v11 = vadd.f32 %v1384_v5, %v6136_v38  ;;  %v1386_v50 = vpop.f32.mrb[14].mxu0  ;;  %v1509_v14 = vmul.f32 %v1493_v47, %v5606_v40 }
 0x21d   : > { %v1595_v58 = vadd.f32 %v1594_v18, %v1585_v51  ;;  %v1459_v31 = vadd.f32 %v1443_v48, %v1383_v59  ;;  %v1387_v44 = vadd.f32 %v1386_v50, %v6128_v53  ;;  %v1388_v57 = vpop.f32.mrb[15].mxu0  ;;  %v1573_v38 = vmul.f32 %v1557_v10, %v5626_v56 }
 0x21e   : > { %v1608_v30 = vadd.f32 %v1607_v24, %v1586_v41  ;;  %v1460_v23 = vadd.f32 %v1444_v45, %v1385_v11  ;;  %v1389_v16 = vadd.f32 %v1388_v57, %v6128_v53  ;;  %v1510_v25 = vmul.f32 %v1493_v47, %v5613_v43 }
 0x21f   : > { %v1523_v4 = vadd.f32 %v1507_v34, %v1459_v31  ;;  %v1461_v6 = vadd.f32 %v1445_v3, %v1387_v44  ;;  %v1574_v48 = vmul.f32 %v1557_v10, %v5629_v60 }
 0x220   : > { %v1524_v28 = vadd.f32 %v1508_v63, %v1460_v23  ;;  %v1462_v18 = vadd.f32 %v1446_v49, %v1389_v16 }
 0x221   : > { %v1587_v59 = vadd.f32 %v1571_v13, %v1523_v4  ;;  %v1525_v5 = vadd.f32 %v1509_v14, %v1461_v6 }
 0x222   : > { %v1588_v32 = vadd.f32 %v1572_v2, %v1524_v28  ;;  %v1526_v24 = vadd.f32 %v1510_v25, %v1462_v18 }
 0x223   : > { %v1596_v45 = vadd.f32 %v1595_v58, %v1587_v59  ;;  %v1589_v11 = vadd.f32 %v1573_v38, %v1525_v5 }
 0x224   : > { %v1609_v50 = vadd.f32 %v1608_v30, %v1588_v32  ;;  %v1590_v53 = vadd.f32 %v1574_v48, %v1526_v24 }
 0x225   : > { %v1597_v57 = vadd.f32 %v1596_v45, %v1589_v11 }
 0x226   : > { %v1610_v12 = vadd.f32 %v1609_v50, %v1590_v53 }
 0x227   : > { %v1598_v34 = vrot.slane %v1597_v57, 4 }
 0x228   : > { %v1611_v3 = vrot.slane %v1610_v12, 4 }
 0x229   : > { %v1599_v31 = vadd.f32 %v1598_v34, %v1597_v57 }
 0x22a   : > { %v1612_v44 = vadd.f32 %v1611_v3, %v1610_v12  ;;  %v8548_v3 = vmov 4  }
 0x22b   : > { %v1600_v9 = vrot.slane %v1599_v31, 2  ;;  %4839 = vset.pattern.permute.xlu0 %v8548_v3  ;;  %4840 = vset.pattern.permute.xlu1 %v8548_v3 }
 0x22c   : > { %v1613_v47 = vrot.slane %v1612_v44, 2  ;;  %1958 = vperm.xlu0 %4839, %v6028_v37   ;;  %1962 = vperm.xlu1 %4840, %v5901_v17  }
 0x22d   : > { %v1601_v63 = vadd.f32 %v1600_v9, %v1599_v31 }
 0x22e   : > { %v1614_v23 = vadd.f32 %v1613_v47, %v1612_v44 }
 0x22f   : > { %v1602_v10 = vrot.slane %v1601_v63, 1 }
 0x230   : > { %v1615_v49 = vrot.slane %v1614_v23, 1  ;;  %1966 = vperm.xlu1 %4840, %v5956_v26   ;;  %1970 = vperm.xlu0 %4839, %v6057_v7  }
 0x231   : > { %v1603_v13 = vadd.f32 %v1602_v10, %v1601_v63 }
 0x232   : > { %v1616_v16 = vadd.f32 %v1615_v49, %v1614_v23 }
 0x233   : > { %v1618_v2 = vmul.f32 0.015625, %v1603_v13 }
 0x234   : > { %v1619_v14 = vmul.f32 0.015625, %v1616_v16  ;;  %1974 = vperm.xlu1 %4840, %v6075_v0   ;;  %1978 = vperm.xlu0 %4839, %v5974_v33  }
 0x235   : > { %v6223_v58 = vsub.f32 %v6181_v8, %v1618_v2  ;;  %v6225_v30 = vsub.f32 %v1583_v35, %v1618_v2  ;;  %v6227_v4 = vsub.f32 %v1585_v51, %v1618_v2  ;;  %v6229_v6 = vsub.f32 %v1589_v11, %v1618_v2  ;;  %v6278_v11 = vpop.permute.xlu1 %1701 }
 0x236   : > { %v6232_v12 = vsub.f32 %v6187_v46, %v1619_v14  ;;  %v6234_v9 = vsub.f32 %v1584_v1, %v1619_v14  ;;  %v6236_v38 = vsub.f32 %v1586_v41, %v1619_v14  ;;  %v6238_v25 = vsub.f32 %v1590_v53, %v1619_v14 }
 0x237   : > { %v6241_v28 = vsub.f32 %v6139_v21, %v1618_v2  ;;  %v6244_v8 = vsub.f32 %v6145_v36, %v1619_v14  ;;  %v6247_v35 = vsub.f32 %v6141_v27, %v1618_v2  ;;  %v6250_v51 = vsub.f32 %v6147_v29, %v1619_v14 }
 0x238   : > { %v6253_v46 = vsub.f32 %v6170_v15, %v1618_v2  ;;  %v6256_v1 = vsub.f32 %v6176_v62, %v1619_v14  ;;  %v6258_v41 = vsub.f32 %v1587_v59, %v1618_v2  ;;  %v6260_v48 = vsub.f32 %v1588_v32, %v1619_v14  ;;  %1982 = vperm.xlu1 %4840, %v5990_v61  }
 0x239   : > { %v1636_v21 = vmul.f32 %v6241_v28, %v6241_v28  ;;  %v1637_v27 = vmul.f32 %v6244_v8, %v6244_v8  ;;  %v1638_v36 = vmul.f32 %v6247_v35, %v6247_v35  ;;  %v1639_v29 = vmul.f32 %v6250_v51, %v6250_v51  ;;  %v6292_v23 = vpop.permute.xlu1 %1749  ;;  %1986 = vperm.xlu0 %4839, %v6091_v54  }
 0x23a   : > { %v1640_v15 = vmul.f32 %v6253_v46, %v6253_v46  ;;  %v1641_v62 = vmul.f32 %v6256_v1, %v6256_v1  ;;  %v1642_v5 = vmul.f32 %v6223_v58, %v6223_v58  ;;  %v1643_v32 = vmul.f32 %v6232_v12, %v6232_v12 }
 0x23b   : > { %v1652_v18 = vadd.f32 %v1638_v36, %v1636_v21  ;;  %v1665_v59 = vadd.f32 %v1639_v29, %v1637_v27  ;;  %v1644_v50 = vmul.f32 %v6225_v30, %v6225_v30  ;;  %v1645_v53 = vmul.f32 %v6234_v9, %v6234_v9 }
 0x23c   : > { %v1646_v31 = vmul.f32 %v6227_v4, %v6227_v4  ;;  %v1647_v44 = vmul.f32 %v6236_v38, %v6236_v38  ;;  %v1648_v10 = vmul.f32 %v6258_v41, %v6258_v41  ;;  %v1649_v49 = vmul.f32 %v6260_v48, %v6260_v48 }
 0x23d   : > { %v1653_v24 = vadd.f32 %v1652_v18, %v1640_v15  ;;  %v1666_v45 = vadd.f32 %v1665_v59, %v1641_v62  ;;  %v1650_v2 = vmul.f32 %v6229_v6, %v6229_v6  ;;  %v1651_v14 = vmul.f32 %v6238_v25, %v6238_v25  ;;  %v6304_v15 = vpop.permute.xlu1 %1709 }
 0x23f   : > { %v1654_v57 = vadd.f32 %v1653_v24, %v1642_v5  ;;  %v1667_v34 = vadd.f32 %v1666_v45, %v1643_v32 }
 0x241   : > { %v1655_v47 = vadd.f32 %v1654_v57, %v1644_v50  ;;  %v1668_v63 = vadd.f32 %v1667_v34, %v1645_v53  ;;  %v1714_v45 = vpop.permute.xlu1 %1713  ;;  %v8546_v57 = vmov 5   ;;  %v8544_v34 = vmov 6  }
 0x242   : > { %4841 = vset.pattern.permute.xlu1 %v8546_v57  ;;  %4844 = vset.pattern.permute.xlu0 %v8544_v34 }
 0x243   : > { %v1656_v13 = vadd.f32 %v1655_v47, %v1646_v31  ;;  %v1669_v16 = vadd.f32 %v1668_v63, %v1647_v44  ;;  %2203 = vperm.xlu1 %4841, %v6028_v37   ;;  %2259 = vperm.xlu0 %4844, %v5956_v26   ;;  %v6314_v47 = vpop.permute.xlu0 %1705 }
 0x245   : > { %v1657_v21 = vadd.f32 %v1656_v13, %v1648_v10  ;;  %v1670_v27 = vadd.f32 %v1669_v16, %v1649_v49  ;;  %v1762_v49 = vpop.permute.xlu1 %1761 }
 0x247   : > { %v1658_v36 = vadd.f32 %v1657_v21, %v1650_v2  ;;  %v1671_v29 = vadd.f32 %v1670_v27, %v1651_v14  ;;  %4842 = vset.pattern.permute.xlu1 %v8544_v34  ;;  %4845 = vset.pattern.permute.xlu0 %v8546_v57  ;;  %v1718_v21 = vpop.permute.xlu0 %1717 }
 0x248   : > { %2251 = vperm.xlu1 %4842, %v6028_v37   ;;  %2207 = vperm.xlu0 %4845, %v5901_v17  }
 0x249   : > { %v1659_v62 = vrot.slane %v1658_v36, 4  ;;  %v1672_v18 = vrot.slane %v1671_v29, 4  ;;  %v1722_v27 = vpop.permute.xlu1 %1721 }
 0x24b   : > { %v1660_v59 = vadd.f32 %v1659_v62, %v1658_v36  ;;  %v1673_v5 = vadd.f32 %v1672_v18, %v1671_v29  ;;  %v6322_v36 = vpop.permute.xlu0 %1753 }
 0x24c   : > { %2255 = vperm.xlu1 %4842, %v5901_v17   ;;  %2211 = vperm.xlu0 %4845, %v5956_v26  }
 0x24d   : > { %v1661_v32 = vrot.slane %v1660_v59, 2  ;;  %v1674_v24 = vrot.slane %v1673_v5, 2  ;;  %v1766_v37 = vpop.permute.xlu1 %1765 }
 0x24f   : > { %v1662_v50 = vadd.f32 %v1661_v32, %v1660_v59  ;;  %v1675_v53 = vadd.f32 %v1674_v24, %v1673_v5  ;;  %v1758_v29 = vpop.permute.xlu0 %1757 }
 0x250   : > { %4843 = vset.pattern.permute.xlu1 %v8546_v57  ;;  %2223 = vperm.xlu0 %4845, %v5974_v33  }
 0x251   : > { %v1663_v31 = vrot.slane %v1662_v50, 1  ;;  %v1676_v44 = vrot.slane %v1675_v53, 1  ;;  %2215 = vperm.xlu1 %4843, %v6057_v7  }
 0x253   : > { %v1664_v63 = vadd.f32 %v1663_v31, %v1662_v50  ;;  %v1677_v10 = vadd.f32 %v1676_v44, %v1675_v53  ;;  %v1726_v31 = vpop.permute.xlu1 %1725 }
 0x254   : > { %2227 = vperm.xlu0 %4845, %v5990_v61  }
 0x255   : > { %v1678_v13 = vmul.f32 0.015625, %v1664_v63  ;;  %v1679_v16 = vmul.f32 0.015625, %v1677_v10  ;;  %4846 = vset.pattern.permute.xlu1 %v8544_v34 }
 0x256   : > { %2263 = vperm.xlu1 %4846, %v6057_v7   ;;  %v1770_v7 = vpop.permute.xlu0 %1769 }
 0x257   : > { %v1680_v2 = vadd.f32 1e-05, %v1678_v13  ;;  %v1681_v14 = vadd.f32 1e-05, %v1679_v16  ;;  %v8639_v16 = vmov 1  }
 0x258   : > { %4850 = vset.pattern.permute.xlu0 %v8544_v34 }
 0x259   : > { %5055 = vrsqrt.f32 %v1680_v2  ;;  %2275 = vperm.xlu0 %4850, %v5990_v61  }
 0x25a   : > { %5057 = vrsqrt.f32 %v1681_v14  ;;  %4847 = vset.pattern.permute.xlu1 %v8546_v57  ;;  %v1730_v14 = vpop.permute.xlu1 %1729 }
 0x25b   : > { %2219 = vperm.xlu1 %4847, %v6075_v0  }
 0x25d   : > { %4855 = vset.pattern.permute.xlu0 %v8639_v16 }
 0x25f   : > { %4848 = vset.pattern.permute.xlu1 %v8544_v34 }
 0x260   : > { %2267 = vperm.xlu1 %4848, %v6075_v0  }
 0x263   : > { %v5056_v62 = vpop.eup %5055 }
 0x264   : > { %v5058_v18 = vpop.eup %5057  ;;  %v1684_v17 = vmul.f32 %v5056_v62, %v6241_v28  ;;  %v1688_v26 = vmul.f32 %v5056_v62, %v6253_v46  ;;  %v1690_v59 = vmul.f32 %v5056_v62, %v6223_v58  ;;  %v1694_v5 = vmul.f32 %v5056_v62, %v6227_v4  ;;  %2271 = vperm.xlu1 %4848, %v5974_v33  }
 0x265   : > { %v1685_v32 = vmul.f32 %v5058_v18, %v6244_v8  ;;  %v1689_v24 = vmul.f32 %v5058_v18, %v6256_v1  ;;  %v1691_v50 = vmul.f32 %v5058_v18, %v6232_v12  ;;  %v1695_v53 = vmul.f32 %v5058_v18, %v6236_v38 }
 0x266   : > { %v1738_v28 = vmul.f32 %v1714_v45, %v1690_v59  ;;  %v1692_v58 = vmul.f32 %v5056_v62, %v6225_v30  ;;  %v1693_v4 = vmul.f32 %v5058_v18, %v6234_v9  ;;  %v1736_v12 = vmul.f32 %v6304_v15, %v1688_v26 }
 0x267   : > { %v1739_v46 = vmul.f32 %v1714_v45, %v1691_v50  ;;  %v1733_v8 = vmul.f32 %v6278_v11, %v1685_v32  ;;  %v1686_v38 = vmul.f32 %v5056_v62, %v6247_v35  ;;  %v1687_v1 = vmul.f32 %v5058_v18, %v6250_v51 }
 0x268   : > { %v1737_v61 = vmul.f32 %v6304_v15, %v1689_v24  ;;  %v1740_v45 = vmul.f32 %v1718_v21, %v1692_v58  ;;  %v1741_v44 = vmul.f32 %v1718_v21, %v1693_v4  ;;  %v1696_v30 = vmul.f32 %v5056_v62, %v6258_v41  ;;  %4849 = vset.pattern.permute.xlu1 %v8546_v57 }
 0x269   : > { %v1732_v9 = vmul.f32 %v6278_v11, %v1684_v17  ;;  %v1742_v63 = vmul.f32 %v1722_v27, %v1694_v5  ;;  %v1735_v10 = vmul.f32 %v6314_v47, %v1687_v1  ;;  %v1697_v13 = vmul.f32 %v5058_v18, %v6260_v48  ;;  %2231 = vperm.xlu1 %4849, %v6091_v54  }
 0x26a   : > { %v6354_v35 = vadd.f32 %v1762_v49, %v1738_v28  ;;  %v6356_v51 = vadd.f32 %v1762_v49, %v1739_v46  ;;  %v1743_v2 = vmul.f32 %v1722_v27, %v1695_v53  ;;  %v1734_v15 = vmul.f32 %v6314_v47, %v1686_v38  ;;  %v1774_v27 = vpop.permute.xlu0 %1773 }
 0x26b   : > { %v1781_v21 = vadd.f32 %v6292_v23, %v1733_v8  ;;  %v6360_v41 = vadd.f32 %v1766_v37, %v1740_v45  ;;  %v6362_v11 = vadd.f32 %v1766_v37, %v1741_v44  ;;  %v1744_v17 = vmul.f32 %v1726_v31, %v1696_v30 }
 0x26c   : > { %v1745_v48 = vmul.f32 %v1726_v31, %v1697_v13  ;;  %v6365_v26 = vadd.f32 %v1758_v29, %v1736_v12  ;;  %v6367_v59 = vadd.f32 %v1758_v29, %v1737_v61  ;;  %v1698_v49 = vmul.f32 %v5056_v62, %v6229_v6  ;;  %v1778_v31 = vpop.permute.xlu1 %1777 }
 0x26d   : > { %v6372_v47 = vadd.f32 %v6292_v23, %v1732_v9  ;;  %v1783_v5 = vadd.f32 %v6322_v36, %v1735_v10  ;;  %v1699_v37 = vmul.f32 %v5058_v18, %v6238_v25  ;;  %v6376_v32 = vadd.f32 %v1770_v7, %v1742_v63  ;;  %4851 = vset.pattern.permute.xlu1 %v8544_v34 }
 0x26e   : > { %v1818_v24 = vmul.f32 0.044715, %v6354_v35  ;;  %v1819_v50 = vmul.f32 0.044715, %v6356_v51  ;;  %v1782_v29 = vadd.f32 %v6322_v36, %v1734_v15  ;;  %v6381_v53 = vadd.f32 %v1770_v7, %v1743_v2  ;;  %2279 = vperm.xlu1 %4851, %v6091_v54  }
 0x26f   : > { %v6384_v6 = vmul.f32 0.044715, %v6360_v41  ;;  %v1821_v0 = vmul.f32 0.044715, %v6362_v11  ;;  %v1746_v23 = vmul.f32 %v1730_v14, %v1698_v49  ;;  %v6387_v62 = vadd.f32 %v1774_v27, %v1744_v17 }
 0x270   : > { %v1816_v25 = vmul.f32 0.044715, %v6365_v26  ;;  %v1817_v18 = vmul.f32 0.044715, %v6367_v59  ;;  %v6391_v28 = vadd.f32 %v1774_v27, %v1745_v48  ;;  %v1813_v46 = vmul.f32 0.044715, %v1781_v21 }
 0x271   : > { %v1747_v36 = vmul.f32 %v1730_v14, %v1699_v37  ;;  %v1822_v58 = vmul.f32 0.044715, %v6376_v32  ;;  %v6395_v4 = vmul.f32 0.5, %v1781_v21  ;;  %v1815_v7 = vmul.f32 0.044715, %v1783_v5 }
 0x272   : > { %v1823_v8 = vmul.f32 0.044715, %v6381_v53  ;;  %v1829_v12 = vmul.f32 %v1813_v46, %v1781_v21  ;;  %v1812_v38 = vmul.f32 0.044715, %v6372_v47  ;;  %v1814_v1 = vmul.f32 0.044715, %v1782_v29 }
 0x273   : > { %v6399_v61 = vadd.f32 %v1778_v31, %v1746_v23  ;;  %v6402_v45 = vmul.f32 0.044715, %v6387_v62  ;;  %v6404_v44 = vmul.f32 0.5, %v1783_v5  ;;  %v1831_v33 = vmul.f32 %v1815_v7, %v1783_v5 }
 0x274   : > { %v1845_v30 = vmul.f32 %v1829_v12, %v1781_v21  ;;  %v1828_v9 = vmul.f32 %v1812_v38, %v6372_v47  ;;  %v1830_v63 = vmul.f32 %v1814_v1, %v1782_v29  ;;  %v1833_v10 = vmul.f32 %v1817_v18, %v6367_v59 }
 0x275   : > { %v6409_v13 = vadd.f32 %v1778_v31, %v1747_v36  ;;  %v1825_v2 = vmul.f32 0.044715, %v6391_v28  ;;  %v1847_v15 = vmul.f32 %v1831_v33, %v1783_v5  ;;  %v1835_v14 = vmul.f32 %v1819_v50, %v6356_v51 }
 0x276   : > { %v1861_v17 = vadd.f32 %v1845_v30, %v1781_v21  ;;  %v1844_v48 = vmul.f32 %v1828_v9, %v6372_v47  ;;  %v1846_v49 = vmul.f32 %v1830_v63, %v1782_v29  ;;  %v1849_v27 = vmul.f32 %v1833_v10, %v6367_v59 }
 0x277   : > { %v1863_v37 = vadd.f32 %v1847_v15, %v1783_v5  ;;  %v1851_v23 = vmul.f32 %v1835_v14, %v6356_v51  ;;  %v1832_v18 = vmul.f32 %v1816_v25, %v6365_v26  ;;  %v1834_v31 = vmul.f32 %v1818_v24, %v6354_v35 }
 0x278   : > { %v1877_v46 = vmul.f32 0.7978846, %v1861_v17  ;;  %v1860_v36 = vadd.f32 %v1844_v48, %v6372_v47  ;;  %v1862_v7 = vadd.f32 %v1846_v49, %v1782_v29  ;;  %v1865_v50 = vadd.f32 %v1849_v27, %v6367_v59 }
 0x279   : > { %v1879_v12 = vmul.f32 0.7978846, %v1863_v37  ;;  %v1867_v21 = vadd.f32 %v1851_v23, %v6356_v51  ;;  %v1848_v38 = vmul.f32 %v1832_v18, %v6365_v26  ;;  %v1850_v1 = vmul.f32 %v1834_v31, %v6354_v35 }
 0x27a   : > { %5059 = vtanh.f32 %v1877_v46  ;;  %v1876_v5 = vmul.f32 0.7978846, %v1860_v36  ;;  %v1878_v25 = vmul.f32 0.7978846, %v1862_v7  ;;  %v1881_v33 = vmul.f32 0.7978846, %v1865_v50 }
 0x27b   : > { %5061 = vtanh.f32 %v1879_v12  ;;  %v1883_v24 = vmul.f32 0.7978846, %v1867_v21  ;;  %v1864_v30 = vadd.f32 %v1848_v38, %v6365_v26  ;;  %v1866_v9 = vadd.f32 %v1850_v1, %v6354_v35 }
 0x27c   : > { %v1796_v63 = vmul.f32 0.5, %v6372_v47  ;;  %v6429_v10 = vmul.f32 0.5, %v1782_v29  ;;  %5063 = vtanh.f32 %v1876_v5  ;;  %v1837_v15 = vmul.f32 %v1821_v0, %v6362_v11 }
 0x27d   : > { %5065 = vtanh.f32 %v1878_v25  ;;  %v1880_v14 = vmul.f32 0.7978846, %v1864_v30  ;;  %v1882_v17 = vmul.f32 0.7978846, %v1866_v9  ;;  %v1839_v48 = vmul.f32 %v1823_v8, %v6381_v53 }
 0x27e   : > { %v1826_v54 = vmul.f32 0.044715, %v6399_v61  ;;  %v1827_v49 = vmul.f32 0.044715, %v6409_v13  ;;  %5067 = vtanh.f32 %v1881_v33  ;;  %v1853_v27 = vmul.f32 %v1837_v15, %v6362_v11 }
 0x27f   : > { %5069 = vtanh.f32 %v1883_v24  ;;  %v1855_v47 = vmul.f32 %v1839_v48, %v6381_v53  ;;  %v1836_v29 = vmul.f32 %v6384_v6, %v6360_v41  ;;  %v1838_v0 = vmul.f32 %v1822_v58, %v6376_v32 }
 0x280   : > { %v1801_v37 = vmul.f32 0.5, %v6367_v59  ;;  %v1803_v23 = vmul.f32 0.5, %v6356_v51  ;;  %5071 = vtanh.f32 %v1880_v14  ;;  %v1869_v8 = vadd.f32 %v1853_v27, %v6362_v11 }
 0x281   : > { %5073 = vtanh.f32 %v1882_v17  ;;  %v1871_v18 = vadd.f32 %v1855_v47, %v6381_v53  ;;  %v1852_v31 = vmul.f32 %v1836_v29, %v6360_v41  ;;  %v1854_v46 = vmul.f32 %v1838_v0, %v6376_v32 }
 0x282   : > { %v1800_v36 = vmul.f32 0.5, %v6365_v26  ;;  %v1885_v7 = vmul.f32 0.7978846, %v1869_v8  ;;  %v1841_v6 = vmul.f32 %v1825_v2, %v6391_v28  ;;  %v1843_v58 = vmul.f32 %v1827_v49, %v6409_v13 }
 0x283   : > { %v1802_v59 = vmul.f32 0.5, %v6354_v35  ;;  %v1887_v51 = vmul.f32 0.7978846, %v1871_v18  ;;  %v1868_v50 = vadd.f32 %v1852_v31, %v6360_v41  ;;  %v1870_v12 = vadd.f32 %v1854_v46, %v6376_v32 }
 0x284   : > { %v5060_v21 = vpop.eup %5059  ;;  %5075 = vtanh.f32 %v1885_v7  ;;  %v1857_v38 = vmul.f32 %v1841_v6, %v6391_v28  ;;  %v1859_v1 = vmul.f32 %v1843_v58, %v6409_v13  ;;  %v1840_v26 = vmul.f32 %v6402_v45, %v6387_v62 }
 0x285   : > { %v5062_v5 = vpop.eup %5061  ;;  %v1909_v2 = vadd.f32 1.0, %v5060_v21  ;;  %5077 = vtanh.f32 %v1887_v51  ;;  %v1884_v25 = vmul.f32 0.7978846, %v1868_v50  ;;  %v1886_v33 = vmul.f32 0.7978846, %v1870_v12 }
 0x286   : > { %v5064_v35 = vpop.eup %5063  ;;  %v1911_v24 = vadd.f32 1.0, %v5062_v5  ;;  %v1873_v30 = vadd.f32 %v1857_v38, %v6391_v28  ;;  %v1875_v9 = vadd.f32 %v1859_v1, %v6409_v13  ;;  %v1842_v15 = vmul.f32 %v1826_v54, %v6399_v61 }
 0x287   : > { %v5066_v14 = vpop.eup %5065  ;;  %v6460_v17 = vmul.f32 %v1909_v2, %v6395_v4  ;;  %v1908_v48 = vadd.f32 1.0, %v5064_v35  ;;  %5079 = vtanh.f32 %v1884_v25  ;;  %v1856_v45 = vmul.f32 %v1840_v26, %v6387_v62 }
 0x288   : > { %v5068_v49 = vpop.eup %5067  ;;  %v6464_v27 = vmul.f32 %v1911_v24, %v6404_v44  ;;  %v1910_v47 = vadd.f32 1.0, %v5066_v14  ;;  %5081 = vtanh.f32 %v1886_v33  ;;  %v1889_v29 = vmul.f32 0.7978846, %v1873_v30 }
 0x289   : > { %v5070_v0 = vpop.eup %5069  ;;  %v6466_v8 = vmul.f32 %v1908_v48, %v1796_v63  ;;  %v1913_v18 = vadd.f32 1.0, %v5068_v49  ;;  %v1891_v54 = vmul.f32 0.7978846, %v1875_v9  ;;  %v1858_v31 = vmul.f32 %v1842_v15, %v6399_v61 }
 0x28a   : > { %v5072_v4 = vpop.eup %5071  ;;  %v1950_v46 = vpack.c.bf16 %v6464_v27, %v6460_v17  ;;  %v6472_v7 = vmul.f32 %v1910_v47, %v6429_v10  ;;  %v1915_v6 = vadd.f32 1.0, %v5070_v0  ;;  %5083 = vtanh.f32 %v1889_v29 }
 0x28b   : > { %v5074_v44 = vpop.eup %5073  ;;  %v6474_v58 = vmul.f32 %v1913_v18, %v1801_v37  ;;  %v1912_v51 = vadd.f32 1.0, %v5072_v4  ;;  %5085 = vtanh.f32 %v1891_v54  ;;  %v1872_v63 = vadd.f32 %v1856_v45, %v6387_v62 }
 0x28c   : > { %2021 = vmatprep.subr.bf16.mxu1 %v1950_v46  ;;  %v1949_v50 = vpack.c.bf16 %v6472_v7, %v6466_v8  ;;  %v6479_v12 = vmul.f32 %v1915_v6, %v1803_v23  ;;  %v1914_v21 = vadd.f32 1.0, %v5074_v44  ;;  %v1874_v38 = vadd.f32 %v1858_v31, %v6399_v61 }
 0x28d   : > { %v6482_v10 = vmul.f32 %v1912_v51, %v1800_v36  ;;  %v1888_v1 = vmul.f32 0.7978846, %v1872_v63  ;;  %v1805_v33 = vmul.f32 0.5, %v6362_v11  ;;  %v1807_v36 = vmul.f32 0.5, %v6381_v53 }
 0x28e   : > { %v5076_v26 = vpop.eup %5075  ;;  %2022 = vmatpush1.bf16.msra.mxu1 %v1949_v50  ;;  %v1952_v37 = vpack.c.bf16 %v6479_v12, %v6474_v58  ;;  %v6486_v5 = vmul.f32 %v1914_v21, %v1802_v59  ;;  %v1890_v2 = vmul.f32 0.7978846, %v1874_v38  ;;  %v1804_v14 = vmul.f32 0.5, %v6360_v41 }
 0x28f   : > { %v5078_v25 = vpop.eup %5077  ;;  %v1917_v35 = vadd.f32 1.0, %v5076_v26  ;;  %5087 = vtanh.f32 %v1888_v1  ;;  %v1806_v48 = vmul.f32 0.5, %v6376_v32  ;;  %v1809_v18 = vmul.f32 0.5, %v6391_v28  ;;  %v4941_v26 = vld [vmem:[%s8512_s3 + $0x20] sm:$0xff]  }
 0x290   : > { %2023 = vmatprep.subr.bf16.mxu1 %v1952_v37  ;;  %v1951_v23 = vpack.c.bf16 %v6486_v5, %v6482_v10  ;;  %v1919_v24 = vadd.f32 1.0, %v5078_v25  ;;  %5089 = vtanh.f32 %v1890_v2  ;;  %v1811_v31 = vmul.f32 0.5, %v6409_v13  ;;  %v4943_v37 = vld [vmem:[%s8512_s3 + $0x30] sm:$0xff]   ;;  %v4944_v2 = vld [vmem:[%s8512_s3 + $0x38] sm:$0xff]  }
 0x291   : > { %v5080_v30 = vpop.eup %5079  ;;  %v6492_v9 = vmul.f32 %v1917_v35, %v1805_v33  ;;  %v1808_v28 = vmul.f32 0.5, %v6387_v62  ;;  %v1810_v50 = vmul.f32 0.5, %v6399_v61  ;;  %v8647_v62 = vmov 0   ;;  %v4942_v61 = vld [vmem:[%s8512_s3 + $0x28] sm:$0xff]   ;;  %v5295_v33 = vld [vmem:[%s8515_s6] sm:$0xff] }
 0x292   : > { %v5082_v15 = vpop.eup %5081  ;;  %2024 = vmatpush1.bf16.msra.mxu1 %v1951_v23  ;;  %v6494_v59 = vmul.f32 %v1919_v24, %v1807_v36  ;;  %v1916_v11 = vadd.f32 1.0, %v5080_v30  ;;  %v8543_v25 = vmov 7   ;;  %v2573_v35 = vld [vmem:[%s8517_s8 + $0x8] sm:$0xff]  ;;  %v6553_v23 = vld [vmem:[%s8519_s10] sm:$0xff]  ;;  %v6568_v24 = vld [vmem:[%s8517_s8 + $0x10] sm:$0xff] }
 0x293   : > { %8640 = vst [vmem:[#allocation27_spill] sm:$0xff] %v6492_v9  ;;  %v1918_v45 = vadd.f32 1.0, %v5082_v15  ;;  %4852 = vset.pattern.permute.xlu1 %v8543_v25  ;;  %2706 = vperm.xlu0 %4855, %v2573_v35   ;;  %v6561_v36 = vld [vmem:[%s8517_s8] sm:$0xff]  ;;  %v2575_v30 = vld [vmem:[%s8517_s8 + $0x18] sm:$0xff]  ;;  %v8648_v15 = vmov 2  }
 0x294   : > { %8641 = vst [vmem:[#allocation28_spill] sm:$0xff] %v6494_v59  ;;  %v5084_v49 = vpop.eup %5083  ;;  %v1954_v47 = vpack.c.bf16 %v6494_v59, %v6492_v9  ;;  %v6500_v53 = vmul.f32 %v1916_v11, %v1804_v14  ;;  %2468 = vperm.xlu1 %4852, %v5295_v33   ;;  %v6583_v14 = vld [vmem:[%s8519_s10 + $0x10] sm:$0xff]  ;;  %v8649_v11 = vmov 3  }
 0x295   : > { %v5086_v29 = vpop.eup %5085  ;;  %v6502_v0 = vmul.f32 %v1918_v45, %v1806_v48  ;;  %v1921_v54 = vadd.f32 1.0, %v5084_v49  ;;  %v6593_v48 = vld [vmem:[%s8517_s8 + $0x20] sm:$0xff]  ;;  %v6611_v49 = vld [vmem:[%s8517_s8 + $0x28] sm:$0xff] }
 0x296   : > { %2025 = vmatprep.subr.bf16.mxu1 %v1954_v47  ;;  %v1923_v41 = vadd.f32 1.0, %v5086_v29  ;;  %v6603_v45 = vld [vmem:[%s8519_s10 + $0x20] sm:$0xff]  ;;  %v6619_v47 = vld [vmem:[%s8517_s8 + $0x30] sm:$0xff] }
 0x297   : > { %8642 = vst [vmem:[#allocation29_spill] sm:$0xff] %v6502_v0  ;;  %v1953_v32 = vpack.c.bf16 %v6502_v0, %v6500_v53  ;;  %v6508_v4 = vmul.f32 %v1921_v54, %v1809_v18  ;;  %4863 = vset.pattern.permute.xlu0 %v8548_v3  ;;  %v6629_v18 = vld [vmem:[%s8519_s10 + $0x30] sm:$0xff] }
 0x298   : > { %v6510_v46 = vmul.f32 %v1923_v41, %v1811_v31  ;;  %4853 = vset.pattern.permute.xlu1 %v8647_v62  ;;  %2902 = vperm.xlu0 %4863, %v6561_v36  }
 0x299   : > { %8643 = vst [vmem:[#allocation30_spill] sm:$0xff] %v6508_v4  ;;  %v5088_v6 = vpop.eup %5087  ;;  %2026 = vmatpush1.bf16.msra.mxu1 %v1953_v32  ;;  %2596 = vperm.xlu1 %4853, %v2573_v35  }
 0x29a   : > { %8644 = vst [vmem:[#allocation31_spill] sm:$0xff] %v6510_v46  ;;  %v5090_v44 = vpop.eup %5089  ;;  %v1956_v51 = vpack.c.bf16 %v6510_v46, %v6508_v4  ;;  %v1920_v63 = vadd.f32 1.0, %v5088_v6 }
 0x29b   : > { %v1922_v13 = vadd.f32 1.0, %v5090_v44 }
 0x29c   : > { %2027 = vmatprep.subr.bf16.mxu1 %v1956_v51  ;;  %v6516_v21 = vmul.f32 %v1920_v63, %v1808_v28  ;;  %2910 = vperm.xlu0 %4863, %v6568_v24  }
 0x29d   : > { %v6518_v38 = vmul.f32 %v1922_v13, %v1810_v50  ;;  %2647 = vperm.xlu1 %4853, %v6553_v23  }
 0x29e   : > { %8645 = vst [vmem:[#allocation32_spill] sm:$0xff] %v6516_v21 }
 0x29f   : > { %8646 = vst [vmem:[#allocation33_spill] sm:$0xff] %v6518_v38  ;;  %v1955_v1 = vpack.c.bf16 %v6518_v38, %v6516_v21 }
 0x2a0   : > { %4870 = vset.pattern.permute.xlu0 %v8647_v62 }
 0x2a1   : > { %2028 = vmatpush1.bf16.msra.mxu1 %v1955_v1  ;;  %4854 = vset.pattern.permute.xlu1 %v8639_v16 }
 0x2a2   : > { %2702 = vperm.xlu1 %4854, %v6561_v36   ;;  %2591 = vperm.xlu0 %4870, %v6561_v36  }
 0x2a4   : > { %4695 = vmatmul.mubr.msk.bf16.vlgmr.msra.gmra.mrb[0].mxu1 %vm1305_vm5, %v4941_v26  ;;  %v6650_v26 = vld [vmem:[%s8517_s8 + $0x38] sm:$0xff] }
 0x2a5   : > { %2063 = vmatprep.mubr.bf16.mxu1 %v8647_v62 }
 0x2a6   : > { %4856 = vset.pattern.permute.xlu1 %v8647_v62 }
 0x2a7   : > { %2601 = vperm.xlu1 %4856, %v6568_v24  }
 0x2ab   : > { %2606 = vperm.xlu1 %4856, %v2575_v30   ;;  %v1963_v29 = vpop.permute.xlu1 %1962  ;;  %v1959_v54 = vpop.permute.xlu0 %1958 }
 0x2ac   : > { %4696 = vmatmul.mubr.msk.bf16.gmra.mrb[4].mxu1 %vm1305_vm5, %v4942_v61 }
 0x2ad   : > { %2073 = vmatprep.mubr.bf16.mxu1 %v8647_v62 }
 0x2af   : > { %4857 = vset.pattern.permute.xlu1 %v8648_v15  ;;  %v1967_v28 = vpop.permute.xlu1 %1966 }
 0x2b0   : > { %2770 = vperm.xlu1 %4857, %v2573_v35  }
 0x2b4   : > { %4697 = vmatmul.mubr.msk.bf16.gmra.mrb[8].mxu1 %vm1305_vm5, %v4943_v37  ;;  %4858 = vset.pattern.permute.xlu1 %v8647_v62 }
 0x2b5   : > { %2083 = vmatprep.mubr.bf16.mxu1 %v8647_v62  ;;  %2657 = vperm.xlu1 %4858, %v6583_v14  }
 0x2b9   : > { %4859 = vset.pattern.permute.xlu1 %v8639_v16 }
 0x2ba   : > { %2710 = vperm.xlu1 %4859, %v6568_v24  }
 0x2bc   : > { %4698 = vmatmul.mubr.msk.bf16.gmra.mrb[12].mxu1 %vm1305_vm5, %v4944_v2  ;;  %v1975_v2 = vpop.permute.xlu1 %1974 }
 0x2bd   : > { %3197 = vmatprep.mubr.bf16.mxu1 %v8647_v62 }
 0x2be   : > { %2714 = vperm.xlu1 %4859, %v2575_v30  }
 0x2c2   : > { %4860 = vset.pattern.permute.xlu1 %v8649_v11 }
 0x2c3   : > { %2834 = vperm.xlu1 %4860, %v2573_v35  }
 0x2c7   : > { %4861 = vset.pattern.permute.xlu1 %v8647_v62 }
 0x2c8   : > { %2611 = vperm.xlu1 %4861, %v6593_v48  }
 0x2cc   : > { %4862 = vset.pattern.permute.xlu1 %v8648_v15 }
 0x2cd   : > { %2774 = vperm.xlu1 %4862, %v6568_v24  }
 0x2d1   : > { %2778 = vperm.xlu1 %4862, %v2575_v30  }
 0x2d5   : > { %4864 = vset.pattern.permute.xlu1 %v8548_v3 }
 0x2d6   : > { %2906 = vperm.xlu1 %4864, %v2573_v35   ;;  %v1971_v35 = vpop.permute.xlu0 %1970 }
 0x2da   : > { %4865 = vset.pattern.permute.xlu1 %v8647_v62 }
 0x2db   : > { %2667 = vperm.xlu1 %4865, %v6603_v45  }
 0x2df   : > { %4866 = vset.pattern.permute.xlu1 %v8639_v16 }
 0x2e0   : > { %2718 = vperm.xlu1 %4866, %v6593_v48  }
 0x2e4   : > { %2722 = vperm.xlu1 %4866, %v6611_v49  }
 0x2e8   : > { %4867 = vset.pattern.permute.xlu1 %v8649_v11 }
 0x2e9   : > { %2842 = vperm.xlu1 %4867, %v2575_v30  }
 0x2ed   : > { %4868 = vset.pattern.permute.xlu1 %v8647_v62 }
 0x2ee   : > { %2621 = vperm.xlu1 %4868, %v6619_v47  }
 0x2f2   : > { %4869 = vset.pattern.permute.xlu1 %v8648_v15 }
 0x2f3   : > { %2782 = vperm.xlu1 %4869, %v6593_v48  }
 0x2f7   : > { %2786 = vperm.xlu1 %4869, %v6611_v49  }
 0x2fb   : > { %4871 = vset.pattern.permute.xlu1 %v8548_v3 }
 0x2fc   : > { %2914 = vperm.xlu1 %4871, %v2575_v30  }
 0x300   : > { %4872 = vset.pattern.permute.xlu1 %v8647_v62 }
 0x301   : > { %2677 = vperm.xlu1 %4872, %v6629_v18  }
 0x305   : > { %4874 = vset.pattern.permute.xlu1 %v8639_v16 }
 0x306   : > { %2726 = vperm.xlu1 %4874, %v6619_v47  }
 0x30a   : > { %2730 = vperm.xlu1 %4874, %v6650_v26  }
 0x30e   : > { %4875 = vset.pattern.permute.xlu1 %v8649_v11 }
 0x30f   : > { %2850 = vperm.xlu1 %4875, %v6611_v49  }
 0x313   : > { %4876 = vset.pattern.permute.xlu1 %v8648_v15 }
 0x314   : > { %2790 = vperm.xlu1 %4876, %v6619_v47  }
 0x377   : > { %v2055_v31 = vpop.f32.mrb[0].mxu1 }
 0x378   : > { %v2057_v41 = vpop.f32.mrb[1].mxu1  ;;  %v6633_v6 = vadd.f32 %v2055_v31, %v1959_v54 }
 0x379   : > { %v2059_v32 = vpop.f32.mrb[2].mxu1  ;;  %v6637_v63 = vadd.f32 %v2057_v41, %v1959_v54 }
 0x37a   : > { %v6635_v44 = vadd.f32 %v2059_v32, %v1963_v29  ;;  %v2061_v51 = vpop.f32.mrb[3].mxu1 }
 0x37b   : > { %v6639_v50 = vadd.f32 %v2061_v51, %v1963_v29 }
 0x37c   : > { %v2094_v13 = vadd.f32 %v6635_v44, %v6633_v6 }
 0x37d   : > { %v2107_v1 = vadd.f32 %v6639_v50, %v6637_v63 }
 0x37f   : > { %v2065_v61 = vpop.f32.mrb[4].mxu1 }
 0x380   : > { %v6652_v37 = vadd.f32 %v2065_v61, %v1967_v28  ;;  %v2067_v33 = vpop.f32.mrb[5].mxu1 }
 0x381   : > { %v6654_v30 = vadd.f32 %v2067_v33, %v1967_v28  ;;  %v2069_v29 = vpop.f32.mrb[6].mxu1  ;;  %v1983_v28 = vpop.permute.xlu1 %1982 }
 0x382   : > { %v2095_v54 = vadd.f32 %v2094_v13, %v6652_v37  ;;  %v6658_v31 = vadd.f32 %v2069_v29, %v1971_v35  ;;  %v2071_v41 = vpop.f32.mrb[7].mxu1  ;;  %v1979_v29 = vpop.permute.xlu0 %1978 }
 0x383   : > { %v2108_v32 = vadd.f32 %v2107_v1, %v6654_v30  ;;  %v6661_v51 = vadd.f32 %v2071_v41, %v1971_v35 }
 0x384   : > { %v2096_v61 = vadd.f32 %v2095_v54, %v6658_v31 }
 0x385   : > { %v2109_v25 = vadd.f32 %v2108_v32, %v6661_v51  ;;  %v6672_v54 = vpop.permute.xlu1 %2203 }
 0x386   : > { %v1987_v20 = vpop.permute.xlu0 %1986 }
 0x387   : > { %v2075_v33 = vpop.f32.mrb[8].mxu1 }
 0x388   : > { %v6667_v34 = vadd.f32 %v2075_v33, %v1975_v2  ;;  %v2077_v13 = vpop.f32.mrb[9].mxu1 }
 0x389   : > { %v6669_v57 = vadd.f32 %v2077_v13, %v1975_v2  ;;  %v2079_v3 = vpop.f32.mrb[10].mxu1  ;;  %v8650_v13 = vmov 4  }
 0x38a   : > { %v2097_v1 = vadd.f32 %v2096_v61, %v6667_v34  ;;  %v2080_v35 = vadd.f32 %v2079_v3, %v1979_v29  ;;  %v2081_v41 = vpop.f32.mrb[11].mxu1  ;;  %4878 = vset.pattern.permute.xlu1 %v8650_v13  ;;  %v6681_v3 = vpop.permute.xlu1 %2251 }
 0x38b   : > { %v2110_v32 = vadd.f32 %v2109_v25, %v6669_v57  ;;  %v6676_v52 = vadd.f32 %v2081_v41, %v1979_v29  ;;  %2918 = vperm.xlu1 %4878, %v6593_v48   ;;  %v6843_v9 = vpop.permute.xlu0 %2259 }
 0x38c   : > { %v2098_v33 = vadd.f32 %v2097_v1, %v2080_v35 }
 0x38d   : > { %v2111_v55 = vadd.f32 %v2110_v32, %v6676_v52  ;;  %v6690_v32 = vld [vmem:[%s8519_s10 + $0x8] sm:$0xff] }
 0x38e   : > { %8651 = vst [vmem:[#allocation34_spill] sm:$0xff] %v6690_v32  ;;  %2652 = vperm.xlu0 %4870, %v6690_v32  }
 0x38f   : > { %v2085_v2 = vpop.f32.mrb[12].mxu1  ;;  %2922 = vperm.xlu1 %4878, %v6611_v49  }
 0x390   : > { %v2086_v22 = vadd.f32 %v2085_v2, %v1983_v28  ;;  %v2087_v61 = vpop.f32.mrb[13].mxu1 }
 0x391   : > { %v6684_v60 = vadd.f32 %v2087_v61, %v1983_v28  ;;  %v2089_v25 = vpop.f32.mrb[14].mxu1  ;;  %v6697_v28 = vld [vmem:[%s8519_s10 + $0x18] sm:$0xff]  ;;  %v6699_v61 = vpop.permute.xlu1 %2255 }
 0x392   : > { %v2099_v29 = vadd.f32 %v2098_v33, %v2086_v22  ;;  %v2090_v41 = vadd.f32 %v2089_v25, %v1987_v20  ;;  %v2091_v56 = vpop.f32.mrb[15].mxu1  ;;  %8652 = vst [vmem:[#allocation35_spill] sm:$0xff] %v6697_v28  ;;  %2662 = vperm.xlu0 %4870, %v6697_v28  }
 0x393   : > { %v2112_v1 = vadd.f32 %v2111_v55, %v6684_v60  ;;  %v2092_v43 = vadd.f32 %v2091_v56, %v1987_v20  ;;  %4879 = vset.pattern.permute.xlu1 %v8649_v11 }
 0x394   : > { %v2100_v2 = vadd.f32 %v2099_v29, %v2090_v41  ;;  %2858 = vperm.xlu1 %4879, %v6650_v26  }
 0x395   : > { %v2113_v40 = vadd.f32 %v2112_v1, %v2092_v43  ;;  %v6704_v42 = vpop.permute.xlu1 %2215 }
 0x396   : > { %v2101_v33 = vrot.slane %v2100_v2, 4  ;;  %2616 = vperm.xlu0 %4870, %v6611_v49  }
 0x397   : > { %v2114_v20 = vrot.slane %v2113_v40, 4 }
 0x398   : > { %v2102_v56 = vadd.f32 %v2101_v33, %v2100_v2  ;;  %4880 = vset.pattern.permute.xlu1 %v8650_v13  ;;  %v6711_v2 = vld [vmem:[%s8519_s10 + $0x28] sm:$0xff] }
 0x399   : > { %v2115_v55 = vadd.f32 %v2114_v20, %v2113_v40  ;;  %8653 = vst [vmem:[#allocation36_spill] sm:$0xff] %v6711_v2  ;;  %2926 = vperm.xlu1 %4880, %v6619_v47   ;;  %v6715_v19 = vpop.permute.xlu1 %2263 }
 0x39a   : > { %v2103_v25 = vrot.slane %v2102_v56, 2  ;;  %2672 = vperm.xlu0 %4870, %v6711_v2  }
 0x39b   : > { %v2116_v29 = vrot.slane %v2115_v55, 2 }
 0x39c   : > { %v2104_v1 = vadd.f32 %v2103_v25, %v2102_v56 }
 0x39d   : > { %v2117_v39 = vadd.f32 %v2116_v29, %v2115_v55  ;;  %4882 = vset.pattern.permute.xlu1 %v8639_v16 }
 0x39e   : > { %v2105_v33 = vrot.slane %v2104_v1, 1  ;;  %3102 = vperm.xlu1 %4882, %v6553_v23   ;;  %2626 = vperm.xlu0 %4870, %v6650_v26  }
 0x39f   : > { %v2118_v40 = vrot.slane %v2117_v39, 1 }
 0x3a0   : > { %v2106_v20 = vadd.f32 %v2105_v33, %v2104_v1 }
 0x3a1   : > { %v2119_v56 = vadd.f32 %v2118_v40, %v2117_v39 }
 0x3a2   : > { %v2120_v25 = vmul.f32 0.015625, %v2106_v20  ;;  %3106 = vperm.xlu1 %4882, %v6690_v32  }
 0x3a3   : > { %v2121_v49 = vmul.f32 0.015625, %v2119_v56  ;;  %v6764_v56 = vpop.permute.xlu1 %2219 }
 0x3a4   : > { %v6720_v55 = vsub.f32 %v6633_v6, %v2120_v25  ;;  %v6723_v29 = vsub.f32 %v6635_v44, %v2120_v25  ;;  %v6726_v38 = vsub.f32 %v6652_v37, %v2120_v25  ;;  %v6729_v1 = vsub.f32 %v6658_v31, %v2120_v25  ;;  %v6744_v44 = vld [vmem:[%s8519_s10 + $0x38] sm:$0xff] }
 0x3a5   : > { %v6733_v39 = vsub.f32 %v6667_v34, %v2120_v25  ;;  %v6735_v33 = vsub.f32 %v2080_v35, %v2120_v25  ;;  %v6737_v23 = vsub.f32 %v2086_v22, %v2120_v25  ;;  %v6739_v6 = vsub.f32 %v2090_v41, %v2120_v25  ;;  %8654 = vst [vmem:[#allocation37_spill] sm:$0xff] %v6744_v44 }
 0x3a6   : > { %v2138_v37 = vmul.f32 %v6720_v55, %v6720_v55  ;;  %v2140_v31 = vmul.f32 %v6723_v29, %v6723_v29  ;;  %v2142_v34 = vmul.f32 %v6726_v38, %v6726_v38  ;;  %v2144_v22 = vmul.f32 %v6729_v1, %v6729_v1  ;;  %2682 = vperm.xlu0 %4870, %v6744_v44  }
 0x3a7   : > { %v6756_v41 = vsub.f32 %v6637_v63, %v2121_v49  ;;  %v6759_v40 = vsub.f32 %v6639_v50, %v2121_v49  ;;  %v6762_v20 = vsub.f32 %v6654_v30, %v2121_v49  ;;  %v6768_v25 = vsub.f32 %v6661_v51, %v2121_v49  ;;  %v6782_v50 = vld [vmem:[%s8517_s8 + $0x48] sm:$0xff]  ;;  %4883 = vset.pattern.permute.xlu1 %v8647_v62  ;;  %v6801_v4 = vpop.permute.xlu1 %2267 }
 0x3a8   : > { %v2154_v35 = vadd.f32 %v2140_v31, %v2138_v37  ;;  %v6771_v46 = vsub.f32 %v6669_v57, %v2121_v49  ;;  %v6774_v37 = vsub.f32 %v6676_v52, %v2121_v49  ;;  %v6777_v63 = vsub.f32 %v6684_v60, %v2121_v49  ;;  %3245 = vperm.xlu1 %4883, %v6782_v50  }
 0x3a9   : > { %v6784_v31 = vsub.f32 %v2092_v43, %v2121_v49  ;;  %v2139_v51 = vmul.f32 %v6756_v41, %v6756_v41  ;;  %v2141_v57 = vmul.f32 %v6759_v40, %v6759_v40  ;;  %v2146_v60 = vmul.f32 %v6733_v39, %v6733_v39 }
 0x3aa   : > { %v2155_v30 = vadd.f32 %v2154_v35, %v2142_v34  ;;  %v2143_v32 = vmul.f32 %v6762_v20, %v6762_v20  ;;  %4873 = vset.pattern.permute.xlu0 %v8648_v15  ;;  %v2148_v43 = vmul.f32 %v6735_v33, %v6735_v33  ;;  %v2145_v34 = vmul.f32 %v6768_v25, %v6768_v25 }
 0x3ab   : > { %v2167_v21 = vadd.f32 %v2141_v57, %v2139_v51  ;;  %2766 = vperm.xlu0 %4873, %v6561_v36   ;;  %v2147_v51 = vmul.f32 %v6771_v46, %v6771_v46 }
 0x3ac   : > { %v2156_v52 = vadd.f32 %v2155_v30, %v2144_v22  ;;  %v2150_v22 = vmul.f32 %v6737_v23, %v6737_v23  ;;  %4884 = vset.pattern.permute.xlu1 %v8639_v16 }
 0x3ad   : > { %v2168_v35 = vadd.f32 %v2167_v21, %v2143_v32  ;;  %3110 = vperm.xlu1 %4884, %v6583_v14   ;;  %v2149_v32 = vmul.f32 %v6774_v37, %v6774_v37 }
 0x3ae   : > { %v2157_v49 = vadd.f32 %v2156_v52, %v2146_v60  ;;  %v2152_v60 = vmul.f32 %v6739_v6, %v6739_v6 }
 0x3af   : > { %v2169_v57 = vadd.f32 %v2168_v35, %v2145_v34  ;;  %2794 = vperm.xlu0 %4873, %v6650_v26   ;;  %v2151_v34 = vmul.f32 %v6777_v63, %v6777_v63  ;;  %v6822_v35 = vpop.permute.xlu1 %2271 }
 0x3b0   : > { %v2158_v30 = vadd.f32 %v2157_v49, %v2148_v43  ;;  %v6817_v43 = vld [vmem:[%s8517_s8 + $0x40] sm:$0xff] }
 0x3b1   : > { %v2170_v52 = vadd.f32 %v2169_v57, %v2147_v51  ;;  %3311 = vperm.xlu1 %4884, %v6817_v43  }
 0x3b2   : > { %v2159_v21 = vadd.f32 %v2158_v30, %v2150_v22  ;;  %v2153_v30 = vmul.f32 %v6784_v31, %v6784_v31 }
 0x3b3   : > { %v2171_v14 = vadd.f32 %v2170_v52, %v2149_v32  ;;  %4877 = vset.pattern.permute.xlu0 %v8649_v11  ;;  %v6830_v32 = vpop.permute.xlu1 %2231  ;;  %v6835_v52 = vld [vmem:[%s8517_s8 + $0x58] sm:$0xff] }
 0x3b4   : > { %v2160_v49 = vadd.f32 %v2159_v21, %v2152_v60  ;;  %2830 = vperm.xlu0 %4877, %v6561_v36  }
 0x3b5   : > { %v2172_v51 = vadd.f32 %v2171_v14, %v2151_v34  ;;  %3114 = vperm.xlu1 %4884, %v6697_v28  }
 0x3b6   : > { %v2161_v22 = vrot.slane %v2160_v49, 4 }
 0x3b7   : > { %v2173_v44 = vadd.f32 %v2172_v51, %v2153_v30  ;;  %v6841_v51 = vpop.permute.xlu1 %2279 }
 0x3b8   : > { %v2162_v57 = vadd.f32 %v2161_v22, %v2160_v49  ;;  %2838 = vperm.xlu0 %4877, %v6568_v24  }
 0x3b9   : > { %v2174_v21 = vrot.slane %v2173_v44, 4  ;;  %4886 = vset.pattern.permute.xlu1 %v8647_v62 }
 0x3ba   : > { %v2163_v60 = vrot.slane %v2162_v57, 2  ;;  %3255 = vperm.xlu1 %4886, %v6835_v52  }
 0x3bb   : > { %v2175_v14 = vadd.f32 %v2174_v21, %v2173_v44  ;;  %v2208_v21 = vpop.permute.xlu0 %2207 }
 0x3bc   : > { %v2164_v34 = vadd.f32 %v2163_v60, %v2162_v57  ;;  %2846 = vperm.xlu0 %4877, %v6593_v48   ;;  %v6848_v57 = vpop.permute.xlu1 %2468 }
 0x3bd   : > { %v2176_v49 = vrot.slane %v2175_v14, 2  ;;  %8655 = vst [vmem:[#allocation38_spill] sm:$0xff] %v6848_v57 }
 0x3be   : > { %v2165_v36 = vrot.slane %v2164_v34, 1  ;;  %4887 = vset.pattern.permute.xlu1 %v8648_v15 }
 0x3bf   : > { %v2177_v30 = vadd.f32 %v2176_v49, %v2175_v14  ;;  %3375 = vperm.xlu1 %4887, %v6817_v43  }
 0x3c0   : > { %v2166_v22 = vadd.f32 %v2165_v36, %v2164_v34  ;;  %2854 = vperm.xlu0 %4877, %v6619_v47   ;;  %v6854_v34 = vpop.permute.xlu1 %2596  ;;  %v6865_v47 = vpop.permute.xlu0 %2211 }
 0x3c1   : > { %v2178_v59 = vrot.slane %v2177_v30, 1  ;;  %8656 = vst [vmem:[#allocation39_spill] sm:$0xff] %v6854_v34 }
 0x3c2   : > { %v2180_v28 = vmul.f32 0.015625, %v2166_v22 }
 0x3c3   : > { %v2179_v44 = vadd.f32 %v2178_v59, %v2177_v30  ;;  %4888 = vset.pattern.permute.xlu1 %v8639_v16  ;;  %v6859_v59 = vld [vmem:[%s8517_s8 + $0x60] sm:$0xff] }
 0x3c4   : > { %v2182_v24 = vadd.f32 1e-05, %v2180_v28  ;;  %4881 = vset.pattern.permute.xlu0 %v8650_v13  ;;  %3118 = vperm.xlu1 %4888, %v6603_v45   ;;  %v6870_v45 = vld [vmem:[%s8517_s8 + $0x50] sm:$0xff]  ;;  %v6872_v28 = vpop.permute.xlu1 %2647 }
 0x3c5   : > { %v2181_v48 = vmul.f32 0.015625, %v2179_v44  ;;  %2930 = vperm.xlu0 %4881, %v6650_v26   ;;  %8657 = vst [vmem:[#allocation40_spill] sm:$0xff] %v6872_v28  ;;  %v2224_v28 = vpop.permute.xlu0 %2223 }
 0x3c6   : > { %5091 = vrsqrt.f32 %v2182_v24 }
 0x3c7   : > { %v2183_v60 = vadd.f32 1e-05, %v2181_v48 }
 0x3c8   : > { %4889 = vset.pattern.permute.xlu1 %v8647_v62 }
 0x3c9   : > { %5093 = vrsqrt.f32 %v2183_v60  ;;  %4885 = vset.pattern.permute.xlu0 %v8639_v16  ;;  %3260 = vperm.xlu1 %4889, %v6859_v59  }
 0x3ca   : > { %3315 = vperm.xlu0 %4885, %v6782_v50  }
 0x3cd   : > { %4890 = vset.pattern.permute.xlu1 %v8648_v15 }
 0x3ce   : > { %3383 = vperm.xlu1 %4890, %v6870_v45   ;;  %3319 = vperm.xlu0 %4885, %v6870_v45  }
 0x3d0   : > { %v5092_v26 = vpop.eup %5091 }
 0x3d1   : > { %v2200_v14 = vmul.f32 %v5092_v26, %v6739_v6  ;;  %v2186_v36 = vmul.f32 %v5092_v26, %v6720_v55  ;;  %v2192_v49 = vmul.f32 %v5092_v26, %v6729_v1  ;;  %v2194_v22 = vmul.f32 %v5092_v26, %v6733_v39 }
 0x3d2   : > { %v2188_v30 = vmul.f32 %v5092_v26, %v6723_v29  ;;  %v2190_v24 = vmul.f32 %v5092_v26, %v6726_v38  ;;  %v2196_v44 = vmul.f32 %v5092_v26, %v6735_v33  ;;  %v2198_v48 = vmul.f32 %v5092_v26, %v6737_v23  ;;  %4891 = vset.pattern.permute.xlu1 %v8649_v11 }
 0x3d3   : > { %v2234_v6 = vmul.f32 %v6672_v54, %v2186_v36  ;;  %v2240_v55 = vmul.f32 %v6704_v42, %v2192_v49  ;;  %v2242_v1 = vmul.f32 %v6764_v56, %v2194_v22  ;;  %v5094_v39 = vpop.eup %5093  ;;  %3439 = vperm.xlu1 %4891, %v6817_v43   ;;  %3323 = vperm.xlu0 %4885, %v6835_v52  }
 0x3d4   : > { %v2236_v60 = vmul.f32 %v2208_v21, %v2188_v30  ;;  %v2201_v29 = vmul.f32 %v5094_v39, %v6784_v31  ;;  %v2187_v38 = vmul.f32 %v5094_v39, %v6756_v41  ;;  %v2193_v23 = vmul.f32 %v5094_v39, %v6768_v25  ;;  %v6902_v30 = vpop.permute.xlu1 %2702 }
 0x3d5   : > { %v6891_v33 = vadd.f32 %v6681_v3, %v2234_v6  ;;  %v6895_v26 = vadd.f32 %v6715_v19, %v2240_v55  ;;  %v2195_v36 = vmul.f32 %v5094_v39, %v6771_v46  ;;  %v2189_v49 = vmul.f32 %v5094_v39, %v6759_v40  ;;  %8658 = vst [vmem:[#allocation41_spill] sm:$0xff] %v6902_v30  ;;  %v2228_v30 = vpop.permute.xlu0 %2227 }
 0x3d6   : > { %v6900_v22 = vadd.f32 %v6699_v61, %v2236_v60  ;;  %v2235_v41 = vmul.f32 %v6672_v54, %v2187_v38  ;;  %v2241_v25 = vmul.f32 %v6704_v42, %v2193_v23  ;;  %v6909_v6 = vadd.f32 %v6801_v4, %v2242_v1 }
 0x3d7   : > { %v2314_v31 = vmul.f32 0.044715, %v6891_v33  ;;  %v2320_v46 = vmul.f32 0.044715, %v6895_v26  ;;  %v2237_v40 = vmul.f32 %v2208_v21, %v2189_v49  ;;  %v2243_v55 = vmul.f32 %v6764_v56, %v2195_v36  ;;  %4892 = vset.pattern.permute.xlu1 %v8639_v16  ;;  %3327 = vperm.xlu0 %4885, %v6859_v59  }
 0x3d8   : > { %v2322_v54 = vmul.f32 0.044715, %v6909_v6  ;;  %v2238_v38 = vmul.f32 %v6865_v47, %v2190_v24  ;;  %v6919_v42 = vadd.f32 %v6681_v3, %v2235_v41  ;;  %v6922_v1 = vadd.f32 %v6715_v19, %v2241_v25  ;;  %v6931_v24 = vpop.permute.xlu1 %2601  ;;  %3122 = vperm.xlu1 %4892, %v6711_v2  }
 0x3d9   : > { %v2330_v60 = vmul.f32 %v2314_v31, %v6891_v33  ;;  %v2316_v23 = vmul.f32 0.044715, %v6900_v22  ;;  %v2336_v56 = vmul.f32 %v2320_v46, %v6895_v26  ;;  %v6929_v21 = vadd.f32 %v6699_v61, %v2237_v40  ;;  %8659 = vst [vmem:[#allocation42_spill] sm:$0xff] %v6931_v24 }
 0x3da   : > { %v2244_v36 = vmul.f32 %v2224_v28, %v2196_v44  ;;  %v6935_v3 = vadd.f32 %v6801_v4, %v2243_v55  ;;  %v2248_v19 = vmul.f32 %v6830_v32, %v2200_v14  ;;  %v2246_v49 = vmul.f32 %v2228_v30, %v2198_v48  ;;  %v6947_v44 = vld [vmem:[%s8517_s8 + $0x68] sm:$0xff] }
 0x3db   : > { %v2346_v41 = vmul.f32 %v2330_v60, %v6891_v33  ;;  %v2338_v31 = vmul.f32 %v2322_v54, %v6909_v6  ;;  %v2191_v25 = vmul.f32 %v5094_v39, %v6762_v20  ;;  %v6942_v61 = vadd.f32 %v6843_v9, %v2238_v38  ;;  %4896 = vset.pattern.permute.xlu0 %v8650_v13  ;;  %v2276_v54 = vpop.permute.xlu0 %2275 }
 0x3dc   : > { %v2315_v4 = vmul.f32 0.044715, %v6919_v42  ;;  %v2321_v46 = vmul.f32 0.044715, %v6922_v1  ;;  %v2332_v14 = vmul.f32 %v2316_v23, %v6900_v22  ;;  %v2197_v48 = vmul.f32 %v5094_v39, %v6774_v37  ;;  %4893 = vset.pattern.permute.xlu1 %v8647_v62  ;;  %3503 = vperm.xlu0 %4896, %v6817_v43   ;;  %v6972_v34 = vpop.permute.xlu1 %2606 }
 0x3dd   : > { %v2352_v20 = vmul.f32 %v2336_v56, %v6895_v26  ;;  %v2317_v40 = vmul.f32 0.044715, %v6929_v21  ;;  %v2239_v55 = vmul.f32 %v6865_v47, %v2191_v25  ;;  %v6958_v60 = vadd.f32 %v6822_v35, %v2244_v36  ;;  %3265 = vperm.xlu1 %4893, %v6947_v44  }
 0x3de   : > { %v2323_v38 = vmul.f32 0.044715, %v6935_v3  ;;  %v2318_v37 = vmul.f32 0.044715, %v6942_v61  ;;  %v2249_v23 = vmul.f32 %v6830_v32, %v2201_v29  ;;  %v2199_v56 = vmul.f32 %v5094_v39, %v6777_v63 }
 0x3df   : > { %v2362_v47 = vadd.f32 %v2346_v41, %v6891_v33  ;;  %v2354_v36 = vmul.f32 %v2338_v31, %v6909_v6  ;;  %v2245_v25 = vmul.f32 %v2224_v28, %v2197_v48  ;;  %v6970_v24 = vadd.f32 %v6841_v51, %v2248_v19 }
 0x3e0   : > { %v2331_v57 = vmul.f32 %v2315_v4, %v6919_v42  ;;  %v2348_v2 = vmul.f32 %v2332_v14, %v6900_v22  ;;  %v2247_v0 = vmul.f32 %v2228_v30, %v2199_v56  ;;  %v6976_v32 = vadd.f32 %v2276_v54, %v2246_v49  ;;  %4897 = vset.pattern.permute.xlu0 %v8647_v62 }
 0x3e1   : > { %v2337_v63 = vmul.f32 %v2321_v46, %v6922_v1  ;;  %v2368_v39 = vadd.f32 %v2352_v20, %v6895_v26  ;;  %v6981_v29 = vadd.f32 %v6843_v9, %v2239_v55  ;;  %v2324_v28 = vmul.f32 0.044715, %v6958_v60  ;;  %4894 = vset.pattern.permute.xlu1 %v8648_v15  ;;  %3240 = vperm.xlu0 %4897, %v6817_v43  }
 0x3e2   : > { %v6986_v19 = vmul.f32 %v2323_v38, %v6935_v3  ;;  %v2334_v41 = vmul.f32 %v2318_v37, %v6942_v61  ;;  %v6990_v30 = vadd.f32 %v6841_v51, %v2249_v23  ;;  %v2326_v49 = vmul.f32 0.044715, %v6976_v32  ;;  %3387 = vperm.xlu1 %4894, %v6835_v52   ;;  %v7009_v37 = vpop.permute.xlu1 %2770 }
 0x3e3   : > { %v2378_v9 = vmul.f32 0.7978846, %v2362_v47  ;;  %v2370_v31 = vadd.f32 %v2354_v36, %v6909_v6  ;;  %v6997_v4 = vadd.f32 %v6822_v35, %v2245_v25  ;;  %v2328_v46 = vmul.f32 0.044715, %v6970_v24 }
 0x3e4   : > { %v7001_v14 = vadd.f32 %v2276_v54, %v2247_v0  ;;  %v2342_v51 = vmul.f32 %v2326_v49, %v6976_v32  ;;  %v2333_v48 = vmul.f32 %v2317_v40, %v6929_v21  ;;  %v2347_v20 = vmul.f32 %v2331_v57, %v6919_v42 }
 0x3e5   : > { %v2384_v55 = vmul.f32 0.7978846, %v2368_v39  ;;  %v2319_v43 = vmul.f32 0.044715, %v6981_v29  ;;  %v2340_v38 = vmul.f32 %v2324_v28, %v6958_v60  ;;  %v2364_v35 = vadd.f32 %v2348_v2, %v6900_v22  ;;  %3250 = vperm.xlu0 %4897, %v6870_v45   ;;  %v7022_v2 = vld [vmem:[%s8517_s8 + $0x70] sm:$0xff] }
 0x3e6   : > { %v2350_v23 = vmul.f32 %v2334_v41, %v6942_v61  ;;  %v2329_v0 = vmul.f32 0.044715, %v6990_v30  ;;  %v2349_v54 = vmul.f32 %v2333_v48, %v6929_v21  ;;  %v2363_v56 = vadd.f32 %v2347_v20, %v6919_v42  ;;  %4895 = vset.pattern.permute.xlu1 %v8649_v11 }
 0x3e7   : > { %v2325_v57 = vmul.f32 0.044715, %v6997_v4  ;;  %v2344_v40 = vmul.f32 %v2328_v46, %v6970_v24  ;;  %v2380_v47 = vmul.f32 0.7978846, %v2364_v35  ;;  %5095 = vtanh.f32 %v2378_v9  ;;  %3447 = vperm.xlu1 %4895, %v6870_v45  }
 0x3e8   : > { %v2327_v36 = vmul.f32 0.044715, %v7001_v14  ;;  %v2358_v25 = vmul.f32 %v2342_v51, %v6976_v32  ;;  %v2365_v39 = vadd.f32 %v2349_v54, %v6929_v21  ;;  %v2379_v28 = vmul.f32 0.7978846, %v2363_v56  ;;  %v7037_v56 = vpop.permute.xlu1 %2657 }
 0x3e9   : > { %v2386_v41 = vmul.f32 0.7978846, %v2370_v31  ;;  %5097 = vtanh.f32 %v2380_v47  ;;  %v2335_v49 = vmul.f32 %v2319_v43, %v6981_v29  ;;  %v2353_v9 = vmul.f32 %v2337_v63, %v6922_v1  ;;  %3270 = vperm.xlu0 %4897, %v7022_v2   ;;  %v7042_v63 = vld [vmem:[%s8517_s8 + $0x78] sm:$0xff] }
 0x3ea   : > { %v2356_v46 = vmul.f32 %v2340_v38, %v6958_v60  ;;  %v2345_v48 = vmul.f32 %v2329_v0, %v6990_v30  ;;  %v2381_v20 = vmul.f32 0.7978846, %v2365_v39  ;;  %5099 = vtanh.f32 %v2379_v28 }
 0x3eb   : > { %v2360_v51 = vmul.f32 %v2344_v40, %v6970_v24  ;;  %v2351_v35 = vmul.f32 %v2335_v49, %v6981_v29  ;;  %v2369_v54 = vadd.f32 %v2353_v9, %v6922_v1  ;;  %v2366_v31 = vadd.f32 %v2350_v23, %v6942_v61  ;;  %4898 = vset.pattern.permute.xlu1 %v8650_v13 }
 0x3ec   : > { %v2343_v43 = vmul.f32 %v2327_v36, %v7001_v14  ;;  %v2374_v38 = vadd.f32 %v2358_v25, %v6976_v32  ;;  %5101 = vtanh.f32 %v2381_v20  ;;  %v2341_v0 = vmul.f32 %v2325_v57, %v6997_v4  ;;  %3507 = vperm.xlu1 %4898, %v6782_v50  }
 0x3ed   : > { %v2367_v40 = vadd.f32 %v2351_v35, %v6981_v29  ;;  %v2385_v47 = vmul.f32 0.7978846, %v2369_v54  ;;  %v2382_v23 = vmul.f32 0.7978846, %v2366_v31  ;;  %5103 = vtanh.f32 %v2384_v55  ;;  %3275 = vperm.xlu0 %4897, %v7042_v63   ;;  %v7062_v31 = vpop.permute.xlu1 %2710 }
 0x3ee   : > { %v2299_v39 = vmul.f32 0.5, %v6919_v42  ;;  %v2298_v28 = vmul.f32 0.5, %v6891_v33  ;;  %v2355_v36 = vmul.f32 %v6986_v19, %v6935_v3  ;;  %v2357_v25 = vmul.f32 %v2341_v0, %v6997_v4 }
 0x3ef   : > { %v2376_v57 = vadd.f32 %v2360_v51, %v6970_v24  ;;  %v2383_v49 = vmul.f32 0.7978846, %v2367_v40  ;;  %5105 = vtanh.f32 %v2385_v47  ;;  %v2372_v9 = vadd.f32 %v2356_v46, %v6958_v60 }
 0x3f0   : > { %v2390_v55 = vmul.f32 0.7978846, %v2374_v38  ;;  %5107 = vtanh.f32 %v2382_v23  ;;  %v2371_v20 = vadd.f32 %v2355_v36, %v6935_v3  ;;  %v2373_v42 = vadd.f32 %v2357_v25, %v6997_v4  ;;  %4899 = vset.pattern.permute.xlu1 %v8639_v16 }
 0x3f1   : > { %v5096_v33 = vpop.eup %5095  ;;  %5109 = vtanh.f32 %v2383_v49  ;;  %v2388_v35 = vmul.f32 0.7978846, %v2372_v9  ;;  %v2359_v19 = vmul.f32 %v2343_v43, %v7001_v14  ;;  %v2361_v54 = vmul.f32 %v2345_v48, %v6990_v30  ;;  %3126 = vperm.xlu1 %4899, %v6629_v18   ;;  %4903 = vset.pattern.permute.xlu0 %v8649_v11 }
 0x3f2   : > { %v2410_v51 = vadd.f32 1.0, %v5096_v33  ;;  %v2387_v0 = vmul.f32 0.7978846, %v2371_v20  ;;  %v2389_v46 = vmul.f32 0.7978846, %v2373_v42  ;;  %5111 = vtanh.f32 %v2386_v41  ;;  %3443 = vperm.xlu0 %4903, %v6782_v50  }
 0x3f3   : > { %v5098_v38 = vpop.eup %5097  ;;  %v2300_v40 = vmul.f32 0.5, %v6900_v22  ;;  %5113 = vtanh.f32 %v2388_v35  ;;  %v2375_v43 = vadd.f32 %v2359_v19, %v7001_v14  ;;  %v2377_v48 = vadd.f32 %v2361_v54, %v6990_v30 }
 0x3f4   : > { %v5100_v47 = vpop.eup %5099  ;;  %v2392_v23 = vmul.f32 0.7978846, %v2376_v57  ;;  %v2412_v36 = vadd.f32 1.0, %v5098_v38  ;;  %v2426_v25 = vmul.f32 %v2410_v51, %v2298_v28  ;;  %5115 = vtanh.f32 %v2387_v0  ;;  %v7075_v28 = vpop.permute.xlu1 %2714 }
 0x3f5   : > { %v2411_v41 = vadd.f32 1.0, %v5100_v47  ;;  %5117 = vtanh.f32 %v2389_v46  ;;  %v2391_v18 = vmul.f32 0.7978846, %v2375_v43  ;;  %v2393_v49 = vmul.f32 0.7978846, %v2377_v48  ;;  %3331 = vperm.xlu1 %4899, %v6947_v44  }
 0x3f6   : > { %v5102_v9 = vpop.eup %5101  ;;  %v2301_v20 = vmul.f32 0.5, %v6929_v21  ;;  %v2428_v22 = vmul.f32 %v2412_v36, %v2300_v40  ;;  %v2442_v42 = vadd.f32 %v2426_v25, %v6466_v8  ;;  %5119 = vtanh.f32 %v2390_v55  ;;  %3451 = vperm.xlu0 %4903, %v6835_v52  }
 0x3f7   : > { %v5104_v33 = vpop.eup %5103  ;;  %v2413_v35 = vadd.f32 1.0, %v5102_v9  ;;  %v2427_v19 = vmul.f32 %v2411_v41, %v2299_v39  ;;  %v2303_v57 = vmul.f32 0.5, %v6981_v29  ;;  %5121 = vtanh.f32 %v2391_v18 }
 0x3f8   : > { %v2444_v54 = vadd.f32 %v2428_v22, %v6472_v7  ;;  %v2304_v21 = vmul.f32 0.5, %v6895_v26  ;;  %v2416_v51 = vadd.f32 1.0, %v5104_v33  ;;  %5123 = vtanh.f32 %v2393_v49 }
 0x3f9   : > { %v5106_v8 = vpop.eup %5105  ;;  %v2429_v55 = vmul.f32 %v2413_v35, %v2301_v20  ;;  %v2443_v0 = vadd.f32 %v2427_v19, %v6460_v17  ;;  %v2305_v46 = vmul.f32 0.5, %v6922_v1  ;;  %5125 = vtanh.f32 %v2392_v23  ;;  %4900 = vset.pattern.permute.xlu1 %v8648_v15 }
 0x3fa   : > { %v5108_v39 = vpop.eup %5107  ;;  %v2459_v29 = vpack.c.bf16 %v2444_v54, %v2442_v42  ;;  %v2417_v38 = vadd.f32 1.0, %v5106_v8  ;;  %v2302_v40 = vmul.f32 0.5, %v6942_v61  ;;  %v2432_v43 = vmul.f32 %v2416_v51, %v2304_v21  ;;  %3391 = vperm.xlu1 %4900, %v6859_v59   ;;  %3455 = vperm.xlu0 %4903, %v6859_v59  }
 0x3fb   : > { %v5110_v7 = vpop.eup %5109  ;;  %v2445_v26 = vadd.f32 %v2429_v55, %v6464_v27  ;;  %v2414_v48 = vadd.f32 1.0, %v5108_v39  ;;  %v2307_v47 = vmul.f32 0.5, %v6935_v3  ;;  %v2309_v36 = vmul.f32 0.5, %v6997_v4  ;;  %v7092_v3 = vpop.permute.xlu1 %2834 }
 0x3fc   : > { %v5112_v17 = vpop.eup %5111  ;;  %v2415_v1 = vadd.f32 1.0, %v5110_v7  ;;  %v2433_v23 = vmul.f32 %v2417_v38, %v2305_v46  ;;  %v2306_v61 = vmul.f32 0.5, %v6909_v6  ;;  %v2308_v25 = vmul.f32 0.5, %v6958_v60 }
 0x3fd   : > { %v5114_v41 = vpop.eup %5113  ;;  %v2460_v18 = vpack.c.bf16 %v2445_v26, %v2443_v0  ;;  %v2430_v49 = vmul.f32 %v2414_v48, %v2302_v40  ;;  %v2448_v27 = vadd.f32 %v2432_v43, %v6486_v5  ;;  %v2418_v9 = vadd.f32 1.0, %v5112_v17 }
 0x3fe   : > { %v5116_v4 = vpop.eup %5115  ;;  %v2431_v20 = vmul.f32 %v2415_v1, %v2303_v57  ;;  %v2449_v22 = vadd.f32 %v2433_v23, %v6479_v12  ;;  %v2420_v42 = vadd.f32 1.0, %v5114_v41  ;;  %v2311_v33 = vmul.f32 0.5, %v7001_v14  ;;  %4901 = vset.pattern.permute.xlu1 %v8650_v13  ;;  %4905 = vset.pattern.permute.xlu0 %v8648_v15 }
 0x3ff   : > { %v5118_v35 = vpop.eup %5117  ;;  %2474 = vmatprep.subr.bf16.mxu0 %v2460_v18  ;;  %v2446_v6 = vadd.f32 %v2430_v49, %v6482_v10  ;;  %v2419_v60 = vadd.f32 1.0, %v5116_v4  ;;  %v2434_v19 = vmul.f32 %v2418_v9, %v2306_v61  ;;  %v2313_v54 = vmul.f32 0.5, %v6990_v30  ;;  %3511 = vperm.xlu1 %4901, %v6870_v45   ;;  %v7108_v48 = vpop.permute.xlu1 %2611  ;;  %v8667_v4 = vld [vmem:[#allocation33_spill] sm:$0xff] }
 0x400   : > { %v5120_v5 = vpop.eup %5119  ;;  %2475 = vmatpush1.bf16.msra.mxu0 %v2459_v29  ;;  %v2447_v21 = vadd.f32 %v2431_v20, %v6474_v58  ;;  %v2421_v57 = vadd.f32 1.0, %v5118_v35  ;;  %v2436_v51 = vmul.f32 %v2420_v42, %v2308_v25  ;;  %v2310_v12 = vmul.f32 0.5, %v6976_v32  ;;  %v8660_v29 = vld [vmem:[#allocation29_spill] sm:$0xff]  ;;  %3379 = vperm.xlu0 %4905, %v6782_v50   ;;  %v8661_v32 = vld [vmem:[#allocation27_spill] sm:$0xff]  ;;  %v8664_v25 = vld [vmem:[#allocation30_spill] sm:$0xff] }
 0x401   : > { %v5122_v14 = vpop.eup %5121  ;;  %v2461_v8 = vpack.c.bf16 %v2448_v27, %v2446_v6  ;;  %v2435_v55 = vmul.f32 %v2419_v60, %v2307_v47  ;;  %v2450_v10 = vadd.f32 %v2434_v19, %v6500_v53  ;;  %v2422_v0 = vadd.f32 1.0, %v5120_v5  ;;  %v8662_v53 = vld [vmem:[#allocation28_spill] sm:$0xff]  ;;  %v8663_v50 = vld [vmem:[#allocation37_spill] sm:$0xff]  ;;  %v8666_v27 = vld [vmem:[#allocation31_spill] sm:$0xff] }
 0x402   : > { %v5124_v30 = vpop.eup %5123  ;;  %v2462_v46 = vpack.c.bf16 %v2449_v22, %v2447_v21  ;;  %v2437_v39 = vmul.f32 %v2421_v57, %v2309_v36  ;;  %v2452_v38 = vadd.f32 %v2436_v51, %v8660_v29  ;;  %v2423_v58 = vadd.f32 1.0, %v5122_v14  ;;  %v2458_v35 = vld [vmem:[%s8514_s5] sm:$0x1]  ;;  %v7144_v19 = vld [vmem:[%s8519_s10 + $0x10] sm:$0xff]  ;;  %v7223_v29 = vpop.permute.xlu0 %2706 }
 0x403   : > { %v5126_v40 = vpop.eup %5125  ;;  %v2451_v43 = vadd.f32 %v2435_v55, %v8661_v32  ;;  %v2425_v45 = vadd.f32 1.0, %v5124_v30  ;;  %v2312_v7 = vmul.f32 0.5, %v6970_v24  ;;  %v2438_v26 = vmul.f32 %v2422_v0, %v2310_v12  ;;  %4902 = vset.pattern.permute.xlu1 %v8639_v16  ;;  %v8665_v24 = vld [vmem:[#allocation32_spill] sm:$0xff]  ;;  %v7118_v42 = vpop.permute.xlu1 %2774  ;;  %v7187_v51 = vld [vmem:[%s8519_s10 + $0x20] sm:$0xff] }
 0x404   : > { %2476 = vmatprep.subr.bf16.mxu0 %v2462_v46  ;;  %v2453_v47 = vadd.f32 %v2437_v39, %v8662_v53  ;;  %v2463_v17 = vpack.c.bf16 %v2452_v38, %v2450_v10  ;;  %v2439_v1 = vmul.f32 %v2423_v58, %v2311_v33  ;;  %v2424_v36 = vadd.f32 1.0, %v5126_v40  ;;  %3130 = vperm.xlu1 %4902, %v8663_v50   ;;  %v8670_v5 = vld [vmem:[#allocation36_spill] sm:$0xff]  ;;  %v5302_v53 = vld [vmem:[%s8519_s10 + $0x28] sm:$0xff] }
 0x405   : > { %2477 = vmatpush1.bf16.msra.mxu0 %v2461_v8  ;;  %v2441_v23 = vmul.f32 %v2425_v45, %v2313_v54  ;;  %v2454_v49 = vadd.f32 %v2438_v26, %v8665_v24  ;;  %3399 = vperm.xlu0 %4905, %v7022_v2   ;;  %v8672_v14 = vmov 5   ;;  %v8673_v8 = vld [vmem:[#allocation35_spill] sm:$0xff]  ;;  %v8675_v10 = vmov 6   ;;  %v8689_v24 = vld [vmem:[#allocation38_spill] sm:$0xff] }
 0x406   : > { %v2464_v61 = vpack.c.bf16 %v2453_v47, %v2451_v43  ;;  %v2455_v41 = vadd.f32 %v2439_v1, %v8664_v25  ;;  %v2440_v18 = vmul.f32 %v2424_v36, %v2312_v7  ;;  %v8676_v39 = vmov 7  }
 0x407   : > { %v2457_v9 = vadd.f32 %v2441_v23, %v8666_v27  ;;  %v7128_v6 = vpop.permute.xlu1 %2778  ;;  %v5303_v23 = vld [vmem:[%s8519_s10 + $0x38] sm:$0xff] }
 0x408   : > { %2478 = vmatprep.subr.bf16.mxu0 %v2464_v61  ;;  %v2456_v20 = vadd.f32 %v2440_v18, %v8667_v4  ;;  %3335 = vperm.xlu1 %4902, %v7022_v2   ;;  %v7282_v61 = vpop.permute.xlu0 %2902 }
 0x409   : > { %2479 = vmatpush1.bf16.msra.mxu0 %v2463_v17  ;;  %v2466_v22 = vpack.c.bf16 %v2457_v9, %v2455_v41  ;;  %3403 = vperm.xlu0 %4905, %v7042_v63   ;;  %8687 = vst [vmem:[#allocation45_spill] sm:$0xff] %v7282_v61 }
 0x40a   : > { %v2465_v33 = vpack.c.bf16 %v2456_v20, %v2454_v49 }
 0x40b   : > { %2480 = vmatprep.subr.bf16.mxu0 %v2466_v22  ;;  %v7136_v60 = vpop.permute.xlu1 %2906 }
 0x40c   : > { %4904 = vset.pattern.permute.xlu1 %v8648_v15  ;;  %8668 = vst [vmem:[#allocation29_spill] sm:$0xff] %v7136_v60  ;;  %v7284_v25 = vpop.permute.xlu0 %2910 }
 0x40d   : > { %2481 = vmatpush1.bf16.msra.mxu0 %v2465_v33  ;;  %3395 = vperm.xlu1 %4904, %v6947_v44   ;;  %8688 = vst [vmem:[#allocation46_spill] sm:$0xff] %v7284_v25 }
 0x40e   : > { %4911 = vset.pattern.permute.xlu0 %v8650_v13 }
 0x40f   : > { %3523 = vperm.xlu0 %4911, %v6947_v44   ;;  %v7147_v54 = vpop.permute.xlu1 %2667 }
 0x410   : > { %4699 = vmatmul.mubr.msk.bf16.vlgmr.msra.gmra.mrb[16].mxu0 %vm1305_vm5, %v2458_v35  ;;  %v2592_v18 = vpop.permute.xlu0 %2591 }
 0x411   : > { %4027 = vmatprep.mubr.bf16.mxu0 %v8647_v62  ;;  %4906 = vset.pattern.permute.xlu1 %v8650_v13 }
 0x412   : > { %3515 = vperm.xlu1 %4906, %v6835_v52  }
 0x413   : > { %3531 = vperm.xlu0 %4911, %v7042_v63   ;;  %v7153_v52 = vpop.permute.xlu1 %2718 }
 0x414   : > { %v7288_v33 = vpop.permute.xlu0 %2652 }
 0x416   : > { %4907 = vset.pattern.permute.xlu1 %v8639_v16  ;;  %v8669_v16 = vld [vmem:[#allocation34_spill] sm:$0xff] }
 0x417   : > { %4916 = vset.pattern.permute.xlu0 %v8649_v11  ;;  %3339 = vperm.xlu1 %4907, %v7042_v63   ;;  %v7160_v21 = vpop.permute.xlu1 %2722 }
 0x418   : > { %3731 = vperm.xlu0 %4916, %v7144_v19   ;;  %v7290_v35 = vpop.permute.xlu0 %2662 }
 0x41b   : > { %4908 = vset.pattern.permute.xlu1 %v8649_v11 }
 0x41c   : > { %4917 = vset.pattern.permute.xlu0 %v8648_v15  ;;  %3459 = vperm.xlu1 %4908, %v6947_v44   ;;  %v7166_v44 = vld [vmem:[%s8519_s10 + $0x30] sm:$0xff] }
 0x41d   : > { %3679 = vperm.xlu0 %4917, %v8669_v16  }
 0x420   : > { %4909 = vset.pattern.permute.xlu1 %v8650_v13 }
 0x421   : > { %3519 = vperm.xlu1 %4909, %v6859_v59   ;;  %3683 = vperm.xlu0 %4917, %v7144_v19   ;;  %v7170_v59 = vpop.permute.xlu1 %2842 }
 0x422   : > { %8671 = vst [vmem:[#allocation27_spill] sm:$0xff] %v7170_v59 }
 0x425   : > { %4910 = vset.pattern.permute.xlu1 %v8649_v11  ;;  %3695 = vperm.xlu0 %4917, %v8670_v5   ;;  %v7176_v57 = vpop.permute.xlu1 %2621 }
 0x426   : > { %3463 = vperm.xlu1 %4910, %v7022_v2  }
 0x429   : > { %3699 = vperm.xlu0 %4917, %v7166_v44  }
 0x42a   : > { %3467 = vperm.xlu1 %4910, %v7042_v63   ;;  %v5298_v63 = vld [vmem:[%s8519_s10] sm:$0xff] }
 0x42d   : > { %4922 = vset.pattern.permute.xlu0 %v8649_v11 }
 0x42e   : > { %4912 = vset.pattern.permute.xlu1 %v8650_v13  ;;  %3747 = vperm.xlu0 %4922, %v7166_v44  }
 0x42f   : > { %3527 = vperm.xlu1 %4912, %v7022_v2   ;;  %v7190_v2 = vpop.permute.xlu1 %2782 }
 0x432   : > { %4925 = vset.pattern.permute.xlu0 %v8650_v13 }
 0x433   : > { %4913 = vset.pattern.permute.xlu1 %v8648_v15  ;;  %3936 = vperm.xlu0 %4925, %v8669_v16   ;;  %v7195_v12 = vpop.permute.xlu1 %2786 }
 0x434   : > { %3675 = vperm.xlu1 %4913, %v5298_v63  }
 0x437   : > { %3948 = vperm.xlu0 %4925, %v7187_v51   ;;  %v7200_v55 = vpop.permute.xlu1 %2914 }
 0x438   : > { %4914 = vset.pattern.permute.xlu1 %v8649_v11  ;;  %8674 = vst [vmem:[#allocation28_spill] sm:$0xff] %v7200_v55 }
 0x439   : > { %3723 = vperm.xlu1 %4914, %v5298_v63  }
 0x43b   : > { %3956 = vperm.xlu0 %4925, %v7166_v44   ;;  %v7207_v0 = vpop.permute.xlu1 %2677 }
 0x43d   : > { %3727 = vperm.xlu1 %4914, %v8669_v16  }
 0x43f   : > { %4926 = vset.pattern.permute.xlu0 %v8672_v14  ;;  %v7212_v30 = vpop.permute.xlu1 %2726 }
 0x440   : > { %4177 = vperm.xlu0 %4926, %v5298_v63  }
 0x441   : > { %4915 = vset.pattern.permute.xlu1 %v8648_v15 }
 0x442   : > { %3687 = vperm.xlu1 %4915, %v8673_v8  }
 0x443   : > { %v7219_v46 = vpop.permute.xlu1 %2730 }
 0x444   : > { %4193 = vperm.xlu0 %4926, %v7187_v51  }
 0x446   : > { %4918 = vset.pattern.permute.xlu1 %v8649_v11 }
 0x447   : > { %3735 = vperm.xlu1 %4918, %v8673_v8   ;;  %v7226_v38 = vpop.permute.xlu1 %2850 }
 0x448   : > { %4931 = vset.pattern.permute.xlu0 %v8675_v10  ;;  %8677 = vst [vmem:[#allocation37_spill] sm:$0xff] %v7226_v38 }
 0x449   : > { %4229 = vperm.xlu0 %4931, %v8669_v16  }
 0x44b   : > { %4919 = vset.pattern.permute.xlu1 %v8648_v15  ;;  %v7230_v58 = vpop.permute.xlu1 %2790 }
 0x44c   : > { %3691 = vperm.xlu1 %4919, %v7187_v51  }
 0x44d   : > { %4233 = vperm.xlu0 %4931, %v7144_v19  }
 0x44f   : > { %v7233_v40 = vpop.permute.xlu1 %2918 }
 0x450   : > { %4920 = vset.pattern.permute.xlu1 %v8649_v11  ;;  %8678 = vst [vmem:[#allocation30_spill] sm:$0xff] %v7233_v40 }
 0x451   : > { %3739 = vperm.xlu1 %4920, %v7187_v51   ;;  %4245 = vperm.xlu0 %4931, %v8670_v5  }
 0x453   : > { %v7239_v32 = vpop.permute.xlu1 %2922 }
 0x454   : > { %8679 = vst [vmem:[#allocation32_spill] sm:$0xff] %v7239_v32 }
 0x455   : > { %3743 = vperm.xlu1 %4920, %v8670_v5   ;;  %4249 = vperm.xlu0 %4931, %v7166_v44  }
 0x459   : > { %4921 = vset.pattern.permute.xlu1 %v8648_v15  ;;  %4936 = vset.pattern.permute.xlu0 %v8676_v39  ;;  %v5300_v15 = vld [vmem:[%s8519_s10 + $0x18] sm:$0xff] }
 0x45a   : > { %3703 = vperm.xlu1 %4921, %v8663_v50   ;;  %4442 = vperm.xlu0 %4936, %v5298_v63  }
 0x45e   : > { %4923 = vset.pattern.permute.xlu1 %v8649_v11  ;;  %v7242_v11 = vpop.permute.xlu1 %2858 }
 0x45f   : > { %3751 = vperm.xlu1 %4923, %v8663_v50  }
 0x462   : > { %v7249_v43 = vpop.permute.xlu1 %2926 }
 0x463   : > { %4924 = vset.pattern.permute.xlu1 %v8650_v13  ;;  %v5301_v13 = vld [vmem:[%s8519_s10 + $0x8] sm:$0xff] }
 0x464   : > { %3932 = vperm.xlu1 %4924, %v5298_v63  }
 0x466   : > { %v7252_v45 = vpop.permute.xlu1 %3102 }
 0x467   : > { %8680 = vst [vmem:[#allocation31_spill] sm:$0xff] %v7252_v45 }
 0x468   : > { %3940 = vperm.xlu1 %4924, %v7144_v19  }
 0x46a   : > { %v7256_v7 = vpop.permute.xlu1 %3106 }
 0x46b   : > { %8681 = vst [vmem:[#allocation33_spill] sm:$0xff] %v7256_v7 }
 0x46c   : > { %3944 = vperm.xlu1 %4924, %v5300_v15  }
 0x46e   : > { %v7259_v26 = vpop.permute.xlu1 %3245 }
 0x46f   : > { %8682 = vst [vmem:[#allocation34_spill] sm:$0xff] %v7259_v26 }
 0x470   : > { %3952 = vperm.xlu1 %4924, %v8670_v5  }
 0x472   : > { %v7265_v47 = vpop.permute.xlu1 %3110 }
 0x473   : > { %8683 = vst [vmem:[#allocation36_spill] sm:$0xff] %v7265_v47 }
 0x474   : > { %3960 = vperm.xlu1 %4924, %v8663_v50  }
 0x476   : > { %v7269_v17 = vpop.permute.xlu1 %3311 }
 0x477   : > { %8684 = vst [vmem:[#allocation35_spill] sm:$0xff] %v7269_v17 }
 0x478   : > { %4927 = vset.pattern.permute.xlu1 %v8672_v14 }
 0x479   : > { %4181 = vperm.xlu1 %4927, %v5301_v13  }
 0x47a   : > { %v7273_v1 = vpop.permute.xlu1 %3114 }
 0x47b   : > { %8685 = vst [vmem:[#allocation43_spill] sm:$0xff] %v7273_v1  ;;  %v8693_v1 = vld [vmem:[#allocation7_spill] sm:$0xff] }
 0x47c   : > { %v2630_v7 = vmul.f32 %v2592_v18, %v8693_v1 }
 0x47d   : > { %4928 = vset.pattern.permute.xlu1 %v8675_v10 }
 0x47e   : > { %4225 = vperm.xlu1 %4928, %v5298_v63   ;;  %v7277_v36 = vpop.permute.xlu1 %3255  ;;  %v7292_v63 = vpop.permute.xlu0 %2616 }
 0x47f   : > { %8686 = vst [vmem:[#allocation44_spill] sm:$0xff] %v7277_v36 }
 0x482   : > { %4929 = vset.pattern.permute.xlu1 %v8672_v14 }
 0x483   : > { %4185 = vperm.xlu1 %4929, %v7144_v19  }
 0x487   : > { %4189 = vperm.xlu1 %4929, %v5300_v15  }
 0x48b   : > { %4930 = vset.pattern.permute.xlu1 %v8675_v10 }
 0x48c   : > { %4237 = vperm.xlu1 %4930, %v5300_v15  }
 0x490   : > { %4932 = vset.pattern.permute.xlu1 %v8672_v14 }
 0x491   : > { %4197 = vperm.xlu1 %4932, %v5302_v53  }
 0x495   : > { %4933 = vset.pattern.permute.xlu1 %v8675_v10 }
 0x496   : > { %4241 = vperm.xlu1 %4933, %v7187_v51   ;;  %v8690_v51 = vld [vmem:[#allocation2_spill] sm:$0xff] }
 0x497   : > { %4503 = vst [vmem:[%s7298_s29] sm:$0x7] %v8690_v51 }
 0x49a   : > { %4934 = vset.pattern.permute.xlu1 %v8672_v14  ;;  %v7302_v14 = vpop.permute.xlu0 %2672 }
 0x49b   : > { %4201 = vperm.xlu1 %4934, %v7166_v44  }
 0x49e   : > { %v7312_v13 = vpop.permute.xlu0 %2626 }
 0x49f   : > { %4205 = vperm.xlu1 %4934, %v8663_v50  }
 0x4a3   : > { %4935 = vset.pattern.permute.xlu1 %v8675_v10 }
 0x4a4   : > { %4253 = vperm.xlu1 %4935, %v5303_v23  }
 0x4e3   : > { %v2508_v41 = vpop.f32.mrb[16].mxu0 }
 0x4e4   : > { %v2509_v49 = vadd.f32 %v2508_v41, %v8689_v24  ;;  %v2510_v27 = vpop.f32.mrb[17].mxu0 }
 0x4e5   : > { %v2511_v50 = vadd.f32 %v2510_v27, %v8689_v24  ;;  %v2512_v9 = vpop.f32.mrb[18].mxu0 }
 0x4e6   : > { %v4700_v4 = vmul.f32 -1.442695, %v2509_v49  ;;  %v2513_v20 = vpop.f32.mrb[19].mxu0  ;;  %v7314_v9 = vpop.permute.xlu0 %2682 }
 0x4e7   : > { %v4701_v22 = vmul.f32 -1.442695, %v2511_v50 }
 0x4e8   : > { %5127 = vpow2.f32 %v4700_v4 }
 0x4e9   : > { %5129 = vpow2.f32 %v4701_v22 }
 0x4f2   : > { %v5128_v19 = vpop.eup %5127 }
 0x4f3   : > { %v5130_v16 = vpop.eup %5129  ;;  %v2521_v5 = vadd.f32 1.0, %v5128_v19 }
 0x4f4   : > { %v2522_v44 = vadd.f32 1.0, %v5130_v16 }
 0x4f5   : > { %5131 = vrcp.f32 %v2521_v5 }
 0x4f6   : > { %5133 = vrcp.f32 %v2522_v44  ;;  %v7316_v44 = vpop.permute.xlu0 %2766 }
 0x4ff   : > { %v7304_v8 = vpop.eup %5131 }
 0x500   : > { %v7306_v10 = vpop.eup %5133  ;;  %v2527_v39 = vmul.f32 %v7304_v8, %v7304_v8 }
 0x501   : > { %v2528_v15 = vmul.f32 %v7306_v10, %v7306_v10 }
 0x502   : > { %v2530_v53 = vsel %vm2529_vm6, %v2527_v39, 0.0  ;;  %v7318_v39 = vpop.permute.xlu0 %2794 }
 0x503   : > { %v2531_v23 = vrot.slane %v2530_v53, 4  ;;  %v2537_v41 = vsel %vm2529_vm6, %v2528_v15, 0.0 }
 0x504   : > { %v2538_v24 = vrot.slane %v2537_v41, 4 }
 0x505   : > { %v2532_v49 = vadd.f32 %v2531_v23, %v2530_v53  ;;  %v8691_v23 = vld [vmem:[#allocation5_spill] sm:$0xff] }
 0x506   : > { %v2539_v27 = vadd.f32 %v2538_v24, %v2537_v41  ;;  %v7320_v15 = vpop.permute.xlu0 %2830  ;;  %v8692_v41 = vld [vmem:[#allocation39_spill] sm:$0xff]  ;;  %v2629_v47 = vmul.f32 %v2592_v18, %v8691_v23 }
 0x507   : > { %v2533_v50 = vrot.slane %v2532_v49, 2  ;;  %v7324_v24 = vmul.f32 %v8692_v41, %v8691_v23 }
 0x508   : > { %v2540_v4 = vrot.slane %v2539_v27, 2 }
 0x509   : > { %v2534_v20 = vadd.f32 %v2533_v50, %v2532_v49  ;;  %v7328_v49 = vmul.f32 %v8692_v41, %v8693_v1  ;;  %v8697_v41 = vld [vmem:[#allocation42_spill] sm:$0xff] }
 0x50a   : > { %v2541_v22 = vadd.f32 %v2540_v4, %v2539_v27  ;;  %v8694_v27 = vld [vmem:[#allocation6_spill] sm:$0xff]  ;;  %v8695_v4 = vld [vmem:[#allocation8_spill] sm:$0xff]  ;;  %v2633_v36 = vmul.f32 %v8697_v41, %v8691_v23  ;;  %v2634_v32 = vmul.f32 %v8697_v41, %v8693_v1  ;;  %v7349_v25 = vpop.permute.xlu0 %2838 }
 0x50b   : > { %v2535_v19 = vrot.slane %v2534_v20, 1  ;;  %v7332_v50 = vmul.f32 %v7223_v29, %v8694_v27  ;;  %8699 = vst [vmem:[#allocation38_spill] sm:$0xff] %v7349_v25  ;;  %v8704_v25 = vld [vmem:[#allocation4_spill] sm:$0xff] }
 0x50c   : > { %v2542_v16 = vrot.slane %v2541_v22, 1 }
 0x50d   : > { %v2536_v5 = vadd.f32 %v2535_v19, %v2534_v20  ;;  %v7336_v20 = vmul.f32 %v7223_v29, %v8695_v4  ;;  %v8696_v19 = vld [vmem:[#allocation41_spill] sm:$0xff] }
 0x50e   : > { %v2543_v51 = vadd.f32 %v2542_v16, %v2541_v22  ;;  %v2733_v16 = vmul.f32 %v8696_v19, %v8694_v27  ;;  %v2734_v18 = vmul.f32 %v8696_v19, %v8695_v4 }
 0x50f   : > { %5135 = vrsqrt.f32 %v2536_v5  ;;  %vm2546_vm7 = vcmp.eq.f32.partialorder %v2536_v5, inf  ;;  %v2549_v17 = vand.u32 2147483648, %v2536_v5  ;;  %vm2548_vm8 = vcmp.eq.f32.partialorder %v2536_v5, 0.0 }
 0x510   : > { %5137 = vrsqrt.f32 %v2543_v51  ;;  %vm2553_vm9 = vcmp.eq.f32.partialorder %v2543_v51, inf  ;;  %v2556_v29 = vand.u32 2147483648, %v2543_v51  ;;  %vm2555_vm10 = vcmp.eq.f32.partialorder %v2543_v51, 0.0 }
 0x519   : > { %v5136_v53 = vpop.eup %5135 }
 0x51a   : > { %v5138_v22 = vpop.eup %5137  ;;  %v2545_v45 = vmul.f32 %v5136_v53, %v2536_v5  ;;  %v8698_v53 = vld [vmem:[#allocation40_spill] sm:$0xff] }
 0x51b   : > { %v2552_v26 = vmul.f32 %v5138_v22, %v2543_v51  ;;  %v2685_v55 = vadd.f32 %v8698_v53, %v2629_v47  ;;  %v2686_v22 = vadd.f32 %v8698_v53, %v2630_v7  ;;  %v2642_v47 = vmul.f32 %v7176_v57, %v8693_v1  ;;  %v8700_v7 = vld [vmem:[#allocation9_spill] sm:$0xff] }
 0x51c   : > { %v2547_v62 = vsel %vm2546_vm7, %v2536_v5, %v2545_v45  ;;  %v2689_v45 = vadd.f32 %v7037_v56, %v2633_v36  ;;  %v2737_v5 = vmul.f32 %v7062_v31, %v8694_v27  ;;  %v8701_v36 = vld [vmem:[#allocation10_spill] sm:$0xff]  ;;  %v2746_v53 = vmul.f32 %v7212_v30, %v8695_v4 }
 0x51d   : > { %v2550_v40 = vsel %vm2548_vm8, %v2549_v17, %v2547_v62  ;;  %v2554_v38 = vsel %vm2553_vm9, %v2543_v51, %v2552_v26  ;;  %v7357_v62 = vmul.f32 %v6972_v34, %v8691_v23  ;;  %v2641_v26 = vmul.f32 %v7176_v57, %v8691_v23 }
 0x51e   : > { %v2558_v59 = vmax.f32 %v2550_v40, 1e-12  ;;  %v2557_v60 = vsel %vm2555_vm10, %v2556_v29, %v2554_v38  ;;  %v7365_v38 = vmul.f32 %v6972_v34, %v8693_v1  ;;  %v2690_v40 = vadd.f32 %v7037_v56, %v2634_v32 }
 0x51f   : > { %v2559_v41 = vmax.f32 %v2557_v60, 1e-12  ;;  %v2738_v60 = vmul.f32 %v7062_v31, %v8695_v4  ;;  %v7372_v17 = vmul.f32 %v7009_v37, %v8700_v7  ;;  %v7376_v51 = vmul.f32 %v7009_v37, %v8701_v36 }
 0x520   : > { %5139 = vrcp.f32 %v2558_v59  ;;  %v2637_v59 = vmul.f32 %v7108_v48, %v8691_v23  ;;  %v2638_v34 = vmul.f32 %v7108_v48, %v8693_v1  ;;  %v7382_v57 = vadd.f32 %v2737_v5, %v2689_v45  ;;  %v7396_v48 = vpop.permute.xlu0 %2846 }
 0x521   : > { %5141 = vrcp.f32 %v2559_v41  ;;  %v2643_v56 = vmul.f32 %v7312_v13, %v8691_v23  ;;  %v7386_v31 = vadd.f32 %v2733_v16, %v2685_v55  ;;  %v7388_v32 = vadd.f32 %v2734_v18, %v2686_v22  ;;  %8702 = vst [vmem:[#allocation5_spill] sm:$0xff] %v7396_v48 }
 0x522   : > { %v2697_v19 = vadd.f32 %v7207_v0, %v2641_v26  ;;  %v2698_v37 = vadd.f32 %v7207_v0, %v2642_v47  ;;  %v2745_v29 = vmul.f32 %v7212_v30, %v8694_v27  ;;  %v7398_v45 = vadd.f32 %v2738_v60, %v2690_v40 }
 0x523   : > { %v7402_v55 = vmul.f32 %v7075_v28, %v8694_v27  ;;  %v7406_v16 = vmul.f32 %v7075_v28, %v8695_v4  ;;  %v2644_v0 = vmul.f32 %v7312_v13, %v8693_v1  ;;  %v2693_v18 = vadd.f32 %v7147_v54, %v2637_v59 }
 0x524   : > { %v2694_v5 = vadd.f32 %v7147_v54, %v2638_v34  ;;  %v2741_v30 = vmul.f32 %v7153_v52, %v8694_v27  ;;  %v2742_v22 = vmul.f32 %v7153_v52, %v8695_v4  ;;  %v7418_v41 = vmul.f32 %v7118_v42, %v8700_v7 }
 0x525   : > { %v7422_v28 = vmul.f32 %v7118_v42, %v8701_v36  ;;  %v2747_v13 = vmul.f32 %v7219_v46, %v8694_v27  ;;  %v2699_v26 = vadd.f32 %v7314_v9, %v2643_v56  ;;  %v2761_v54 = vadd.f32 %v2745_v29, %v2697_v19 }
 0x526   : > { %v2762_v47 = vadd.f32 %v2746_v53, %v2698_v37  ;;  %v2809_v40 = vmul.f32 %v7230_v58, %v8700_v7  ;;  %v2810_v52 = vmul.f32 %v7230_v58, %v8701_v36  ;;  %v7433_v60 = vmul.f32 %v7128_v6, %v8700_v7  ;;  %v2855_v53 = vpop.permute.xlu0 %2854 }
 0x527   : > { %v7437_v42 = vmul.f32 %v7128_v6, %v8701_v36  ;;  %v2748_v59 = vmul.f32 %v7219_v46, %v8695_v4  ;;  %v2700_v34 = vadd.f32 %v7314_v9, %v2644_v0  ;;  %v7442_v19 = vadd.f32 %v2741_v30, %v2693_v18 }
 0x528   : > { %v7444_v37 = vadd.f32 %v2742_v22, %v2694_v5  ;;  %v2743_v58 = vmul.f32 %v7160_v21, %v8694_v27  ;;  %v7450_v29 = vmul.f32 %v7160_v21, %v8695_v4  ;;  %v2805_v48 = vmul.f32 %v7190_v2, %v8700_v7  ;;  %v8703_v4 = vld [vmem:[#allocation3_spill] sm:$0xff] }
 0x529   : > { %v2763_v46 = vadd.f32 %v2747_v13, %v2699_v26  ;;  %v2811_v9 = vmul.f32 %v7318_v39, %v8700_v7  ;;  %v2687_v18 = vadd.f32 %v7288_v33, %v7324_v24  ;;  %v2825_v5 = vadd.f32 %v2809_v40, %v2761_v54 }
 0x52a   : > { %v5140_v56 = vpop.eup %5139  ;;  %v2826_v30 = vadd.f32 %v2810_v52, %v2762_v47  ;;  %v2764_v22 = vadd.f32 %v2748_v59, %v2700_v34  ;;  %v2931_v59 = vpop.permute.xlu0 %2930 }
 0x52b   : > { %v5142_v6 = vpop.eup %5141  ;;  %v2561_v0 = vmul.f32 %v5140_v56, %v7304_v8  ;;  %v2812_v8 = vmul.f32 %v7318_v39, %v8701_v36  ;;  %v2827_v47 = vadd.f32 %v2811_v9, %v2763_v46  ;;  %v2688_v39 = vadd.f32 %v7288_v33, %v7328_v49 }
 0x52c   : > { %v2563_v21 = vmul.f32 %v5142_v6, %v7306_v10  ;;  %v2639_v10 = vmul.f32 %v7292_v63, %v8691_v23  ;;  %v2692_v33 = vadd.f32 %v7290_v35, %v7365_v38  ;;  %v2751_v38 = vadd.f32 %v7332_v50, %v2687_v18 }
 0x52d   : > { %v7461_v27 = vrot.slane %v2561_v0, %v8703_v4  ;;  %v7464_v61 = vrot.slane %v2561_v0, %v8704_v25  ;;  %v4507_v13 = vrot.slane %v2561_v0, 5  ;;  %v2828_v49 = vadd.f32 %v2812_v8, %v2764_v22 }
 0x52e   : > { %v7469_v26 = vrot.slane %v2563_v21, %v8703_v4  ;;  %v7472_v24 = vrot.slane %v2563_v21, %v8704_v25  ;;  %v4508_v54 = vrot.slane %v2563_v21, 5  ;;  %v2691_v4 = vadd.f32 %v7290_v35, %v7357_v62 }
 0x52f   : > { %v2881_v40 = vmul.f32 %v7461_v27, %v2855_v53  ;;  %v2883_v52 = vmul.f32 %v7461_v27, %v7242_v11  ;;  %4511 = vst [vmem:[%s7298_s29] sm:$0x18] %v4507_v13  ;;  %v2953_v6 = vmul.f32 %v7464_v61, %v7249_v43  ;;  %v2955_v9 = vmul.f32 %v7464_v61, %v2931_v59 }
 0x530   : > { %v2882_v25 = vmul.f32 %v7469_v26, %v2855_v53  ;;  %v2884_v34 = vmul.f32 %v7469_v26, %v7242_v11  ;;  %4512 = vst [vmem:[%s7298_s29 + $0x8] sm:$0x18] %v4508_v54  ;;  %v2954_v62 = vmul.f32 %v7472_v24, %v7249_v43  ;;  %v2640_v53 = vmul.f32 %v7292_v63, %v8693_v1  ;;  %v7504_v43 = vpop.permute.xlu1 %3375 }
 0x531   : > { %v2897_v56 = vadd.f32 %v2881_v40, %v2825_v5  ;;  %v2899_v46 = vadd.f32 %v2883_v52, %v2827_v47  ;;  %v2695_v11 = vadd.f32 %v7302_v14, %v2639_v10  ;;  %v2806_v13 = vmul.f32 %v7190_v2, %v8701_v36 }
 0x532   : > { %v2898_v0 = vadd.f32 %v2882_v25, %v2826_v30  ;;  %v2807_v54 = vmul.f32 %v7195_v12, %v8700_v7  ;;  %v2900_v35 = vadd.f32 %v2884_v34, %v2828_v49  ;;  %v2752_v30 = vadd.f32 %v7336_v20, %v2688_v39  ;;  %v8707_v49 = vld [vmem:[#allocation38_spill] sm:$0xff] }
 0x533   : > { %v2969_v5 = vadd.f32 %v2953_v6, %v2897_v56  ;;  %v2971_v21 = vadd.f32 %v2955_v9, %v2899_v46  ;;  %v2755_v8 = vadd.f32 %v7402_v55, %v2691_v4  ;;  %v2756_v10 = vadd.f32 %v7406_v16, %v2692_v33 }
 0x534   : > { %v2970_v47 = vadd.f32 %v2954_v62, %v2898_v0  ;;  %v2956_v2 = vmul.f32 %v7472_v24, %v2931_v59  ;;  %v2696_v52 = vadd.f32 %v7302_v14, %v2640_v53  ;;  %v2759_v25 = vadd.f32 %v2743_v58, %v2695_v11  ;;  %v8708_v62 = vld [vmem:[#allocation27_spill] sm:$0xff] }
 0x535   : > { %v4722_v22 = vmul.f32 -1.442695, %v2969_v5  ;;  %v4724_v63 = vmul.f32 -1.442695, %v2971_v21  ;;  %v2797_v34 = vmul.f32 %v7316_v44, %v8700_v7  ;;  %v2817_v50 = vadd.f32 %v7418_v41, %v7382_v57 }
 0x536   : > { %v4723_v40 = vmul.f32 -1.442695, %v2970_v47  ;;  %v2798_v20 = vmul.f32 %v7316_v44, %v8701_v36  ;;  %v2972_v55 = vadd.f32 %v2956_v2, %v2900_v35  ;;  %v2818_v16 = vadd.f32 %v7422_v28, %v7398_v45 }
 0x537   : > { %5143 = vpow2.f32 %v4722_v22  ;;  %v7519_v18 = vadd.f32 %v2805_v48, %v7442_v19  ;;  %v7522_v14 = vadd.f32 %v2806_v13, %v7444_v37  ;;  %v2808_v58 = vmul.f32 %v7195_v12, %v8701_v36  ;;  %v7534_v19 = vpop.permute.xlu1 %3118 }
 0x538   : > { %5145 = vpow2.f32 %v4723_v40  ;;  %v2815_v57 = vadd.f32 %v7372_v17, %v2751_v38  ;;  %v2816_v41 = vadd.f32 %v7376_v51, %v2752_v30  ;;  %v2819_v44 = vadd.f32 %v7433_v60, %v2755_v8  ;;  %v8705_v51 = vld [vmem:[#allocation45_spill] sm:$0xff]  ;;  %v8710_v8 = vld [vmem:[#allocation28_spill] sm:$0xff] }
 0x539   : > { %5147 = vpow2.f32 %v4724_v63  ;;  %v2820_v39 = vadd.f32 %v7437_v42, %v2756_v10  ;;  %v2760_v45 = vadd.f32 %v7450_v29, %v2696_v52  ;;  %v7531_v28 = vadd.f32 %v2807_v54, %v2759_v25  ;;  %v8706_v42 = vld [vmem:[#allocation29_spill] sm:$0xff] }
 0x53a   : > { %v2813_v48 = vadd.f32 %v2797_v34, %v7386_v31  ;;  %v2814_v37 = vadd.f32 %v2798_v20, %v7388_v32  ;;  %v4725_v4 = vmul.f32 -1.442695, %v2972_v55  ;;  %v2870_v12 = vmul.f32 %v7469_v26, %v7320_v15 }
 0x53b   : > { %v2872_v17 = vmul.f32 %v7469_v26, %v7092_v3  ;;  %v2942_v60 = vmul.f32 %v7472_v24, %v8705_v51  ;;  %v2944_v29 = vmul.f32 %v7472_v24, %v8706_v42  ;;  %v2869_v31 = vmul.f32 %v7461_v27, %v7320_v15  ;;  %v7559_v54 = vpop.permute.xlu1 %3260 }
 0x53c   : > { %v2871_v59 = vmul.f32 %v7461_v27, %v7092_v3  ;;  %v2886_v32 = vadd.f32 %v2870_v12, %v2814_v37  ;;  %v2941_v6 = vmul.f32 %v7464_v61, %v8705_v51  ;;  %v2943_v46 = vmul.f32 %v7464_v61, %v8706_v42  ;;  %v8709_v3 = vld [vmem:[#allocation46_spill] sm:$0xff]  ;;  %v8711_v51 = vld [vmem:[#allocation5_spill] sm:$0xff] }
 0x53d   : > { %v2888_v56 = vadd.f32 %v2872_v17, %v2816_v41  ;;  %v2885_v9 = vadd.f32 %v2869_v31, %v2813_v48  ;;  %v2874_v0 = vmul.f32 %v7469_v26, %v8707_v49  ;;  %v2876_v53 = vmul.f32 %v7469_v26, %v8708_v62  ;;  %v8712_v42 = vld [vmem:[#allocation37_spill] sm:$0xff]  ;;  %v8713_v31 = vld [vmem:[#allocation30_spill] sm:$0xff] }
 0x53e   : > { %v2887_v33 = vadd.f32 %v2871_v59, %v2815_v57  ;;  %v2824_v15 = vadd.f32 %v2808_v58, %v2760_v45  ;;  %v2958_v11 = vadd.f32 %v2942_v60, %v2886_v32  ;;  %v2946_v21 = vmul.f32 %v7472_v24, %v8709_v3  ;;  %v8714_v59 = vld [vmem:[#allocation32_spill] sm:$0xff] }
 0x53f   : > { %v2960_v5 = vadd.f32 %v2944_v29, %v2888_v56  ;;  %v2957_v47 = vadd.f32 %v2941_v6, %v2885_v9  ;;  %v2890_v38 = vadd.f32 %v2874_v0, %v2818_v16  ;;  %v2892_v30 = vadd.f32 %v2876_v53, %v2820_v39 }
 0x540   : > { %v2959_v35 = vadd.f32 %v2943_v46, %v2887_v33  ;;  %5149 = vpow2.f32 %v4725_v4  ;;  %v2948_v10 = vmul.f32 %v7472_v24, %v8710_v8  ;;  %v2873_v40 = vmul.f32 %v7461_v27, %v8707_v49  ;;  %v7569_v4 = vpop.permute.xlu1 %3383 }
 0x541   : > { %v5144_v13 = vpop.eup %5143  ;;  %v4711_v25 = vmul.f32 -1.442695, %v2958_v11  ;;  %v4713_v34 = vmul.f32 -1.442695, %v2960_v5  ;;  %v2962_v20 = vadd.f32 %v2946_v21, %v2890_v38  ;;  %v2875_v16 = vmul.f32 %v7461_v27, %v8708_v62 }
 0x542   : > { %v5146_v22 = vpop.eup %5145  ;;  %v3033_v63 = vadd.f32 1.0, %v5144_v13  ;;  %v2964_v58 = vadd.f32 %v2948_v10, %v2892_v30  ;;  %v4710_v57 = vmul.f32 -1.442695, %v2957_v47  ;;  %v4712_v41 = vmul.f32 -1.442695, %v2959_v35 }
 0x543   : > { %v5148_v2 = vpop.eup %5147  ;;  %v3034_v52 = vadd.f32 1.0, %v5146_v22  ;;  %v2889_v39 = vadd.f32 %v2873_v40, %v2817_v50  ;;  %v4715_v45 = vmul.f32 -1.442695, %v2962_v20  ;;  %v2891_v48 = vadd.f32 %v2875_v16, %v2819_v44 }
 0x544   : > { %5151 = vrcp.f32 %v3033_v63  ;;  %v3035_v55 = vadd.f32 1.0, %v5148_v2  ;;  %v2945_v37 = vmul.f32 %v7464_v61, %v8709_v3  ;;  %v4717_v12 = vmul.f32 -1.442695, %v2964_v58 }
 0x545   : > { %5153 = vrcp.f32 %v3034_v52  ;;  %v2947_v17 = vmul.f32 %v7464_v61, %v8710_v8  ;;  %v2878_v60 = vmul.f32 %v7469_v26, %v8711_v51  ;;  %v2880_v29 = vmul.f32 %v7469_v26, %v8712_v42 }
 0x546   : > { %5155 = vrcp.f32 %v3035_v55  ;;  %v2961_v50 = vadd.f32 %v2945_v37, %v2889_v39  ;;  %v2950_v44 = vmul.f32 %v7472_v24, %v8713_v31  ;;  %v2952_v32 = vmul.f32 %v7472_v24, %v8714_v59 }
 0x547   : > { %5157 = vpow2.f32 %v4711_v25  ;;  %v2963_v56 = vadd.f32 %v2947_v17, %v2891_v48  ;;  %v2894_v6 = vadd.f32 %v2878_v60, %v7522_v14  ;;  %v2896_v46 = vadd.f32 %v2880_v29, %v2824_v15  ;;  %v3440_v15 = vpop.permute.xlu1 %3439 }
 0x548   : > { %5159 = vpow2.f32 %v4713_v34  ;;  %v4714_v9 = vmul.f32 -1.442695, %v2961_v50  ;;  %v2877_v33 = vmul.f32 %v7461_v27, %v8711_v51  ;;  %v2879_v49 = vmul.f32 %v7461_v27, %v8712_v42 }
 0x549   : > { %5161 = vpow2.f32 %v4710_v57  ;;  %v4716_v0 = vmul.f32 -1.442695, %v2963_v56  ;;  %v2966_v62 = vadd.f32 %v2950_v44, %v2894_v6  ;;  %v2968_v53 = vadd.f32 %v2952_v32, %v2896_v46  ;;  %v8715_v46 = vld [vmem:[#allocation11_spill] sm:$0xff] }
 0x54a   : > { %5163 = vpow2.f32 %v4712_v41  ;;  %v5150_v11 = vpop.eup %5149  ;;  %v2893_v5 = vadd.f32 %v2877_v33, %v7519_v18  ;;  %v2895_v3 = vadd.f32 %v2879_v49, %v7531_v28  ;;  %v2949_v14 = vmul.f32 %v7464_v61, %v8713_v31  ;;  %v8716_v49 = vld [vmem:[#allocation12_spill] sm:$0xff] }
 0x54b   : > { %5165 = vpow2.f32 %v4715_v45  ;;  %v4719_v21 = vmul.f32 -1.442695, %v2966_v62  ;;  %v4721_v13 = vmul.f32 -1.442695, %v2968_v53  ;;  %v2951_v47 = vmul.f32 %v7464_v61, %v8714_v59  ;;  %v8717_v53 = vld [vmem:[#allocation13_spill] sm:$0xff] }
 0x54c   : > { %5167 = vpow2.f32 %v4717_v12  ;;  %v2965_v38 = vadd.f32 %v2949_v14, %v2893_v5  ;;  %v7595_v30 = vmul.f32 %v3440_v15, %v7461_v27  ;;  %v7598_v18 = vmul.f32 %v3440_v15, %v7469_v26  ;;  %v8718_v14 = vld [vmem:[#allocation14_spill] sm:$0xff] }
 0x54d   : > { %5169 = vpow2.f32 %v4714_v9  ;;  %v2967_v22 = vadd.f32 %v2951_v47, %v2895_v3  ;;  %v3036_v8 = vadd.f32 1.0, %v5150_v11 }
 0x54e   : > { %v7592_v35 = vpop.eup %5151  ;;  %5171 = vpow2.f32 %v4716_v0  ;;  %v4718_v10 = vmul.f32 -1.442695, %v2965_v38 }
 0x54f   : > { %v7600_v28 = vpop.eup %5153  ;;  %5173 = vpow2.f32 %v4719_v21  ;;  %v4720_v40 = vmul.f32 -1.442695, %v2967_v22 }
 0x550   : > { %v7602_v63 = vpop.eup %5155  ;;  %5175 = vpow2.f32 %v4721_v13  ;;  %v8719_v13 = vld [vmem:[#allocation17_spill] sm:$0xff] }
 0x551   : > { %v5158_v2 = vpop.eup %5157  ;;  %5177 = vpow2.f32 %v4718_v10 }
 0x552   : > { %v5160_v52 = vpop.eup %5159  ;;  %v3022_v25 = vadd.f32 1.0, %v5158_v2  ;;  %5179 = vpow2.f32 %v4720_v40  ;;  %v8721_v2 = vld [vmem:[#allocation18_spill] sm:$0xff] }
 0x553   : > { %v5162_v34 = vpop.eup %5161  ;;  %5181 = vrcp.f32 %v3036_v8  ;;  %v3024_v20 = vadd.f32 1.0, %v5160_v52  ;;  %v8720_v8 = vld [vmem:[#allocation15_spill] sm:$0xff] }
 0x554   : > { %v5164_v55 = vpop.eup %5163  ;;  %5183 = vrcp.f32 %v3022_v25  ;;  %v3021_v58 = vadd.f32 1.0, %v5162_v34 }
 0x555   : > { %v5166_v16 = vpop.eup %5165  ;;  %5185 = vrcp.f32 %v3024_v20  ;;  %v3023_v57 = vadd.f32 1.0, %v5164_v55  ;;  %v8722_v20 = vld [vmem:[#allocation16_spill] sm:$0xff] }
 0x556   : > { %v5168_v41 = vpop.eup %5167  ;;  %5187 = vrcp.f32 %v3021_v58  ;;  %v3026_v39 = vadd.f32 1.0, %v5166_v16  ;;  %v8723_v16 = vld [vmem:[#allocation20_spill] sm:$0xff] }
 0x557   : > { %v5170_v45 = vpop.eup %5169  ;;  %5189 = vrcp.f32 %v3023_v57  ;;  %v3028_v48 = vadd.f32 1.0, %v5168_v41 }
 0x558   : > { %v5172_v37 = vpop.eup %5171  ;;  %5191 = vrcp.f32 %v3026_v39  ;;  %v3025_v12 = vadd.f32 1.0, %v5170_v45  ;;  %v8724_v45 = vld [vmem:[#allocation19_spill] sm:$0xff] }
 0x559   : > { %v5174_v17 = vpop.eup %5173  ;;  %5193 = vrcp.f32 %v3028_v48  ;;  %v3027_v51 = vadd.f32 1.0, %v5172_v37 }
 0x55a   : > { %v5176_v60 = vpop.eup %5175  ;;  %5195 = vrcp.f32 %v3025_v12  ;;  %v3030_v42 = vadd.f32 1.0, %v5174_v17  ;;  %v8725_v12 = vld [vmem:[#allocation22_spill] sm:$0xff] }
 0x55b   : > { %v5178_v29 = vpop.eup %5177  ;;  %5197 = vrcp.f32 %v3027_v51  ;;  %v3032_v50 = vadd.f32 1.0, %v5176_v60  ;;  %v8726_v51 = vld [vmem:[#allocation23_spill] sm:$0xff] }
 0x55c   : > { %v5180_v31 = vpop.eup %5179  ;;  %5199 = vrcp.f32 %v3030_v42  ;;  %v3029_v44 = vadd.f32 1.0, %v5178_v29  ;;  %v3082_v60 = vmul.f32 %v7600_v28, %v8726_v51  ;;  %v8727_v42 = vld [vmem:[#allocation25_spill] sm:$0xff]  ;;  %v4945_v28 = vld [vmem:[%s8516_s7] sm:$0xff]   ;;  %v8737_v51 = vld [vmem:[#allocation8_spill] sm:$0xff] }
 0x55d   : > { %v5182_v59 = vpop.eup %5181  ;;  %5201 = vrcp.f32 %v3032_v50  ;;  %v3031_v32 = vadd.f32 1.0, %v5180_v31  ;;  %v8728_v31 = vld [vmem:[#allocation21_spill] sm:$0xff] }
 0x55e   : > { %v5184_v56 = vpop.eup %5183  ;;  %5203 = vrcp.f32 %v3029_v44  ;;  %v3084_v29 = vmul.f32 %v5182_v59, %v8727_v42  ;;  %v8731_v59 = vmov 0   ;;  %v8738_v42 = vld [vmem:[#allocation44_spill] sm:$0xff] }
 0x55f   : > { %v5186_v6 = vpop.eup %5185  ;;  %v3070_v9 = vmul.f32 %v5184_v56, %v8715_v46  ;;  %5205 = vrcp.f32 %v3031_v32  ;;  %v8729_v56 = vld [vmem:[#allocation24_spill] sm:$0xff]  ;;  %v8730_v46 = vld [vmem:[#allocation26_spill] sm:$0xff] }
 0x560   : > { %v5188_v33 = vpop.eup %5187  ;;  %v3072_v0 = vmul.f32 %v5186_v6, %v8716_v49  ;;  %v3081_v6 = vmul.f32 %v7592_v35, %v8729_v56  ;;  %v4946_v35 = vld [vmem:[%s8516_s7 + $0x8] sm:$0xff]   ;;  %v7701_v56 = vmul.f32 %v7559_v54, %v8693_v1 }
 0x561   : > { %v5190_v62 = vpop.eup %5189  ;;  %v3069_v11 = vmul.f32 %v5188_v33, %v8717_v53  ;;  %v3092_v33 = vpack.c.bf16 %v3084_v29, %v3082_v60  ;;  %v7643_v53 = vpop.permute.xlu1 %3122  ;;  %v7681_v29 = vmul.f32 %v8738_v42, %v8691_v23 }
 0x562   : > { %v5192_v5 = vpop.eup %5191  ;;  %v3086_v3 = vpack.c.bf16 %v3072_v0, %v3070_v9  ;;  %v3071_v15 = vmul.f32 %v5190_v62, %v8718_v14  ;;  %v3083_v9 = vmul.f32 %v7602_v63, %v8730_v46  ;;  %v4947_v63 = vld [vmem:[%s8516_s7 + $0x10] sm:$0xff]   ;;  %v4948_v0 = vld [vmem:[%s8516_s7 + $0x18] sm:$0xff]   ;;  %v3316_v62 = vpop.permute.xlu0 %3315  ;;  %v7709_v46 = vmul.f32 %v7569_v4, %v8701_v36 }
 0x563   : > { %v5194_v21 = vpop.eup %5193  ;;  %v3074_v47 = vmul.f32 %v5192_v5, %v8719_v13 }
 0x564   : > { %v5196_v38 = vpop.eup %5195  ;;  %3165 = vmatprep.subr.bf16.mxu1 %v3086_v3  ;;  %v3085_v22 = vpack.c.bf16 %v3071_v15, %v3069_v11  ;;  %v3076_v10 = vmul.f32 %v5194_v21, %v8720_v8  ;;  %v3091_v49 = vpack.c.bf16 %v3083_v9, %v3081_v6  ;;  %v7705_v6 = vmul.f32 %v7569_v4, %v8700_v7 }
 0x565   : > { %v5198_v40 = vpop.eup %5197  ;;  %v3073_v52 = vmul.f32 %v5196_v38, %v8721_v2  ;;  %v3266_v5 = vpop.permute.xlu1 %3265 }
 0x566   : > { %v5200_v25 = vpop.eup %5199  ;;  %3166 = vmatpush1.bf16.msra.mxu1 %v3085_v22  ;;  %v3088_v34 = vpack.c.bf16 %v3076_v10, %v3074_v47  ;;  %v3075_v55 = vmul.f32 %v5198_v40, %v8722_v20  ;;  %v3320_v11 = vpop.permute.xlu0 %3319 }
 0x567   : > { %v5202_v58 = vpop.eup %5201  ;;  %v3078_v57 = vmul.f32 %v5200_v25, %v8723_v16 }
 0x568   : > { %v5204_v41 = vpop.eup %5203  ;;  %3167 = vmatprep.subr.bf16.mxu1 %v3088_v34  ;;  %v3087_v39 = vpack.c.bf16 %v3075_v55, %v3073_v52  ;;  %v3080_v48 = vmul.f32 %v5202_v58, %v8724_v45 }
 0x569   : > { %v5206_v37 = vpop.eup %5205  ;;  %v3077_v17 = vmul.f32 %v5204_v41, %v8725_v12  ;;  %v3388_v14 = vpop.permute.xlu1 %3387  ;;  %v8736_v12 = vld [vmem:[#allocation35_spill] sm:$0xff] }
 0x56a   : > { %3168 = vmatpush1.bf16.msra.mxu1 %v3087_v39  ;;  %v3090_v50 = vpack.c.bf16 %v3080_v48, %v3078_v57  ;;  %v3079_v44 = vmul.f32 %v5206_v37, %v8728_v31  ;;  %v3324_v3 = vpop.permute.xlu0 %3323  ;;  %v8734_v39 = vld [vmem:[#allocation34_spill] sm:$0xff]  ;;  %v7677_v60 = vmul.f32 %v8736_v12, %v8737_v51  ;;  %v7689_v31 = vmul.f32 %v7504_v43, %v8700_v7 }
 0x56b   : > { %v7665_v45 = vmul.f32 %v8734_v39, %v8691_v23  ;;  %v7669_v48 = vmul.f32 %v8734_v39, %v8693_v1  ;;  %v8735_v37 = vld [vmem:[#allocation6_spill] sm:$0xff] }
 0x56c   : > { %3169 = vmatprep.subr.bf16.mxu1 %v3090_v50  ;;  %v3089_v32 = vpack.c.bf16 %v3079_v44, %v3077_v17  ;;  %v7673_v17 = vmul.f32 %v8736_v12, %v8735_v37  ;;  %v7685_v50 = vmul.f32 %v8738_v42, %v8693_v1  ;;  %v7693_v44 = vmul.f32 %v7504_v43, %v8701_v36 }
 0x56d   : > { %v7645_v21 = vpop.permute.xlu1 %3447  ;;  %v7714_v43 = vmul.f32 %v3266_v5, %v8691_v23  ;;  %v7728_v4 = vmul.f32 %v3320_v11, %v8735_v37 }
 0x56e   : > { %3170 = vmatpush1.bf16.msra.mxu1 %v3089_v32  ;;  %v3328_v15 = vpop.permute.xlu0 %3327  ;;  %v7697_v32 = vmul.f32 %v7559_v54, %v8691_v23  ;;  %v7723_v54 = vmul.f32 %v3388_v14, %v8701_v36 }
 0x56f   : > { %3171 = vmatprep.subr.bf16.mxu1 %v3092_v33  ;;  %v7717_v33 = vmul.f32 %v3266_v5, %v8693_v1  ;;  %v7737_v5 = vmul.f32 %v3324_v3, %v8737_v51  ;;  %v7740_v39 = vmul.f32 %v3328_v15, %v8735_v37 }
 0x571   : > { %v7649_v47 = vpop.permute.xlu1 %3507 }
 0x572   : > { %3172 = vmatpush1.bf16.msra.mxu1 %v3091_v49  ;;  %v7647_v13 = vpop.permute.xlu0 %3503  ;;  %v7720_v49 = vmul.f32 %v3388_v14, %v8700_v7  ;;  %v7743_v14 = vmul.f32 %v3328_v15, %v8737_v51 }
 0x575   : > { %4730 = vmatmul.mubr.msk.bf16.vlgmr.msra.gmra.mrb[16].mxu1 %vm1305_vm5, %v4945_v28  ;;  %v7651_v22 = vpop.permute.xlu1 %3126  ;;  %v3344_v28 = vmul.f32 %v3316_v62, %v8735_v37 }
 0x576   : > { %3207 = vmatprep.mubr.bf16.mxu1 %v8731_v59  ;;  %v3241_v38 = vpop.permute.xlu0 %3240  ;;  %8732 = vst [vmem:[#allocation39_spill] sm:$0xff] %v7651_v22 }
 0x579   : > { %v3332_v10 = vpop.permute.xlu1 %3331 }
 0x57a   : > { %v3251_v8 = vpop.permute.xlu0 %3250  ;;  %v7749_v42 = vmul.f32 %v3332_v10, %v8737_v51 }
 0x57b   : > { %v3282_v15 = vmul.f32 %v3251_v8, %v8691_v23  ;;  %v7761_v22 = vmul.f32 %v3251_v8, %v8693_v1 }
 0x57c   : > { %8740 = vst [vmem:[#allocation42_spill] sm:$0xff] %v7749_v42 }
 0x57d   : > { %4731 = vmatmul.mubr.msk.bf16.gmra.mrb[20].mxu1 %vm1305_vm5, %v4946_v35  ;;  %v3392_v2 = vpop.permute.xlu1 %3391  ;;  %v3345_v35 = vmul.f32 %v3316_v62, %v8737_v51  ;;  %v7746_v62 = vmul.f32 %v3332_v10, %v8735_v37 }
 0x57e   : > { %3217 = vmatprep.mubr.bf16.mxu1 %v8731_v59  ;;  %v3271_v40 = vpop.permute.xlu0 %3270 }
 0x57f   : > { %8739 = vst [vmem:[#allocation41_spill] sm:$0xff] %v7746_v62  ;;  %v7764_v62 = vmul.f32 %v3271_v40, %v8691_v23  ;;  %v7767_v10 = vmul.f32 %v3271_v40, %v8693_v1 }
 0x581   : > { %v7653_v25 = vpop.permute.xlu1 %3511  ;;  %8743 = vst [vmem:[#allocation10_spill] sm:$0xff] %v7764_v62  ;;  %8744 = vst [vmem:[#allocation3_spill] sm:$0xff] %v7767_v10 }
 0x582   : > { %v3276_v52 = vpop.permute.xlu0 %3275 }
 0x585   : > { %4732 = vmatmul.mubr.msk.bf16.gmra.mrb[24].mxu1 %vm1305_vm5, %v4947_v63  ;;  %v7657_v20 = vpop.permute.xlu1 %3130  ;;  %v7731_v63 = vmul.f32 %v3320_v11, %v8737_v51  ;;  %v7752_v11 = vmul.f32 %v3392_v2, %v8700_v7 }
 0x586   : > { %3227 = vmatprep.mubr.bf16.mxu1 %v8731_v59  ;;  %v7655_v34 = vpop.permute.xlu0 %3443  ;;  %8733 = vst [vmem:[#allocation7_spill] sm:$0xff] %v7657_v20  ;;  %v3279_v20 = vmul.f32 %v3241_v38, %v8693_v1 }
 0x587   : > { %8741 = vst [vmem:[#allocation40_spill] sm:$0xff] %v7752_v11  ;;  %v7779_v11 = vmul.f32 %v3276_v52, %v8693_v1 }
 0x589   : > { %v3336_v58 = vpop.permute.xlu1 %3335  ;;  %8748 = vst [vmem:[#allocation38_spill] sm:$0xff] %v7779_v11 }
 0x58a   : > { %v7659_v55 = vpop.permute.xlu0 %3451  ;;  %v7770_v42 = vmul.f32 %v3336_v58, %v8735_v37 }
 0x58c   : > { %8745 = vst [vmem:[#allocation4_spill] sm:$0xff] %v7770_v42 }
 0x58d   : > { %4733 = vmatmul.mubr.msk.bf16.gmra.mrb[28].mxu1 %vm1305_vm5, %v4948_v0  ;;  %v3396_v57 = vpop.permute.xlu1 %3395  ;;  %v7734_v0 = vmul.f32 %v3324_v3, %v8735_v37  ;;  %v3278_v3 = vmul.f32 %v3241_v38, %v8691_v23  ;;  %v7776_v38 = vmul.f32 %v3276_v52, %v8691_v23  ;;  %v8753_v23 = vld [vmem:[#allocation31_spill] sm:$0xff] }
 0x58e   : > { %4480 = vmatprep.mubr.bf16.mxu1 %v8731_v59  ;;  %v7661_v16 = vpop.permute.xlu0 %3455  ;;  %v7755_v59 = vmul.f32 %v3392_v2, %v8701_v36  ;;  %v7773_v2 = vmul.f32 %v3336_v58, %v8737_v51  ;;  %v7782_v8 = vmul.f32 %v3396_v57, %v8700_v7  ;;  %v7785_v62 = vmul.f32 %v3396_v57, %v8701_v36 }
 0x58f   : > { %8747 = vst [vmem:[#allocation29_spill] sm:$0xff] %v7776_v38 }
 0x590   : > { %8742 = vst [vmem:[#allocation9_spill] sm:$0xff] %v7755_v59  ;;  %8746 = vst [vmem:[#allocation45_spill] sm:$0xff] %v7773_v2 }
 0x591   : > { %v7711_v9 = vpop.permute.xlu1 %3515  ;;  %8749 = vst [vmem:[#allocation27_spill] sm:$0xff] %v7782_v8  ;;  %8750 = vst [vmem:[#allocation46_spill] sm:$0xff] %v7785_v62 }
 0x592   : > { %v3380_v41 = vpop.permute.xlu0 %3379 }
 0x593   : > { %v3408_v2 = vmul.f32 %v3380_v41, %v8700_v7  ;;  %v3409_v1 = vmul.f32 %v3380_v41, %v8701_v36 }
 0x595   : > { %v3340_v59 = vpop.permute.xlu1 %3339 }
 0x596   : > { %v3400_v12 = vpop.permute.xlu0 %3399  ;;  %v7788_v10 = vmul.f32 %v3340_v59, %v8735_v37  ;;  %v7791_v58 = vmul.f32 %v3340_v59, %v8737_v51 }
 0x597   : > { %v7797_v52 = vmul.f32 %v3400_v12, %v8700_v7  ;;  %v7800_v57 = vmul.f32 %v3400_v12, %v8701_v36  ;;  %v7814_v12 = vmul.f32 %v7645_v21, %v7469_v26 }
 0x598   : > { %8751 = vst [vmem:[#allocation28_spill] sm:$0xff] %v7788_v10  ;;  %8752 = vst [vmem:[#allocation5_spill] sm:$0xff] %v7791_v58  ;;  %v8758_v58 = vld [vmem:[#allocation33_spill] sm:$0xff] }
 0x599   : > { %8754 = vst [vmem:[#allocation37_spill] sm:$0xff] %v7797_v52  ;;  %8755 = vst [vmem:[#allocation30_spill] sm:$0xff] %v7800_v57  ;;  %v3474_v52 = vmul.f32 %v7645_v21, %v7461_v27  ;;  %v3535_v21 = vmul.f32 %v7647_v13, %v7472_v24 }
 0x59a   : > { %v3404_v11 = vpop.permute.xlu0 %3403 }
 0x59b   : > { %v7804_v59 = vmul.f32 %v3404_v11, %v8700_v7  ;;  %v7807_v51 = vmul.f32 %v3404_v11, %v8701_v36  ;;  %v3536_v7 = vmul.f32 %v7649_v47, %v7464_v61  ;;  %v3537_v36 = vmul.f32 %v7649_v47, %v7472_v24  ;;  %v3460_v11 = vpop.permute.xlu1 %3459 }
 0x59c   : > { %v3539_v47 = vmul.f32 %v7653_v25, %v7472_v24 }
 0x59d   : > { %8756 = vst [vmem:[#allocation32_spill] sm:$0xff] %v7804_v59  ;;  %8757 = vst [vmem:[#allocation11_spill] sm:$0xff] %v7807_v51  ;;  %v8760_v51 = vld [vmem:[#allocation43_spill] sm:$0xff] }
 0x648   : > { %v3199_v40 = vpop.f32.mrb[16].mxu1 }
 0x649   : > { %v3200_v38 = vadd.f32 %v3199_v40, %v8753_v23  ;;  %v3201_v42 = vpop.f32.mrb[17].mxu1 }
 0x64a   : > { %v3202_v37 = vadd.f32 %v3201_v42, %v8753_v23  ;;  %v3203_v10 = vpop.f32.mrb[18].mxu1  ;;  %v3538_v23 = vmul.f32 %v7653_v25, %v7464_v61  ;;  %v8759_v25 = vld [vmem:[#allocation36_spill] sm:$0xff] }
 0x64b   : > { %v3294_v40 = vadd.f32 %v3278_v3, %v3200_v38  ;;  %v3204_v62 = vadd.f32 %v3203_v10, %v8758_v58  ;;  %v3205_v41 = vpop.f32.mrb[19].mxu1  ;;  %v3534_v38 = vmul.f32 %v7647_v13, %v7464_v61 }
 0x64c   : > { %v3295_v57 = vadd.f32 %v3279_v20, %v3202_v37  ;;  %v3206_v42 = vadd.f32 %v3205_v41, %v8758_v58 }
 0x64d   : > { %v3358_v3 = vadd.f32 %v7673_v17, %v3294_v40  ;;  %v3296_v10 = vadd.f32 %v7665_v45, %v3204_v62  ;;  %v3472_v45 = vmul.f32 %v7655_v34, %v7461_v27  ;;  %v3473_v62 = vmul.f32 %v7655_v34, %v7469_v26 }
 0x64e   : > { %v3359_v20 = vadd.f32 %v7677_v60, %v3295_v57  ;;  %v3297_v58 = vadd.f32 %v7669_v48, %v3206_v42  ;;  %v3540_v48 = vmul.f32 %v7711_v9, %v7464_v61 }
 0x64f   : > { %v3422_v17 = vadd.f32 %v7689_v31, %v3358_v3  ;;  %v3360_v37 = vadd.f32 %v3344_v28, %v3296_v10  ;;  %v3541_v28 = vmul.f32 %v7711_v9, %v7472_v24 }
 0x650   : > { %v3423_v13 = vadd.f32 %v7693_v44, %v3359_v20  ;;  %v3361_v60 = vadd.f32 %v3345_v35, %v3297_v58  ;;  %v3209_v57 = vpop.f32.mrb[20].mxu1  ;;  %v3520_v35 = vpop.permute.xlu1 %3519 }
 0x651   : > { %v3486_v40 = vadd.f32 %v7595_v30, %v3422_v17  ;;  %v3424_v41 = vadd.f32 %v3408_v2, %v3360_v37  ;;  %v3210_v42 = vadd.f32 %v3209_v57, %v8759_v25  ;;  %v3211_v31 = vpop.f32.mrb[21].mxu1 }
 0x652   : > { %v3487_v3 = vadd.f32 %v7598_v18, %v3423_v13  ;;  %v3425_v10 = vadd.f32 %v3409_v1, %v3361_v60  ;;  %v3212_v34 = vadd.f32 %v3211_v31, %v8759_v25  ;;  %v3213_v44 = vpop.f32.mrb[22].mxu1  ;;  %v3476_v18 = vmul.f32 %v7659_v55, %v7461_v27 }
 0x653   : > { %v3488_v20 = vadd.f32 %v3472_v45, %v3424_v41  ;;  %v3298_v58 = vadd.f32 %v3282_v15, %v3210_v42  ;;  %v3214_v59 = vadd.f32 %v3213_v44, %v8760_v51  ;;  %v3215_v8 = vpop.f32.mrb[23].mxu1  ;;  %v7848_v30 = vadd.f32 %v3534_v38, %v3486_v40 }
 0x654   : > { %v3489_v2 = vadd.f32 %v3473_v62, %v3425_v10  ;;  %v3299_v17 = vadd.f32 %v7761_v22, %v3212_v34  ;;  %v3216_v37 = vadd.f32 %v3215_v8, %v8760_v51  ;;  %v7852_v9 = vadd.f32 %v3535_v21, %v3487_v3  ;;  %v7879_v62 = vpop.permute.xlu1 %3463 }
 0x655   : > { %v7856_v1 = vadd.f32 %v3536_v7, %v3488_v20  ;;  %v3362_v45 = vadd.f32 %v7728_v4, %v3298_v58  ;;  %v3300_v15 = vadd.f32 %v7681_v29, %v3214_v59  ;;  %v3477_v38 = vmul.f32 %v7659_v55, %v7469_v26 }
 0x656   : > { %v7862_v13 = vadd.f32 %v3537_v36, %v3489_v2  ;;  %v3363_v22 = vadd.f32 %v7731_v63, %v3299_v17  ;;  %v3301_v8 = vadd.f32 %v7685_v50, %v3216_v37  ;;  %v3478_v51 = vmul.f32 %v7661_v16, %v7461_v27  ;;  %v8762_v2 = vld [vmem:[#allocation41_spill] sm:$0xff]  ;;  %v3524_v37 = vpop.permute.xlu0 %3523 }
 0x657   : > { %v3426_v21 = vadd.f32 %v7705_v6, %v3362_v45  ;;  %v3364_v7 = vadd.f32 %v7734_v0, %v3300_v15  ;;  %v3566_v4 = vadd.f32 %v7856_v1, %v7848_v30  ;;  %v3479_v29 = vmul.f32 %v7661_v16, %v7469_v26  ;;  %v8764_v45 = vld [vmem:[#allocation42_spill] sm:$0xff] }
 0x658   : > { %v3427_v55 = vadd.f32 %v7709_v46, %v3363_v22  ;;  %v3365_v59 = vadd.f32 %v7737_v5, %v3301_v8  ;;  %v3219_v63 = vpop.f32.mrb[24].mxu1  ;;  %v3579_v50 = vadd.f32 %v7862_v13, %v7852_v9  ;;  %v3480_v36 = vmul.f32 %v3460_v11, %v7461_v27  ;;  %v3468_v58 = vpop.permute.xlu1 %3467  ;;  %v8765_v8 = vld [vmem:[#allocation27_spill] sm:$0xff] }
 0x659   : > { %v3490_v6 = vadd.f32 %v3474_v52, %v3426_v21  ;;  %v3428_v0 = vadd.f32 %v7720_v49, %v3364_v7  ;;  %v3220_v60 = vadd.f32 %v3219_v63, %v7534_v19  ;;  %v3221_v57 = vpop.f32.mrb[25].mxu1  ;;  %v3481_v16 = vmul.f32 %v3460_v11, %v7469_v26  ;;  %v8766_v7 = vld [vmem:[#allocation39_spill] sm:$0xff] }
 0x65a   : > { %v3491_v46 = vadd.f32 %v7814_v12, %v3427_v55  ;;  %v3429_v5 = vadd.f32 %v7723_v54, %v3365_v59  ;;  %v3222_v40 = vadd.f32 %v3221_v57, %v7534_v19  ;;  %v3223_v41 = vpop.f32.mrb[26].mxu1  ;;  %v3545_v59 = vmul.f32 %v3524_v37, %v7472_v24 }
 0x65b   : > { %v7887_v25 = vadd.f32 %v3538_v23, %v3490_v6  ;;  %v3492_v42 = vadd.f32 %v3476_v18, %v3428_v0  ;;  %v3302_v31 = vadd.f32 %v7697_v32, %v3220_v60  ;;  %v3224_v52 = vadd.f32 %v3223_v41, %v7643_v53  ;;  %v3225_v49 = vpop.f32.mrb[27].mxu1 }
 0x65c   : > { %v7891_v3 = vadd.f32 %v3539_v47, %v3491_v46  ;;  %v3493_v10 = vadd.f32 %v3477_v38, %v3429_v5  ;;  %v3303_v11 = vadd.f32 %v7701_v56, %v3222_v40  ;;  %v3226_v12 = vadd.f32 %v3225_v49, %v7643_v53  ;;  %v8761_v53 = vld [vmem:[#allocation40_spill] sm:$0xff]  ;;  %v8768_v46 = vld [vmem:[#allocation10_spill] sm:$0xff]  ;;  %v8769_v40 = vld [vmem:[#allocation7_spill] sm:$0xff] }
 0x65d   : > { %v7895_v34 = vadd.f32 %v3540_v48, %v3492_v42  ;;  %v3366_v19 = vadd.f32 %v7740_v39, %v3302_v31  ;;  %v3304_v54 = vadd.f32 %v7714_v43, %v3224_v52  ;;  %v3567_v23 = vadd.f32 %v3566_v4, %v7887_v25  ;;  %v8770_v52 = vld [vmem:[#allocation3_spill] sm:$0xff] }
 0x65e   : > { %v7900_v44 = vadd.f32 %v3541_v28, %v3493_v10  ;;  %v3367_v32 = vadd.f32 %v7743_v14, %v3303_v11  ;;  %v3305_v47 = vadd.f32 %v7717_v33, %v3226_v12  ;;  %v3580_v20 = vadd.f32 %v3579_v50, %v7891_v3  ;;  %v8763_v28 = vld [vmem:[#allocation9_spill] sm:$0xff] }
 0x65f   : > { %v3542_v56 = vmul.f32 %v3520_v35, %v7464_v61  ;;  %v3430_v48 = vadd.f32 %v8761_v53, %v3366_v19  ;;  %v3368_v17 = vadd.f32 %v8762_v2, %v3304_v54  ;;  %v3568_v39 = vadd.f32 %v3567_v23, %v7895_v34  ;;  %v8772_v19 = vld [vmem:[#allocation29_spill] sm:$0xff] }
 0x660   : > { %v3543_v43 = vmul.f32 %v3520_v35, %v7472_v24  ;;  %v3431_v18 = vadd.f32 %v8763_v28, %v3367_v32  ;;  %v3369_v14 = vadd.f32 %v8764_v45, %v3305_v47  ;;  %v3229_v15 = vpop.f32.mrb[28].mxu1  ;;  %v3581_v33 = vadd.f32 %v3580_v20, %v7900_v44  ;;  %v8767_v35 = vld [vmem:[#allocation46_spill] sm:$0xff]  ;;  %v3528_v32 = vpop.permute.xlu1 %3527  ;;  %v8773_v47 = vld [vmem:[#allocation45_spill] sm:$0xff] }
 0x661   : > { %v3544_v38 = vmul.f32 %v3524_v37, %v7464_v61  ;;  %v3494_v22 = vadd.f32 %v3478_v51, %v3430_v48  ;;  %v3432_v21 = vadd.f32 %v8765_v8, %v3368_v17  ;;  %v3230_v4 = vadd.f32 %v3229_v15, %v8766_v7  ;;  %v3231_v55 = vpop.f32.mrb[29].mxu1  ;;  %v8775_v2 = vld [vmem:[#allocation37_spill] sm:$0xff]  ;;  %v8777_v45 = vld [vmem:[#allocation30_spill] sm:$0xff] }
 0x662   : > { %v3495_v63 = vadd.f32 %v3479_v29, %v3431_v18  ;;  %v3433_v50 = vadd.f32 %v8767_v35, %v3369_v14  ;;  %v3232_v6 = vadd.f32 %v3231_v55, %v8766_v7  ;;  %v3233_v0 = vpop.f32.mrb[30].mxu1  ;;  %v8771_v29 = vld [vmem:[#allocation4_spill] sm:$0xff]  ;;  %v3483_v18 = vmul.f32 %v7879_v62, %v7469_v26  ;;  %v8778_v15 = vld [vmem:[#allocation5_spill] sm:$0xff]  ;;  %v8780_v35 = vld [vmem:[#allocation11_spill] sm:$0xff] }
 0x663   : > { %v3558_v60 = vadd.f32 %v3542_v56, %v3494_v22  ;;  %v3496_v57 = vadd.f32 %v3480_v36, %v3432_v21  ;;  %v3306_v5 = vadd.f32 %v8768_v46, %v3230_v4  ;;  %v3234_v41 = vadd.f32 %v3233_v0, %v8769_v40  ;;  %v3235_v51 = vpop.f32.mrb[31].mxu1  ;;  %v8774_v56 = vld [vmem:[#allocation38_spill] sm:$0xff]  ;;  %v8779_v7 = vld [vmem:[#allocation32_spill] sm:$0xff] }
 0x664   : > { %v3559_v42 = vadd.f32 %v3543_v43, %v3495_v63  ;;  %v3497_v31 = vadd.f32 %v3481_v16, %v3433_v50  ;;  %v3307_v49 = vadd.f32 %v8770_v52, %v3232_v6  ;;  %v3236_v10 = vadd.f32 %v3235_v51, %v8769_v40  ;;  %v8776_v43 = vld [vmem:[#allocation28_spill] sm:$0xff] }
 0x665   : > { %v7923_v11 = vadd.f32 %v3544_v38, %v3496_v57  ;;  %v3370_v12 = vadd.f32 %v8771_v29, %v3306_v5  ;;  %v3308_v54 = vadd.f32 %v8772_v19, %v3234_v41  ;;  %v3569_v23 = vadd.f32 %v3568_v39, %v3558_v60  ;;  %v3532_v39 = vpop.permute.xlu0 %3531 }
 0x666   : > { %v3561_v36 = vadd.f32 %v3545_v59, %v3497_v31  ;;  %v3371_v20 = vadd.f32 %v8773_v47, %v3307_v49  ;;  %v3309_v53 = vadd.f32 %v8774_v56, %v3236_v10  ;;  %v3582_v48 = vadd.f32 %v3581_v33, %v3559_v42 }
 0x667   : > { %v3482_v16 = vmul.f32 %v7879_v62, %v7461_v27  ;;  %v3434_v17 = vadd.f32 %v8775_v2, %v3370_v12  ;;  %v3372_v37 = vadd.f32 %v8776_v43, %v3308_v54  ;;  %v3570_v28 = vadd.f32 %v3569_v23, %v7923_v11 }
 0x668   : > { %v3435_v14 = vadd.f32 %v8777_v45, %v3371_v20  ;;  %v3373_v38 = vadd.f32 %v8778_v15, %v3309_v53  ;;  %v3583_v22 = vadd.f32 %v3582_v48, %v3561_v36  ;;  %v3484_v33 = vmul.f32 %v3468_v58, %v7461_v27 }
 0x669   : > { %v3546_v8 = vmul.f32 %v3528_v32, %v7464_v61  ;;  %v3498_v21 = vadd.f32 %v3482_v16, %v3434_v17  ;;  %v3436_v4 = vadd.f32 %v8779_v7, %v3372_v37  ;;  %v3485_v55 = vmul.f32 %v3468_v58, %v7469_v26 }
 0x66a   : > { %v3547_v59 = vmul.f32 %v3528_v32, %v7472_v24  ;;  %v3499_v63 = vadd.f32 %v3483_v18, %v3435_v14  ;;  %v3437_v62 = vadd.f32 %v8780_v35, %v3373_v38  ;;  %v3548_v50 = vmul.f32 %v3532_v39, %v7464_v61  ;;  %v7999_v14 = vpop.permute.xlu1 %3675 }
 0x66b   : > { %v3562_v6 = vadd.f32 %v3546_v8, %v3498_v21  ;;  %v3500_v0 = vadd.f32 %v3484_v33, %v3436_v4  ;;  %v3549_v57 = vmul.f32 %v3532_v39, %v7472_v24 }
 0x66c   : > { %v3563_v46 = vadd.f32 %v3547_v59, %v3499_v63  ;;  %v3501_v27 = vadd.f32 %v3485_v55, %v3437_v62 }
 0x66d   : > { %v3564_v5 = vadd.f32 %v3548_v50, %v3500_v0  ;;  %v3571_v40 = vadd.f32 %v3570_v28, %v3562_v6 }
 0x66e   : > { %v3565_v41 = vadd.f32 %v3549_v57, %v3501_v27  ;;  %v3584_v51 = vadd.f32 %v3583_v22, %v3563_v46  ;;  %v3724_v62 = vpop.permute.xlu1 %3723 }
 0x66f   : > { %v3572_v31 = vadd.f32 %v3571_v40, %v3564_v5 }
 0x670   : > { %v3585_v52 = vadd.f32 %v3584_v51, %v3565_v41 }
 0x671   : > { %v3573_v26 = vrot.slane %v3572_v31, 4 }
 0x672   : > { %v3586_v58 = vrot.slane %v3585_v52, 4 }
 0x673   : > { %v3574_v49 = vadd.f32 %v3573_v26, %v3572_v31  ;;  %v3728_v31 = vpop.permute.xlu1 %3727 }
 0x674   : > { %v3587_v10 = vadd.f32 %v3586_v58, %v3585_v52 }
 0x675   : > { %v3575_v29 = vrot.slane %v3574_v49, 2 }
 0x676   : > { %v3588_v12 = vrot.slane %v3587_v10, 2 }
 0x677   : > { %v3576_v19 = vadd.f32 %v3575_v29, %v3574_v49 }
 0x678   : > { %v3589_v61 = vadd.f32 %v3588_v12, %v3587_v10  ;;  %v3688_v12 = vpop.permute.xlu1 %3687 }
 0x679   : > { %v3577_v54 = vrot.slane %v3576_v19, 1 }
 0x67a   : > { %v3590_v23 = vrot.slane %v3589_v61, 1 }
 0x67b   : > { %v3578_v32 = vadd.f32 %v3577_v54, %v3576_v19 }
 0x67c   : > { %v3591_v24 = vadd.f32 %v3590_v23, %v3589_v61 }
 0x67d   : > { %v3592_v47 = vmul.f32 0.015625, %v3578_v32 }
 0x67e   : > { %v3593_v20 = vmul.f32 0.015625, %v3591_v24 }
 0x67f   : > { %v7947_v56 = vsub.f32 %v7895_v34, %v3592_v47  ;;  %v7949_v53 = vsub.f32 %v3558_v60, %v3592_v47  ;;  %v7951_v48 = vsub.f32 %v3564_v5, %v3592_v47  ;;  %v7954_v16 = vsub.f32 %v7848_v30, %v3592_v47 }
 0x680   : > { %v7957_v2 = vsub.f32 %v7900_v44, %v3593_v20  ;;  %v7959_v17 = vsub.f32 %v3559_v42, %v3593_v20  ;;  %v7961_v43 = vsub.f32 %v3565_v41, %v3593_v20  ;;  %v7964_v37 = vsub.f32 %v7852_v9, %v3593_v20 }
 0x681   : > { %v7967_v34 = vsub.f32 %v7856_v1, %v3592_v47  ;;  %v7970_v60 = vsub.f32 %v7862_v13, %v3593_v20  ;;  %v7973_v28 = vsub.f32 %v7887_v25, %v3592_v47  ;;  %v7976_v30 = vsub.f32 %v7891_v3, %v3593_v20 }
 0x682   : > { %v7979_v44 = vsub.f32 %v7923_v11, %v3592_v47  ;;  %v7981_v42 = vsub.f32 %v3561_v36, %v3593_v20  ;;  %v7983_v18 = vsub.f32 %v3562_v6, %v3592_v47  ;;  %v7985_v9 = vsub.f32 %v3563_v46, %v3593_v20  ;;  %v3736_v47 = vpop.permute.xlu1 %3735 }
 0x683   : > { %v3610_v1 = vmul.f32 %v7954_v16, %v7954_v16  ;;  %v3611_v13 = vmul.f32 %v7964_v37, %v7964_v37  ;;  %v3612_v25 = vmul.f32 %v7967_v34, %v7967_v34  ;;  %v3613_v3 = vmul.f32 %v7970_v60, %v7970_v60 }
 0x684   : > { %v3614_v11 = vmul.f32 %v7973_v28, %v7973_v28  ;;  %v3615_v36 = vmul.f32 %v7976_v30, %v7976_v30  ;;  %v3616_v15 = vmul.f32 %v7947_v56, %v7947_v56  ;;  %v3617_v38 = vmul.f32 %v7957_v2, %v7957_v2 }
 0x685   : > { %v3626_v39 = vadd.f32 %v3612_v25, %v3610_v1  ;;  %v3639_v45 = vadd.f32 %v3613_v3, %v3611_v13  ;;  %v3618_v8 = vmul.f32 %v7949_v53, %v7949_v53  ;;  %v3619_v21 = vmul.f32 %v7959_v17, %v7959_v17  ;;  %v8021_v13 = vpop.permute.xlu0 %3731 }
 0x686   : > { %v3620_v55 = vmul.f32 %v7979_v44, %v7979_v44  ;;  %v3621_v59 = vmul.f32 %v7981_v42, %v7981_v42  ;;  %v3622_v50 = vmul.f32 %v7983_v18, %v7983_v18  ;;  %v3623_v6 = vmul.f32 %v7985_v9, %v7985_v9 }
 0x687   : > { %v3627_v22 = vadd.f32 %v3626_v39, %v3614_v11  ;;  %v3640_v33 = vadd.f32 %v3639_v45, %v3615_v36  ;;  %v3624_v46 = vmul.f32 %v7951_v48, %v7951_v48  ;;  %v3625_v27 = vmul.f32 %v7961_v43, %v7961_v43  ;;  %v3692_v11 = vpop.permute.xlu1 %3691 }
 0x689   : > { %v3628_v7 = vadd.f32 %v3627_v22, %v3616_v15  ;;  %v3641_v4 = vadd.f32 %v3640_v33, %v3617_v38  ;;  %v3680_v36 = vpop.permute.xlu0 %3679 }
 0x68b   : > { %v3629_v63 = vadd.f32 %v3628_v7, %v3618_v8  ;;  %v3642_v35 = vadd.f32 %v3641_v4, %v3619_v21  ;;  %v3740_v39 = vpop.permute.xlu1 %3739 }
 0x68d   : > { %v3630_v0 = vadd.f32 %v3629_v63, %v3620_v55  ;;  %v3643_v57 = vadd.f32 %v3642_v35, %v3621_v59  ;;  %v3684_v45 = vpop.permute.xlu0 %3683 }
 0x68f   : > { %v3631_v5 = vadd.f32 %v3630_v0, %v3622_v50  ;;  %v3644_v40 = vadd.f32 %v3643_v57, %v3623_v6 }
 0x691   : > { %v3632_v41 = vadd.f32 %v3631_v5, %v3624_v46  ;;  %v3645_v51 = vadd.f32 %v3644_v40, %v3625_v27  ;;  %v3696_v0 = vpop.permute.xlu0 %3695 }
 0x693   : > { %v3633_v52 = vrot.slane %v3632_v41, 4  ;;  %v3646_v26 = vrot.slane %v3645_v51, 4 }
 0x695   : > { %v3634_v58 = vadd.f32 %v3633_v52, %v3632_v41  ;;  %v3647_v49 = vadd.f32 %v3646_v26, %v3645_v51 }
 0x697   : > { %v3635_v10 = vrot.slane %v3634_v58, 2  ;;  %v3648_v29 = vrot.slane %v3647_v49, 2 }
 0x699   : > { %v3636_v19 = vadd.f32 %v3635_v10, %v3634_v58  ;;  %v3649_v61 = vadd.f32 %v3648_v29, %v3647_v49  ;;  %v3700_v49 = vpop.permute.xlu0 %3699 }
 0x69b   : > { %v3637_v54 = vrot.slane %v3636_v19, 1  ;;  %v3650_v23 = vrot.slane %v3649_v61, 1 }
 0x69d   : > { %v3638_v32 = vadd.f32 %v3637_v54, %v3636_v19  ;;  %v3651_v24 = vadd.f32 %v3650_v23, %v3649_v61 }
 0x69f   : > { %v3652_v20 = vmul.f32 0.015625, %v3638_v32  ;;  %v3653_v1 = vmul.f32 0.015625, %v3651_v24 }
 0x6a1   : > { %v3654_v25 = vadd.f32 1e-05, %v3652_v20  ;;  %v3655_v3 = vadd.f32 1e-05, %v3653_v1 }
 0x6a3   : > { %5207 = vrsqrt.f32 %v3654_v25 }
 0x6a4   : > { %5209 = vrsqrt.f32 %v3655_v3 }
 0x6ad   : > { %v5208_v15 = vpop.eup %5207 }
 0x6ae   : > { %v5210_v38 = vpop.eup %5209  ;;  %v3658_v22 = vmul.f32 %v5208_v15, %v7954_v16  ;;  %v3664_v33 = vmul.f32 %v5208_v15, %v7947_v56  ;;  %v3666_v8 = vmul.f32 %v5208_v15, %v7949_v53  ;;  %v3660_v21 = vmul.f32 %v5208_v15, %v7967_v34  ;;  %v8032_v16 = vpop.permute.xlu1 %3743 }
 0x6af   : > { %v3659_v7 = vmul.f32 %v5210_v38, %v7964_v37  ;;  %v3665_v4 = vmul.f32 %v5210_v38, %v7957_v2  ;;  %v3667_v55 = vmul.f32 %v5210_v38, %v7959_v17  ;;  %v3661_v59 = vmul.f32 %v5210_v38, %v7970_v60 }
 0x6b0   : > { %v3706_v63 = vmul.f32 %v7999_v14, %v3658_v22  ;;  %v3712_v35 = vmul.f32 %v3688_v12, %v3664_v33  ;;  %v3714_v50 = vmul.f32 %v3692_v11, %v3666_v8  ;;  %v3708_v6 = vmul.f32 %v3680_v36, %v3660_v21  ;;  %v3748_v22 = vpop.permute.xlu0 %3747 }
 0x6b1   : > { %v3707_v56 = vmul.f32 %v7999_v14, %v3659_v7  ;;  %v3713_v53 = vmul.f32 %v3688_v12, %v3665_v4  ;;  %v3709_v2 = vmul.f32 %v3680_v36, %v3661_v59  ;;  %v3662_v46 = vmul.f32 %v5208_v15, %v7973_v28 }
 0x6b2   : > { %v8035_v34 = vadd.f32 %v3724_v62, %v3706_v63  ;;  %v8037_v37 = vadd.f32 %v3736_v47, %v3712_v35  ;;  %v8039_v57 = vadd.f32 %v3728_v31, %v3708_v6  ;;  %v8041_v17 = vadd.f32 %v3740_v39, %v3714_v50  ;;  %v3704_v52 = vpop.permute.xlu1 %3703 }
 0x6b3   : > { %v8043_v60 = vadd.f32 %v3724_v62, %v3707_v56  ;;  %v8047_v5 = vadd.f32 %v3736_v47, %v3713_v53  ;;  %v3715_v14 = vmul.f32 %v3692_v11, %v3667_v55  ;;  %v3663_v40 = vmul.f32 %v5210_v38, %v7976_v30 }
 0x6b4   : > { %v3786_v27 = vmul.f32 0.044715, %v8035_v34  ;;  %v3792_v41 = vmul.f32 0.044715, %v8037_v37  ;;  %v8051_v51 = vadd.f32 %v3728_v31, %v3709_v2  ;;  %v3788_v26 = vmul.f32 0.044715, %v8039_v57 }
 0x6b5   : > { %v3794_v58 = vmul.f32 0.044715, %v8041_v17  ;;  %v3710_v62 = vmul.f32 %v3684_v45, %v3662_v46  ;;  %v3787_v28 = vmul.f32 0.044715, %v8043_v60  ;;  %v3793_v29 = vmul.f32 0.044715, %v8047_v5 }
 0x6b6   : > { %v3802_v10 = vmul.f32 %v3786_v27, %v8035_v34  ;;  %v8058_v12 = vadd.f32 %v3740_v39, %v3715_v14  ;;  %v3668_v30 = vmul.f32 %v5208_v15, %v7979_v44  ;;  %v3808_v31 = vmul.f32 %v3792_v41, %v8037_v37  ;;  %v3752_v3 = vpop.permute.xlu1 %3751 }
 0x6b7   : > { %v3789_v19 = vmul.f32 0.044715, %v8051_v51  ;;  %v8064_v61 = vadd.f32 %v8021_v13, %v3710_v62  ;;  %v3669_v54 = vmul.f32 %v5210_v38, %v7981_v42  ;;  %v3804_v23 = vmul.f32 %v3788_v26, %v8039_v57 }
 0x6b8   : > { %v3810_v32 = vmul.f32 %v3794_v58, %v8041_v17  ;;  %v3716_v24 = vmul.f32 %v3696_v0, %v3668_v30  ;;  %v3672_v47 = vmul.f32 %v5208_v15, %v7951_v48  ;;  %v3803_v20 = vmul.f32 %v3787_v28, %v8043_v60 }
 0x6b9   : > { %v3711_v1 = vmul.f32 %v3684_v45, %v3663_v40  ;;  %v3673_v44 = vmul.f32 %v5210_v38, %v7961_v43  ;;  %v3670_v25 = vmul.f32 %v5208_v15, %v7983_v18  ;;  %v3818_v11 = vmul.f32 %v3802_v10, %v8035_v34 }
 0x6ba   : > { %v3795_v36 = vmul.f32 0.044715, %v8058_v12  ;;  %v8076_v42 = vadd.f32 %v8032_v16, %v3716_v24  ;;  %v3720_v39 = vmul.f32 %v3704_v52, %v3672_v47  ;;  %v3824_v33 = vmul.f32 %v3808_v31, %v8037_v37 }
 0x6bb   : > { %v3790_v48 = vmul.f32 0.044715, %v8064_v61  ;;  %v3671_v45 = vmul.f32 %v5210_v38, %v7985_v9  ;;  %v3718_v8 = vmul.f32 %v3700_v49, %v3670_v25  ;;  %v3809_v43 = vmul.f32 %v3793_v29, %v8047_v5 }
 0x6bc   : > { %v3820_v18 = vmul.f32 %v3804_v23, %v8039_v57  ;;  %v3826_v15 = vmul.f32 %v3810_v32, %v8041_v17  ;;  %v8084_v21 = vadd.f32 %v3752_v3, %v3720_v39  ;;  %v8087_v7 = vadd.f32 %v8021_v13, %v3711_v1 }
 0x6bd   : > { %v3717_v4 = vmul.f32 %v3696_v0, %v3669_v54  ;;  %v3721_v55 = vmul.f32 %v3704_v52, %v3673_v44  ;;  %v8089_v59 = vadd.f32 %v3748_v22, %v3718_v8  ;;  %v3811_v63 = vmul.f32 %v3795_v36, %v8058_v12 }
 0x6be   : > { %v3796_v9 = vmul.f32 0.044715, %v8076_v42  ;;  %v3719_v38 = vmul.f32 %v3700_v49, %v3671_v45  ;;  %v3805_v35 = vmul.f32 %v3789_v19, %v8051_v51  ;;  %v3834_v50 = vadd.f32 %v3818_v11, %v8035_v34 }
 0x6bf   : > { %v3840_v6 = vadd.f32 %v3824_v33, %v8037_v37  ;;  %v3806_v56 = vmul.f32 %v3790_v48, %v8064_v61  ;;  %v3819_v13 = vmul.f32 %v3803_v20, %v8043_v60  ;;  %v3842_v53 = vadd.f32 %v3826_v15, %v8041_v17 }
 0x6c0   : > { %v3800_v0 = vmul.f32 0.044715, %v8084_v21  ;;  %v3798_v2 = vmul.f32 0.044715, %v8089_v59  ;;  %v3821_v46 = vmul.f32 %v3805_v35, %v8051_v51  ;;  %v3791_v27 = vmul.f32 0.044715, %v8087_v7 }
 0x6c1   : > { %v8104_v14 = vadd.f32 %v8032_v16, %v3717_v4  ;;  %v8106_v40 = vadd.f32 %v3752_v3, %v3721_v55  ;;  %v3835_v41 = vadd.f32 %v3819_v13, %v8043_v60  ;;  %v3812_v52 = vmul.f32 %v3796_v9, %v8076_v42 }
 0x6c2   : > { %v8110_v26 = vadd.f32 %v3748_v22, %v3719_v38  ;;  %v3837_v58 = vadd.f32 %v3821_v46, %v8051_v51  ;;  %v3836_v62 = vadd.f32 %v3820_v18, %v8039_v57  ;;  %v3822_v49 = vmul.f32 %v3806_v56, %v8064_v61 }
 0x6c3   : > { %v8116_v28 = vmul.f32 0.5, %v8043_v60  ;;  %v3851_v10 = vmul.f32 0.7978846, %v3835_v41  ;;  %v3850_v16 = vmul.f32 0.7978846, %v3834_v50  ;;  %v3816_v29 = vmul.f32 %v3800_v0, %v8084_v21 }
 0x6c4   : > { %v3814_v30 = vmul.f32 %v3798_v2, %v8089_v59  ;;  %v3853_v31 = vmul.f32 0.7978846, %v3837_v58  ;;  %v3852_v19 = vmul.f32 0.7978846, %v3836_v62  ;;  %v3797_v54 = vmul.f32 0.044715, %v8104_v14 }
 0x6c5   : > { %v3801_v23 = vmul.f32 0.044715, %v8106_v40  ;;  %5211 = vtanh.f32 %v3851_v10  ;;  %v3807_v32 = vmul.f32 %v3791_v27, %v8087_v7  ;;  %v3828_v24 = vmul.f32 %v3812_v52, %v8076_v42 }
 0x6c6   : > { %v3799_v60 = vmul.f32 0.044715, %v8110_v26  ;;  %5213 = vtanh.f32 %v3853_v31  ;;  %v3825_v47 = vmul.f32 %v3809_v43, %v8047_v5  ;;  %v3838_v1 = vadd.f32 %v3822_v49, %v8064_v61 }
 0x6c7   : > { %5215 = vtanh.f32 %v3850_v16  ;;  %v3823_v20 = vmul.f32 %v3807_v32, %v8087_v7  ;;  %v3856_v44 = vmul.f32 0.7978846, %v3840_v6  ;;  %v3832_v25 = vmul.f32 %v3816_v29, %v8084_v21 }
 0x6c8   : > { %v3830_v3 = vmul.f32 %v3814_v30, %v8089_v59  ;;  %5217 = vtanh.f32 %v3852_v19  ;;  %v3841_v11 = vadd.f32 %v3825_v47, %v8047_v5  ;;  %v3854_v39 = vmul.f32 0.7978846, %v3838_v1 }
 0x6c9   : > { %v3839_v36 = vadd.f32 %v3823_v20, %v8087_v7  ;;  %5219 = vtanh.f32 %v3856_v44  ;;  %v3813_v22 = vmul.f32 %v3797_v54, %v8104_v14  ;;  %v3817_v33 = vmul.f32 %v3801_v23, %v8106_v40 }
 0x6ca   : > { %v3815_v48 = vmul.f32 %v3799_v60, %v8110_v26  ;;  %v3857_v45 = vmul.f32 0.7978846, %v3841_v11  ;;  %v3827_v8 = vmul.f32 %v3811_v63, %v8058_v12  ;;  %5221 = vtanh.f32 %v3854_v39 }
 0x6cb   : > { %v3855_v43 = vmul.f32 0.7978846, %v3839_v36  ;;  %v3829_v18 = vmul.f32 %v3813_v22, %v8104_v14  ;;  %v3844_v15 = vadd.f32 %v3828_v24, %v8076_v42  ;;  %v3848_v4 = vadd.f32 %v3832_v25, %v8084_v21 }
 0x6cc   : > { %5223 = vtanh.f32 %v3857_v45  ;;  %v3843_v55 = vadd.f32 %v3827_v8, %v8058_v12  ;;  %v3858_v9 = vmul.f32 0.7978846, %v3842_v53  ;;  %v3846_v38 = vadd.f32 %v3830_v3, %v8089_v59 }
 0x6cd   : > { %5225 = vtanh.f32 %v3855_v43  ;;  %v3845_v35 = vadd.f32 %v3829_v18, %v8104_v14  ;;  %v3860_v50 = vmul.f32 0.7978846, %v3844_v15  ;;  %v3831_v63 = vmul.f32 %v3815_v48, %v8110_v26 }
 0x6ce   : > { %v3859_v6 = vmul.f32 0.7978846, %v3843_v55  ;;  %5227 = vtanh.f32 %v3858_v9  ;;  %v3833_v56 = vmul.f32 %v3817_v33, %v8106_v40  ;;  %v3773_v0 = vmul.f32 0.5, %v8051_v51 }
 0x6cf   : > { %v5212_v13 = vpop.eup %5211  ;;  %v3770_v2 = vmul.f32 0.5, %v8035_v34  ;;  %v3861_v46 = vmul.f32 0.7978846, %v3845_v35  ;;  %5229 = vtanh.f32 %v3860_v50  ;;  %v3847_v41 = vadd.f32 %v3831_v63, %v8110_v26 }
 0x6d0   : > { %v5214_v53 = vpop.eup %5213  ;;  %v3883_v27 = vadd.f32 1.0, %v5212_v13  ;;  %5231 = vtanh.f32 %v3859_v6  ;;  %v3849_v52 = vadd.f32 %v3833_v56, %v8106_v40  ;;  %v3862_v49 = vmul.f32 0.7978846, %v3846_v38 }
 0x6d1   : > { %v5216_v58 = vpop.eup %5215  ;;  %v3885_v62 = vadd.f32 1.0, %v5214_v53  ;;  %5233 = vtanh.f32 %v3861_v46  ;;  %v3864_v10 = vmul.f32 0.7978846, %v3848_v4  ;;  %v3863_v34 = vmul.f32 0.7978846, %v3847_v41 }
 0x6d2   : > { %v5218_v16 = vpop.eup %5217  ;;  %v8149_v29 = vmul.f32 %v3883_v27, %v8116_v28  ;;  %v3882_v51 = vadd.f32 1.0, %v5216_v58  ;;  %v3865_v30 = vmul.f32 0.7978846, %v3849_v52  ;;  %v3772_v54 = vmul.f32 0.5, %v8039_v57 }
 0x6d3   : > { %v5220_v31 = vpop.eup %5219  ;;  %v8151_v19 = vmul.f32 %v3885_v62, %v3773_v0  ;;  %v3884_v23 = vadd.f32 1.0, %v5218_v16  ;;  %5235 = vtanh.f32 %v3862_v49  ;;  %v3777_v1 = vmul.f32 0.5, %v8047_v5 }
 0x6d4   : > { %v8154_v32 = vmul.f32 %v3882_v51, %v3770_v2  ;;  %5237 = vtanh.f32 %v3863_v34  ;;  %v5222_v24 = vpop.eup %5221  ;;  %v3888_v28 = vadd.f32 1.0, %v5220_v31  ;;  %v3774_v11 = vmul.f32 0.5, %v8064_v61  ;;  %v4949_v34 = vld [vmem:[%s8516_s7 + $0x20] sm:$0xff]   ;;  %v4950_v31 = vld [vmem:[%s8516_s7 + $0x28] sm:$0xff]  }
 0x6d5   : > { %v3924_v60 = vpack.c.bf16 %v8151_v19, %v8149_v29  ;;  %v8158_v47 = vmul.f32 %v3884_v23, %v3772_v54  ;;  %5239 = vtanh.f32 %v3865_v30  ;;  %v3886_v44 = vadd.f32 1.0, %v5222_v24  ;;  %v4951_v54 = vld [vmem:[%s8516_s7 + $0x30] sm:$0xff]   ;;  %v4952_v23 = vld [vmem:[%s8516_s7 + $0x38] sm:$0xff]   ;;  %v3933_v24 = vpop.permute.xlu1 %3932 }
 0x6d6   : > { %v5224_v20 = vpop.eup %5223  ;;  %5241 = vtanh.f32 %v3864_v10  ;;  %v3776_v36 = vmul.f32 0.5, %v8037_v37  ;;  %v3775_v22 = vmul.f32 0.5, %v8087_v7  ;;  %v3779_v37 = vmul.f32 0.5, %v8058_v12 }
 0x6d7   : > { %v5226_v25 = vpop.eup %5225  ;;  %3995 = vmatprep.subr.bf16.mxu0 %v3924_v60  ;;  %v3923_v57 = vpack.c.bf16 %v8158_v47, %v8154_v32  ;;  %v3889_v3 = vadd.f32 1.0, %v5224_v20  ;;  %v8168_v5 = vmul.f32 %v3886_v44, %v3774_v11  ;;  %v3778_v7 = vmul.f32 0.5, %v8041_v17 }
 0x6d8   : > { %v5228_v39 = vpop.eup %5227  ;;  %v3887_v33 = vadd.f32 1.0, %v5226_v25  ;;  %v8170_v8 = vmul.f32 %v3888_v28, %v3776_v36  ;;  %v3780_v9 = vmul.f32 0.5, %v8076_v42  ;;  %v3781_v35 = vmul.f32 0.5, %v8104_v14  ;;  %v3937_v28 = vpop.permute.xlu0 %3936 }
 0x6d9   : > { %v5230_v48 = vpop.eup %5229  ;;  %3996 = vmatpush1.bf16.msra.mxu0 %v3923_v57  ;;  %v8166_v45 = vmul.f32 %v3889_v3, %v3777_v1  ;;  %v3890_v43 = vadd.f32 1.0, %v5228_v39  ;;  %v3783_v14 = vmul.f32 0.5, %v8110_v26  ;;  %v3782_v53 = vmul.f32 0.5, %v8089_v59  ;;  %v3941_v3 = vpop.permute.xlu1 %3940 }
 0x6da   : > { %v5232_v18 = vpop.eup %5231  ;;  %v8172_v15 = vmul.f32 %v3887_v33, %v3775_v22  ;;  %v3892_v4 = vadd.f32 1.0, %v5230_v48  ;;  %v3925_v63 = vpack.c.bf16 %v8170_v8, %v8168_v5  ;;  %v3785_v52 = vmul.f32 0.5, %v8106_v40 }
 0x6db   : > { %v5234_v61 = vpop.eup %5233  ;;  %v3891_v55 = vadd.f32 1.0, %v5232_v18  ;;  %v8184_v13 = vmul.f32 %v3890_v43, %v3778_v7  ;;  %v3784_v62 = vmul.f32 0.5, %v8084_v21  ;;  %v8781_v30 = vmov 0  }
 0x6dc   : > { %v3926_v38 = vpack.c.bf16 %v8166_v45, %v8172_v15  ;;  %v3893_v50 = vadd.f32 1.0, %v5234_v61  ;;  %v8186_v12 = vmul.f32 %v3892_v4, %v3780_v9 }
 0x6dd   : > { %v5236_v6 = vpop.eup %5235  ;;  %v8182_v56 = vmul.f32 %v3891_v55, %v3779_v37  ;;  %v3945_v18 = vpop.permute.xlu1 %3944 }
 0x6de   : > { %v5238_v0 = vpop.eup %5237  ;;  %3997 = vmatprep.subr.bf16.mxu0 %v3926_v38  ;;  %v8188_v17 = vmul.f32 %v3893_v50, %v3781_v35  ;;  %v3894_v42 = vadd.f32 1.0, %v5236_v6  ;;  %v3927_v49 = vpack.c.bf16 %v8186_v12, %v8184_v13  ;;  %v3949_v6 = vpop.permute.xlu0 %3948 }
 0x6df   : > { %v5240_v2 = vpop.eup %5239  ;;  %3998 = vmatpush1.bf16.msra.mxu0 %v3925_v63  ;;  %v3895_v46 = vadd.f32 1.0, %v5238_v0 }
 0x6e0   : > { %v5242_v27 = vpop.eup %5241  ;;  %v3928_v41 = vpack.c.bf16 %v8188_v17, %v8182_v56  ;;  %v3897_v58 = vadd.f32 1.0, %v5240_v2  ;;  %v8200_v51 = vmul.f32 %v3894_v42, %v3782_v53 }
 0x6e1   : > { %v8198_v10 = vmul.f32 %v3895_v46, %v3783_v14  ;;  %v3896_v16 = vadd.f32 1.0, %v5242_v27  ;;  %v3953_v2 = vpop.permute.xlu1 %3952 }
 0x6e2   : > { %3999 = vmatprep.subr.bf16.mxu0 %v3928_v41  ;;  %v8202_v26 = vmul.f32 %v3897_v58, %v3785_v52 }
 0x6e3   : > { %4000 = vmatpush1.bf16.msra.mxu0 %v3927_v49  ;;  %v8204_v59 = vmul.f32 %v3896_v16, %v3784_v62  ;;  %v3957_v16 = vpop.permute.xlu0 %3956 }
 0x6e4   : > { %v3930_v40 = vpack.c.bf16 %v8202_v26, %v8198_v10 }
 0x6e5   : > { %v3929_v21 = vpack.c.bf16 %v8204_v59, %v8200_v51 }
 0x6e6   : > { %4001 = vmatprep.subr.bf16.mxu0 %v3930_v40 }
 0x6e7   : > { %4002 = vmatpush1.bf16.msra.mxu0 %v3929_v21 }
 0x6ea   : > { %4746 = vmatmul.mubr.msk.bf16.vlgmr.msra.gmra.mrb[20].mxu0 %vm1305_vm5, %v4949_v34 }
 0x6eb   : > { %4037 = vmatprep.mubr.bf16.mxu0 %v8781_v30 }
 0x6f2   : > { %4747 = vmatmul.mubr.msk.bf16.gmra.mrb[24].mxu0 %vm1305_vm5, %v4950_v31 }
 0x6f3   : > { %4047 = vmatprep.mubr.bf16.mxu0 %v8781_v30 }
 0x6fa   : > { %4748 = vmatmul.mubr.msk.bf16.gmra.mrb[28].mxu0 %vm1305_vm5, %v4951_v54 }
 0x6fb   : > { %4057 = vmatprep.mubr.bf16.mxu0 %v8781_v30  ;;  %v3961_v30 = vpop.permute.xlu1 %3960 }
 0x702   : > { %4749 = vmatmul.mubr.msk.bf16.gmra.mrb[32].mxu0 %vm1305_vm5, %v4952_v23 }
 0x7bd   : > { %v4029_v60 = vpop.f32.mrb[20].mxu0 }
 0x7be   : > { %v4031_v20 = vpop.f32.mrb[21].mxu0  ;;  %v8229_v44 = vadd.f32 %v4029_v60, %v3933_v24 }
 0x7bf   : > { %v4033_v1 = vpop.f32.mrb[22].mxu0  ;;  %v8233_v11 = vadd.f32 %v4031_v20, %v3933_v24 }
 0x7c0   : > { %v8231_v25 = vadd.f32 %v4033_v1, %v3937_v28  ;;  %v4035_v57 = vpop.f32.mrb[23].mxu0 }
 0x7c1   : > { %v8235_v36 = vadd.f32 %v4035_v57, %v3937_v28 }
 0x7c2   : > { %v4068_v39 = vadd.f32 %v8231_v25, %v8229_v44 }
 0x7c3   : > { %v4081_v22 = vadd.f32 %v8235_v36, %v8233_v11 }
 0x7c5   : > { %v4039_v33 = vpop.f32.mrb[24].mxu0 }
 0x7c6   : > { %v4040_v48 = vadd.f32 %v4039_v33, %v3941_v3  ;;  %v4041_v43 = vpop.f32.mrb[25].mxu0 }
 0x7c7   : > { %v4042_v4 = vadd.f32 %v4041_v43, %v3941_v3  ;;  %v4043_v61 = vpop.f32.mrb[26].mxu0 }
 0x7c8   : > { %v4069_v37 = vadd.f32 %v4068_v39, %v4040_v48  ;;  %v4044_v55 = vadd.f32 %v4043_v61, %v3945_v18  ;;  %v4045_v7 = vpop.f32.mrb[27].mxu0 }
 0x7c9   : > { %v4082_v9 = vadd.f32 %v4081_v22, %v4042_v4  ;;  %v4046_v38 = vadd.f32 %v4045_v7, %v3945_v18 }
 0x7ca   : > { %v4070_v35 = vadd.f32 %v4069_v37, %v4044_v55 }
 0x7cb   : > { %v4083_v50 = vadd.f32 %v4082_v9, %v4046_v38 }
 0x7cd   : > { %v4049_v63 = vpop.f32.mrb[28].mxu0 }
 0x7ce   : > { %v4050_v0 = vadd.f32 %v4049_v63, %v3949_v6  ;;  %v4051_v42 = vpop.f32.mrb[29].mxu0 }
 0x7cf   : > { %v4052_v14 = vadd.f32 %v4051_v42, %v3949_v6  ;;  %v4053_v46 = vpop.f32.mrb[30].mxu0 }
 0x7d0   : > { %v4071_v53 = vadd.f32 %v4070_v35, %v4050_v0  ;;  %v4054_v27 = vadd.f32 %v4053_v46, %v3953_v2  ;;  %v4055_v41 = vpop.f32.mrb[31].mxu0 }
 0x7d1   : > { %v4084_v52 = vadd.f32 %v4083_v50, %v4052_v14  ;;  %v4056_v58 = vadd.f32 %v4055_v41, %v3953_v2 }
 0x7d2   : > { %v4072_v62 = vadd.f32 %v4071_v53, %v4054_v27 }
 0x7d3   : > { %v4085_v49 = vadd.f32 %v4084_v52, %v4056_v58 }
 0x7d5   : > { %v4059_v40 = vpop.f32.mrb[32].mxu0 }
 0x7d6   : > { %v4060_v21 = vadd.f32 %v4059_v40, %v3957_v16  ;;  %v4061_v34 = vpop.f32.mrb[33].mxu0 }
 0x7d7   : > { %v4062_v31 = vadd.f32 %v4061_v34, %v3957_v16  ;;  %v4063_v54 = vpop.f32.mrb[34].mxu0 }
 0x7d8   : > { %v4073_v23 = vadd.f32 %v4072_v62, %v4060_v21  ;;  %v4064_v24 = vadd.f32 %v4063_v54, %v3961_v30  ;;  %v4065_v60 = vpop.f32.mrb[35].mxu0 }
 0x7d9   : > { %v4086_v28 = vadd.f32 %v4085_v49, %v4062_v31  ;;  %v4066_v20 = vadd.f32 %v4065_v60, %v3961_v30 }
 0x7da   : > { %v4074_v1 = vadd.f32 %v4073_v23, %v4064_v24 }
 0x7db   : > { %v4087_v57 = vadd.f32 %v4086_v28, %v4066_v20 }
 0x7dc   : > { %v4075_v3 = vrot.slane %v4074_v1, 4 }
 0x7dd   : > { %v4088_v39 = vrot.slane %v4087_v57, 4 }
 0x7de   : > { %v4076_v22 = vadd.f32 %v4075_v3, %v4074_v1 }
 0x7df   : > { %v4089_v33 = vadd.f32 %v4088_v39, %v4087_v57 }
 0x7e0   : > { %v4077_v43 = vrot.slane %v4076_v22, 2 }
 0x7e1   : > { %v4090_v18 = vrot.slane %v4089_v33, 2 }
 0x7e2   : > { %v4078_v61 = vadd.f32 %v4077_v43, %v4076_v22 }
 0x7e3   : > { %v4091_v37 = vadd.f32 %v4090_v18, %v4089_v33 }
 0x7e4   : > { %v4079_v7 = vrot.slane %v4078_v61, 1 }
 0x7e5   : > { %v4092_v9 = vrot.slane %v4091_v37, 1 }
 0x7e6   : > { %v4080_v35 = vadd.f32 %v4079_v7, %v4078_v61 }
 0x7e7   : > { %v4093_v50 = vadd.f32 %v4092_v9, %v4091_v37 }
 0x7e8   : > { %v4094_v6 = vmul.f32 0.015625, %v4080_v35 }
 0x7e9   : > { %v4095_v63 = vmul.f32 0.015625, %v4093_v50 }
 0x7ea   : > { %v8241_v42 = vsub.f32 %v4040_v48, %v4094_v6  ;;  %v8243_v2 = vsub.f32 %v4044_v55, %v4094_v6  ;;  %v8245_v46 = vsub.f32 %v4064_v24, %v4094_v6  ;;  %v8248_v53 = vsub.f32 %v8229_v44, %v4094_v6  ;;  %v8293_v24 = vpop.permute.xlu1 %4181 }
 0x7eb   : > { %v8250_v41 = vsub.f32 %v4042_v4, %v4095_v63  ;;  %v8252_v52 = vsub.f32 %v4046_v38, %v4095_v63  ;;  %v8254_v62 = vsub.f32 %v4066_v20, %v4095_v63  ;;  %v8257_v49 = vsub.f32 %v8233_v11, %v4095_v63 }
 0x7ec   : > { %v8260_v16 = vsub.f32 %v8231_v25, %v4094_v6  ;;  %v8263_v48 = vsub.f32 %v8235_v36, %v4095_v63  ;;  %v8265_v55 = vsub.f32 %v4050_v0, %v4094_v6  ;;  %v8267_v40 = vsub.f32 %v4052_v14, %v4095_v63 }
 0x7ed   : > { %v8269_v44 = vsub.f32 %v4054_v27, %v4094_v6  ;;  %v8271_v4 = vsub.f32 %v4056_v58, %v4095_v63  ;;  %v8273_v38 = vsub.f32 %v4060_v21, %v4094_v6  ;;  %v8275_v34 = vsub.f32 %v4062_v31, %v4095_v63 }
 0x7ee   : > { %v4112_v11 = vmul.f32 %v8248_v53, %v8248_v53  ;;  %v4113_v25 = vmul.f32 %v8257_v49, %v8257_v49  ;;  %v4114_v36 = vmul.f32 %v8260_v16, %v8260_v16  ;;  %v4115_v0 = vmul.f32 %v8263_v48, %v8263_v48  ;;  %v4226_v50 = vpop.permute.xlu1 %4225 }
 0x7ef   : > { %v4116_v14 = vmul.f32 %v8241_v42, %v8241_v42  ;;  %v4117_v27 = vmul.f32 %v8250_v41, %v8250_v41  ;;  %v4118_v30 = vmul.f32 %v8243_v2, %v8243_v2  ;;  %v4119_v31 = vmul.f32 %v8252_v52, %v8252_v52 }
 0x7f0   : > { %v4128_v58 = vadd.f32 %v4114_v36, %v4112_v11  ;;  %v4141_v21 = vadd.f32 %v4115_v0, %v4113_v25  ;;  %v4120_v60 = vmul.f32 %v8265_v55, %v8265_v55  ;;  %v4121_v28 = vmul.f32 %v8267_v40, %v8267_v40 }
 0x7f1   : > { %v4122_v57 = vmul.f32 %v8269_v44, %v8269_v44  ;;  %v4123_v3 = vmul.f32 %v8271_v4, %v8271_v4  ;;  %v4124_v33 = vmul.f32 %v8273_v38, %v8273_v38  ;;  %v4125_v43 = vmul.f32 %v8275_v34, %v8275_v34 }
 0x7f2   : > { %v4129_v54 = vadd.f32 %v4128_v58, %v4116_v14  ;;  %v4142_v23 = vadd.f32 %v4141_v21, %v4117_v27  ;;  %v4126_v37 = vmul.f32 %v8245_v46, %v8245_v46  ;;  %v4127_v7 = vmul.f32 %v8254_v62, %v8254_v62  ;;  %v4186_v14 = vpop.permute.xlu1 %4185 }
 0x7f4   : > { %v4130_v20 = vadd.f32 %v4129_v54, %v4118_v30  ;;  %v4143_v1 = vadd.f32 %v4142_v23, %v4119_v31 }
 0x7f6   : > { %v4131_v39 = vadd.f32 %v4130_v20, %v4120_v60  ;;  %v4144_v22 = vadd.f32 %v4143_v1, %v4121_v28  ;;  %v4190_v23 = vpop.permute.xlu1 %4189 }
 0x7f8   : > { %v4132_v18 = vadd.f32 %v4131_v39, %v4122_v57  ;;  %v4145_v61 = vadd.f32 %v4144_v22, %v4123_v3  ;;  %v4178_v22 = vpop.permute.xlu0 %4177 }
 0x7fa   : > { %v4133_v9 = vadd.f32 %v4132_v18, %v4124_v33  ;;  %v4146_v35 = vadd.f32 %v4145_v61, %v4125_v43  ;;  %v4238_v39 = vpop.permute.xlu1 %4237 }
 0x7fc   : > { %v4134_v6 = vadd.f32 %v4133_v9, %v4126_v37  ;;  %v4147_v63 = vadd.f32 %v4146_v35, %v4127_v7  ;;  %v4194_v43 = vpop.permute.xlu0 %4193 }
 0x7fe   : > { %v4135_v11 = vrot.slane %v4134_v6, 4  ;;  %v4148_v25 = vrot.slane %v4147_v63, 4  ;;  %v4198_v33 = vpop.permute.xlu1 %4197 }
 0x800   : > { %v4136_v36 = vadd.f32 %v4135_v11, %v4134_v6  ;;  %v4149_v0 = vadd.f32 %v4148_v25, %v4147_v63 }
 0x802   : > { %v4137_v27 = vrot.slane %v4136_v36, 2  ;;  %v4150_v58 = vrot.slane %v4149_v0, 2  ;;  %v4242_v61 = vpop.permute.xlu1 %4241 }
 0x804   : > { %v4138_v21 = vadd.f32 %v4137_v27, %v4136_v36  ;;  %v4151_v30 = vadd.f32 %v4150_v58, %v4149_v0  ;;  %v4230_v0 = vpop.permute.xlu0 %4229 }
 0x806   : > { %v4139_v31 = vrot.slane %v4138_v21, 1  ;;  %v4152_v54 = vrot.slane %v4151_v30, 1 }
 0x808   : > { %v4140_v60 = vadd.f32 %v4139_v31, %v4138_v21  ;;  %v4153_v28 = vadd.f32 %v4152_v54, %v4151_v30  ;;  %v4202_v54 = vpop.permute.xlu1 %4201 }
 0x80a   : > { %v4154_v20 = vmul.f32 0.015625, %v4140_v60  ;;  %v4155_v1 = vmul.f32 0.015625, %v4153_v28 }
 0x80c   : > { %v4156_v57 = vadd.f32 1e-05, %v4154_v20  ;;  %v4157_v3 = vadd.f32 1e-05, %v4155_v1 }
 0x80e   : > { %5243 = vrsqrt.f32 %v4156_v57 }
 0x80f   : > { %5245 = vrsqrt.f32 %v4157_v3 }
 0x818   : > { %v8311_v18 = vpop.eup %5243 }
 0x819   : > { %v8313_v37 = vpop.eup %5245  ;;  %v4162_v7 = vmul.f32 %v8311_v18, %v8260_v16  ;;  %v4164_v9 = vmul.f32 %v8311_v18, %v8241_v42  ;;  %v4166_v35 = vmul.f32 %v8311_v18, %v8243_v2  ;;  %v4160_v6 = vmul.f32 %v8311_v18, %v8248_v53 }
 0x81a   : > { %v4163_v63 = vmul.f32 %v8313_v37, %v8263_v48  ;;  %v4165_v11 = vmul.f32 %v8313_v37, %v8250_v41  ;;  %v4167_v25 = vmul.f32 %v8313_v37, %v8252_v52  ;;  %v4161_v16 = vmul.f32 %v8313_v37, %v8257_v49 }
 0x81b   : > { %v4214_v36 = vmul.f32 %v4190_v23, %v4166_v35  ;;  %v4208_v42 = vmul.f32 %v4178_v22, %v4160_v6  ;;  %v4210_v2 = vmul.f32 %v8293_v24, %v4162_v7  ;;  %v4170_v41 = vmul.f32 %v8311_v18, %v8269_v44 }
 0x81c   : > { %v4215_v27 = vmul.f32 %v4190_v23, %v4167_v25  ;;  %v4209_v58 = vmul.f32 %v4178_v22, %v4161_v16  ;;  %v4171_v52 = vmul.f32 %v8313_v37, %v8271_v4  ;;  %v4211_v48 = vmul.f32 %v8293_v24, %v4163_v63  ;;  %v4206_v25 = vpop.permute.xlu1 %4205 }
 0x81d   : > { %v8332_v53 = vadd.f32 %v4238_v39, %v4214_v36  ;;  %v8334_v21 = vadd.f32 %v4226_v50, %v4208_v42  ;;  %v4168_v30 = vmul.f32 %v8311_v18, %v8265_v55  ;;  %v4169_v31 = vmul.f32 %v8313_v37, %v8267_v40  ;;  %v4234_v55 = vpop.permute.xlu0 %4233 }
 0x81e   : > { %v8341_v49 = vadd.f32 %v4238_v39, %v4215_v27  ;;  %v8348_v60 = vadd.f32 %v4226_v50, %v4209_v58  ;;  %v8354_v57 = vadd.f32 %v4230_v0, %v4210_v2  ;;  %v4212_v3 = vmul.f32 %v4186_v14, %v4164_v9 }
 0x81f   : > { %v4294_v23 = vmul.f32 0.044715, %v8332_v53  ;;  %v4288_v44 = vmul.f32 0.044715, %v8334_v21  ;;  %v4216_v4 = vmul.f32 %v4194_v43, %v4168_v30  ;;  %v4217_v20 = vmul.f32 %v4194_v43, %v4169_v31 }
 0x820   : > { %v4295_v28 = vmul.f32 0.044715, %v8341_v49  ;;  %v8358_v39 = vadd.f32 %v4230_v0, %v4211_v48  ;;  %v4213_v50 = vmul.f32 %v4186_v14, %v4165_v11  ;;  %v4289_v7 = vmul.f32 0.044715, %v8348_v60 }
 0x821   : > { %v4310_v24 = vmul.f32 %v4294_v23, %v8332_v53  ;;  %v4304_v1 = vmul.f32 %v4288_v44, %v8334_v21  ;;  %v8356_v40 = vadd.f32 %v4242_v61, %v4216_v4  ;;  %v4290_v35 = vmul.f32 0.044715, %v8354_v57  ;;  %v4246_v48 = vpop.permute.xlu0 %4245 }
 0x822   : > { %v4311_v43 = vmul.f32 %v4295_v28, %v8341_v49  ;;  %v8364_v6 = vadd.f32 %v4242_v61, %v4217_v20  ;;  %v4172_v9 = vmul.f32 %v8311_v18, %v8273_v38  ;;  %v4218_v36 = vmul.f32 %v4198_v33, %v4170_v41 }
 0x823   : > { %v4326_v22 = vmul.f32 %v4310_v24, %v8332_v53  ;;  %v4296_v63 = vmul.f32 0.044715, %v8356_v40  ;;  %v4320_v16 = vmul.f32 %v4304_v1, %v8334_v21  ;;  %v4306_v14 = vmul.f32 %v4290_v35, %v8354_v57  ;;  %v4254_v1 = vpop.permute.xlu1 %4253 }
 0x824   : > { %v4219_v11 = vmul.f32 %v4198_v33, %v4171_v52  ;;  %v4291_v0 = vmul.f32 0.044715, %v8358_v39  ;;  %v4173_v61 = vmul.f32 %v8313_v37, %v8275_v34  ;;  %v4305_v27 = vmul.f32 %v4289_v7, %v8348_v60 }
 0x825   : > { %v4312_v42 = vmul.f32 %v4296_v63, %v8356_v40  ;;  %v4342_v2 = vadd.f32 %v4326_v22, %v8332_v53  ;;  %v4322_v38 = vmul.f32 %v4306_v14, %v8354_v57  ;;  %v8378_v58 = vadd.f32 %v4234_v55, %v4212_v3 }
 0x826   : > { %v8381_v41 = vmul.f32 %v4311_v43, %v8341_v49  ;;  %v4297_v33 = vmul.f32 0.044715, %v8364_v6  ;;  %v8385_v30 = vadd.f32 %v4234_v55, %v4213_v50  ;;  %v8388_v34 = vadd.f32 %v4320_v16, %v8334_v21 }
 0x827   : > { %v4328_v52 = vmul.f32 %v4312_v42, %v8356_v40  ;;  %v4338_v31 = vadd.f32 %v4322_v38, %v8354_v57  ;;  %v4292_v23 = vmul.f32 0.044715, %v8378_v58  ;;  %v4174_v44 = vmul.f32 %v8311_v18, %v8245_v46 }
 0x828   : > { %v4307_v4 = vmul.f32 %v4291_v0, %v8358_v39  ;;  %v4175_v20 = vmul.f32 %v8313_v37, %v8254_v62  ;;  %v8398_v24 = vadd.f32 %v4246_v48, %v4218_v36  ;;  %v4358_v55 = vmul.f32 0.7978846, %v4342_v2  ;;  %v4250_v37 = vpop.permute.xlu0 %4249 }
 0x829   : > { %v4344_v28 = vadd.f32 %v4328_v52, %v8356_v40  ;;  %v4293_v3 = vmul.f32 0.044715, %v8385_v30  ;;  %v4308_v50 = vmul.f32 %v4292_v23, %v8378_v58  ;;  %v4222_v22 = vmul.f32 %v4206_v25, %v4174_v44 }
 0x82a   : > { %v4220_v7 = vmul.f32 %v4202_v54, %v4172_v9  ;;  %v4223_v35 = vmul.f32 %v4206_v25, %v4175_v20  ;;  %v8402_v43 = vadd.f32 %v4246_v48, %v4219_v11  ;;  %v4298_v46 = vmul.f32 0.044715, %v8398_v24 }
 0x82b   : > { %v4354_v18 = vmul.f32 0.7978846, %v4338_v31  ;;  %v4221_v63 = vmul.f32 %v4202_v54, %v4173_v61  ;;  %v4324_v16 = vmul.f32 %v4308_v50, %v8378_v58  ;;  %v4270_v62 = vadd.f32 %v4254_v1, %v4222_v22 }
 0x82c   : > { %v4360_v36 = vmul.f32 0.7978846, %v4344_v28  ;;  %v4323_v14 = vmul.f32 %v4307_v4, %v8358_v39  ;;  %v4314_v42 = vmul.f32 %v4298_v46, %v8398_v24  ;;  %v8408_v0 = vadd.f32 %v4254_v1, %v4223_v35 }
 0x82d   : > { %5247 = vtanh.f32 %v4358_v55  ;;  %v4309_v9 = vmul.f32 %v4293_v3, %v8385_v30  ;;  %v4340_v25 = vadd.f32 %v4324_v16, %v8378_v58  ;;  %v4302_v11 = vmul.f32 0.044715, %v4270_v62 }
 0x82e   : > { %v4299_v2 = vmul.f32 0.044715, %v8402_v43  ;;  %v4330_v54 = vmul.f32 %v4314_v42, %v8398_v24  ;;  %v4303_v61 = vmul.f32 0.044715, %v8408_v0  ;;  %v8415_v38 = vadd.f32 %v4250_v37, %v4220_v7 }
 0x82f   : > { %5249 = vtanh.f32 %v4354_v18  ;;  %v4356_v48 = vmul.f32 0.7978846, %v4340_v25  ;;  %v4318_v52 = vmul.f32 %v4302_v11, %v4270_v62  ;;  %v8417_v31 = vadd.f32 %v4250_v37, %v4221_v63 }
 0x830   : > { %v4313_v23 = vmul.f32 %v4297_v33, %v8364_v6  ;;  %5251 = vtanh.f32 %v4360_v36  ;;  %v4346_v44 = vadd.f32 %v4330_v54, %v8398_v24  ;;  %v4300_v28 = vmul.f32 0.044715, %v8415_v38 }
 0x831   : > { %v4325_v4 = vmul.f32 %v4309_v9, %v8385_v30  ;;  %5253 = vtanh.f32 %v4356_v48  ;;  %v4334_v20 = vmul.f32 %v4318_v52, %v4270_v62  ;;  %v4321_v1 = vmul.f32 %v4305_v27, %v8348_v60 }
 0x832   : > { %v4315_v55 = vmul.f32 %v4299_v2, %v8402_v43  ;;  %v4362_v3 = vmul.f32 0.7978846, %v4346_v44  ;;  %v4319_v50 = vmul.f32 %v4303_v61, %v8408_v0  ;;  %v4316_v22 = vmul.f32 %v4300_v28, %v8415_v38 }
 0x833   : > { %v4350_v7 = vadd.f32 %v4334_v20, %v4270_v62  ;;  %v4301_v33 = vmul.f32 0.044715, %v8417_v31  ;;  %v4337_v35 = vadd.f32 %v4321_v1, %v8348_v60  ;;  %v4339_v46 = vadd.f32 %v4323_v14, %v8358_v39 }
 0x834   : > { %5255 = vtanh.f32 %v4362_v3  ;;  %v4332_v18 = vmul.f32 %v4316_v22, %v8415_v38  ;;  %v4341_v37 = vadd.f32 %v4325_v4, %v8385_v30  ;;  %v4329_v36 = vmul.f32 %v4313_v23, %v8364_v6 }
 0x835   : > { %v4366_v63 = vmul.f32 0.7978846, %v4350_v7  ;;  %v4353_v16 = vmul.f32 0.7978846, %v4337_v35  ;;  %v4355_v27 = vmul.f32 0.7978846, %v4339_v46  ;;  %v4331_v42 = vmul.f32 %v4315_v55, %v8402_v43 }
 0x836   : > { %v4335_v9 = vmul.f32 %v4319_v50, %v8408_v0  ;;  %v4348_v25 = vadd.f32 %v4332_v18, %v8415_v38  ;;  %v4317_v14 = vmul.f32 %v4301_v33, %v8417_v31  ;;  %v4352_v2 = vmul.f32 0.7978846, %v8388_v34 }
 0x837   : > { %v5248_v11 = vpop.eup %5247  ;;  %5257 = vtanh.f32 %v4366_v63  ;;  %v4343_v54 = vadd.f32 %v8381_v41, %v8341_v49  ;;  %v4357_v48 = vmul.f32 0.7978846, %v4341_v37  ;;  %v4286_v23 = vmul.f32 0.5, %v4270_v62 }
 0x838   : > { %v4364_v61 = vmul.f32 0.7978846, %v4348_v25  ;;  %5259 = vtanh.f32 %v4353_v16  ;;  %v4351_v4 = vadd.f32 %v4335_v9, %v8408_v0  ;;  %v4278_v20 = vmul.f32 0.5, %v8332_v53 }
 0x839   : > { %v5250_v52 = vpop.eup %5249  ;;  %5261 = vtanh.f32 %v4355_v27  ;;  %v4359_v44 = vmul.f32 0.7978846, %v4343_v54  ;;  %v4390_v1 = vadd.f32 1.0, %v5248_v11  ;;  %v4333_v34 = vmul.f32 %v4317_v14, %v8417_v31 }
 0x83a   : > { %v5252_v28 = vpop.eup %5251  ;;  %5263 = vtanh.f32 %v4364_v61  ;;  %v4345_v41 = vadd.f32 %v4329_v36, %v8364_v6  ;;  %v4347_v3 = vadd.f32 %v4331_v42, %v8402_v43  ;;  %v4276_v62 = vmul.f32 0.5, %v8378_v58 }
 0x83b   : > { %v5254_v55 = vpop.eup %5253  ;;  %5265 = vtanh.f32 %v4352_v2  ;;  %v4406_v22 = vmul.f32 %v4390_v1, %v4278_v20  ;;  %v4386_v7 = vadd.f32 1.0, %v5250_v52  ;;  %v4280_v63 = vmul.f32 0.5, %v8356_v40 }
 0x83c   : > { %5267 = vtanh.f32 %v4357_v48  ;;  %v4388_v50 = vadd.f32 1.0, %v5254_v55  ;;  %v4361_v33 = vmul.f32 0.7978846, %v4345_v41  ;;  %v4363_v35 = vmul.f32 0.7978846, %v4347_v3 }
 0x83d   : > { %5269 = vtanh.f32 %v4359_v44  ;;  %v8447_v18 = vadd.f32 %v4406_v22, %v8170_v8  ;;  %v4392_v16 = vadd.f32 1.0, %v5252_v28  ;;  %v4282_v27 = vmul.f32 0.5, %v8398_v24 }
 0x83e   : > { %v5256_v46 = vpop.eup %5255  ;;  %v4404_v53 = vmul.f32 %v4388_v50, %v4276_v62  ;;  %5271 = vtanh.f32 %v4361_v33  ;;  %v4349_v58 = vadd.f32 %v4333_v34, %v8417_v31  ;;  %v4367_v9 = vmul.f32 0.7978846, %v4351_v4 }
 0x83f   : > { %v4394_v37 = vadd.f32 1.0, %v5256_v46  ;;  %5273 = vtanh.f32 %v4363_v35  ;;  %v4408_v42 = vmul.f32 %v4392_v16, %v4280_v63  ;;  %v4273_v11 = vmul.f32 0.5, %v8348_v60 }
 0x840   : > { %v8453_v36 = vadd.f32 %v4404_v53, %v8168_v5  ;;  %v4274_v8 = vmul.f32 0.5, %v8354_v57  ;;  %v4365_v40 = vmul.f32 0.7978846, %v4349_v58  ;;  %5275 = vtanh.f32 %v4367_v9 }
 0x841   : > { %v5258_v25 = vpop.eup %5257  ;;  %v4410_v14 = vmul.f32 %v4394_v37, %v4282_v27  ;;  %v8460_v54 = vadd.f32 %v4408_v42, %v8184_v13  ;;  %v4275_v48 = vmul.f32 0.5, %v8358_v39  ;;  %v4272_v28 = vmul.f32 0.5, %v8334_v21 }
 0x842   : > { %v5260_v2 = vpop.eup %5259  ;;  %v4435_v24 = vpack.c.bf16 %v8447_v18, %v8453_v36  ;;  %v4398_v5 = vadd.f32 1.0, %v5258_v25  ;;  %5277 = vtanh.f32 %v4365_v40  ;;  %v4402_v4 = vmul.f32 %v4386_v7, %v4274_v8 }
 0x843   : > { %v5262_v61 = vpop.eup %5261  ;;  %v4385_v52 = vadd.f32 1.0, %v5260_v2  ;;  %v8464_v44 = vadd.f32 %v4410_v14, %v8186_v12  ;;  %v4284_v34 = vmul.f32 0.5, %v8415_v38  ;;  %v4277_v12 = vmul.f32 0.5, %v8385_v30 }
 0x844   : > { %v5264_v60 = vpop.eup %5263  ;;  %v4387_v57 = vadd.f32 1.0, %v5262_v61  ;;  %v4414_v20 = vmul.f32 %v4398_v5, %v4286_v23  ;;  %v4279_v50 = vmul.f32 0.5, %v8341_v49  ;;  %v4418_v38 = vadd.f32 %v4402_v4, %v8158_v47 }
 0x845   : > { %v5266_v1 = vpop.eup %5265  ;;  %v4401_v55 = vmul.f32 %v4385_v52, %v4273_v11  ;;  %v4437_v13 = vpack.c.bf16 %v8464_v44, %v8460_v54  ;;  %v4396_v41 = vadd.f32 1.0, %v5264_v60  ;;  %v4281_v27 = vmul.f32 0.5, %v8364_v6  ;;  %v4443_v44 = vpop.permute.xlu0 %4442 }
 0x846   : > { %v5268_v39 = vpop.eup %5267  ;;  %v4403_v3 = vmul.f32 %v4387_v57, %v4275_v48  ;;  %v4384_v62 = vadd.f32 1.0, %v5266_v1  ;;  %v4430_v33 = vadd.f32 %v4414_v20, %v8204_v59  ;;  %v4287_v40 = vmul.f32 0.5, %v8408_v0 }
 0x847   : > { %v5270_v22 = vpop.eup %5269  ;;  %v4417_v21 = vadd.f32 %v4401_v55, %v8149_v29  ;;  %v4389_v7 = vadd.f32 1.0, %v5268_v39  ;;  %v4412_v23 = vmul.f32 %v4396_v41, %v4284_v34 }
 0x848   : > { %v4419_v35 = vadd.f32 %v4403_v3, %v8151_v19  ;;  %v4400_v46 = vmul.f32 %v4384_v62, %v4272_v28  ;;  %v4391_v53 = vadd.f32 1.0, %v5270_v22  ;;  %v5272_v63 = vpop.eup %5271  ;;  %v4283_v19 = vmul.f32 0.5, %v8402_v43 }
 0x849   : > { %v4405_v16 = vmul.f32 %v4389_v7, %v4277_v12  ;;  %v4428_v30 = vadd.f32 %v4412_v23, %v8200_v51  ;;  %v5274_v49 = vpop.eup %5273  ;;  %v4393_v42 = vadd.f32 1.0, %v5272_v63 }
 0x84a   : > { %v4434_v37 = vpack.c.bf16 %v4419_v35, %v4417_v21  ;;  %v4416_v29 = vadd.f32 %v4400_v46, %v8154_v32  ;;  %v4407_v58 = vmul.f32 %v4391_v53, %v4279_v50  ;;  %v4395_v9 = vadd.f32 1.0, %v5274_v49  ;;  %v5276_v47 = vpop.eup %5275 }
 0x84b   : > { %v4421_v59 = vadd.f32 %v4405_v16, %v8172_v15  ;;  %v4439_v25 = vpack.c.bf16 %v4430_v33, %v4428_v30  ;;  %v4409_v6 = vmul.f32 %v4393_v42, %v4281_v27  ;;  %v4399_v2 = vadd.f32 1.0, %v5276_v47 }
 0x84c   : > { %4448 = vmatprep.subr.bf16.mxu1 %v4434_v37  ;;  %v4433_v11 = vpack.c.bf16 %v4418_v38, %v4416_v29  ;;  %v4423_v8 = vadd.f32 %v4407_v58, %v8166_v45  ;;  %v5278_v14 = vpop.eup %5277  ;;  %v4411_v51 = vmul.f32 %v4395_v9, %v4283_v19  ;;  %v4285_v15 = vmul.f32 0.5, %v8417_v31  ;;  %v8782_v31 = vld [vmem:[#allocation2_spill] sm:$0xff] }
 0x84d   : > { %v4425_v54 = vadd.f32 %v4409_v6, %v8182_v56  ;;  %v4397_v43 = vadd.f32 1.0, %v5278_v14  ;;  %v4415_v61 = vmul.f32 %v4399_v2, %v4287_v40 }
 0x84e   : > { %4449 = vmatpush1.bf16.msra.mxu1 %v4433_v11  ;;  %v4436_v32 = vpack.c.bf16 %v4423_v8, %v4421_v59  ;;  %v4427_v5 = vadd.f32 %v4411_v51, %v8188_v17  ;;  %v4432_v17 = vld [vmem:[%s8518_s9] sm:$0x1] }
 0x84f   : > { %v4413_v48 = vmul.f32 %v4397_v43, %v4285_v15  ;;  %v4431_v52 = vadd.f32 %v4415_v61, %v8202_v26  ;;  %v4501_v26 = vcombine.high %v8782_v31, %v8782_v31 }
 0x850   : > { %4450 = vmatprep.subr.bf16.mxu1 %v4436_v32  ;;  %v4438_v45 = vpack.c.bf16 %v4427_v5, %v4425_v54 }
 0x851   : > { %v4429_v0 = vadd.f32 %v4413_v48, %v8198_v10  ;;  %4504 = vst [vmem:[%s7298_s29 + $0x8] sm:$0x7] %v4501_v26 }
 0x852   : > { %4451 = vmatpush1.bf16.msra.mxu1 %v4435_v24 }
 0x853   : > { %4452 = vmatprep.subr.bf16.mxu1 %v4438_v45  ;;  %v4440_v56 = vpack.c.bf16 %v4431_v52, %v4429_v0 }
 0x856   : > { %4453 = vmatpush1.bf16.msra.mxu1 %v4437_v13 }
 0x857   : > { %4454 = vmatprep.subr.bf16.mxu1 %v4440_v56 }
 0x85a   : > { %4455 = vmatpush1.bf16.msra.mxu1 %v4439_v25 }
 0x85d   : > { %4750 = vmatmul.mubr.msk.bf16.vlgmr.msra.gmra.mrb[32].mxu1 %vm1305_vm5, %v4432_v17 }
 0x930   : > { %v4482_v18 = vpop.f32.mrb[32].mxu1 }
 0x931   : > { %v4484_v36 = vpop.f32.mrb[33].mxu1  ;;  %v4483_v24 = vadd.f32 %v4482_v18, %v4443_v44 }
 0x932   : > { %v4486_v10 = vpop.f32.mrb[34].mxu1  ;;  %v4485_v60 = vadd.f32 %v4484_v36, %v4443_v44 }
 0x933   : > { %v4751_v57 = vmul.f32 -1.442695, %v4483_v24  ;;  %v4487_v28 = vpop.f32.mrb[35].mxu1 }
 0x934   : > { %v4752_v4 = vmul.f32 -1.442695, %v4485_v60 }
 0x935   : > { %5279 = vpow2.f32 %v4751_v57 }
 0x936   : > { %5281 = vpow2.f32 %v4752_v4 }
 0x93f   : > { %v5280_v20 = vpop.eup %5279 }
 0x940   : > { %v5282_v1 = vpop.eup %5281  ;;  %v4495_v55 = vadd.f32 1.0, %v5280_v20 }
 0x941   : > { %v4496_v13 = vadd.f32 1.0, %v5282_v1 }
 0x942   : > { %5283 = vrcp.f32 %v4495_v55 }
 0x943   : > { %5285 = vrcp.f32 %v4496_v13 }
 0x94c   : > { %v5284_v34 = vpop.eup %5283 }
 0x94d   : > { %v5286_v41 = vpop.eup %5285  ;;  %v4515_v39 = vrot.slane %v5284_v34, 3 }
 0x94e   : > { %v4516_v3 = vrot.slane %v5286_v41, 3 }
 0x94f   : > { %4519 = vst [vmem:[%s7298_s29] sm:$0x60] %v4515_v39 }
 0x950   : > { %4520 = vst [vmem:[%s7298_s29 + $0x8] sm:$0x60] %v4516_v3 }
 0x951 PF: > { %s21_s19 = sadd.s32 1, %s5326_s19   ;;  %s8783_s17 = smov %s5322_s18 }
 0x952   : > { %p18_p5 = scmp.ge.s32.totalorder %s21_s19, 4   ;;  %s8784_s18 = smov %s8786_s20 }
 0x954   :  { %20 = sbr.rel (!%p18_p5) target bundleno = 2 (0x2), region = 104 }

</bundles_post_ra>
